<compile_context>
chip_gen: v5e
topology: v5e:2x2
jax: 0.10.0
libtpu: 0.0.40
codegen_flags: <defaults>
</compile_context>

<pallas_src>
import functools

import jax
import jax.numpy as jnp
from jax.experimental import pallas as pl
from jax.experimental.pallas import tpu as pltpu

BN_EPS = 1e-5
LANE = 128


def _round_up(x, m):
    return (x + m - 1) // m * m


@functools.lru_cache(maxsize=None)
def _vmem_limit():
    """Generation-aware VMEM budget (128 MiB on v5e/v6e, 64 MiB per TC on v7x)."""
    cap = None
    try:
        cap = getattr(pltpu.get_tpu_info(), "vmem_capacity_bytes", None)
    except Exception:
        cap = None
    if not cap:
        cap = 64 * 1024 * 1024
    return max(32 * 1024 * 1024, min(int(cap) * 3 // 4, 100 * 1024 * 1024))


def _pick_row_tile(h, w, cp, co, budget):
    """Largest divisor of H whose per-step VMEM footprint fits the budget.

    Prefers >= 2 row tiles so the second grid axis keeps both v7x TensorCores
    busy even at batch size 1."""
    def est(th):
        x_blk = 2 * h * w * cp * 2                 # resident bf16 sample, 2 bufs
        w_blk = 2 * 9 * cp * co * 2                # weights, 2 bufs
        o_blk = 2 * (th * w * co * 2 + 2 * co * 4)
        slab = (th + 2) * (w + 2) * cp * (2 + 4)   # bf16 slab + f32 prenorm temp
        patch = th * w * 9 * cp * 2                # im2col scratch
        acc = 2 * th * w * co * 4                  # f32 acc + acc*acc temp
        return x_blk + w_blk + o_blk + slab + patch + acc

    divisors = [d for d in range(h, 0, -1) if h % d == 0]
    fitting = [d for d in divisors if est(d) <= budget]
    if not fitting:
        return 1
    multi = [d for d in fitting if h // d >= 2]
    return multi[0] if multi else fitting[0]


# ----------------------------- Pallas kernels ------------------------------ #
def _conv3x3_stats_kernel(*refs, TH, H, W, prenorm):
    """One (batch, row-tile) cell: reflect halo + im2col + one K=9*Cp matmul.

    Optionally folds the previous layer's BatchNorm (per-channel scale/shift)
    + ReLU into the input read, and always emits per-channel sum / sum-of-sq
    of the f32 conv output so BN batch stats need no extra HBM pass."""
    if prenorm:
        (x_ref, w_ref, scale_ref, shift_ref,
         o_ref, s_ref, ss_ref, slab_ref, patch_ref) = refs
    else:
        x_ref, w_ref, o_ref, s_ref, ss_ref, slab_ref, patch_ref = refs

    cp = x_ref.shape[-1]
    co = w_ref.shape[-1]

    r = pl.program_id(1)
    row0 = pl.multiple_of(r * TH, TH)
    # Reflection indices for the 1-row halo (PyTorch ReflectionPad2d(1)).
    top_i = jnp.where(row0 == 0, 1, row0 - 1)
    bot_i = jnp.where(row0 + TH >= H, H - 2, row0 + TH)

    # Assemble the (TH+2, W+2, Cp) reflection-padded slab in VMEM; column
    # reflection reuses the freshly written rows (separable reflect pad).
    slab_ref[0:1, 1:W + 1] = x_ref[0, pl.ds(top_i, 1)]
    slab_ref[1:TH + 1, 1:W + 1] = x_ref[0, pl.ds(row0, TH)]
    slab_ref[TH + 1:TH + 2, 1:W + 1] = x_ref[0, pl.ds(bot_i, 1)]
    slab_ref[:, 0:1] = slab_ref[:, 2:3]
    slab_ref[:, W + 1:W + 2] = slab_ref[:, W - 1:W]

    slab = slab_ref[...]                                   # (TH+2, W+2, Cp) bf16
    if prenorm:
        # Folded BN of the previous conv + ReLU (per-channel, so it commutes
        # with the reflection padding).
        slab = jnp.maximum(
            slab.astype(jnp.float32) * scale_ref[...] + shift_ref[...], 0.0
        ).astype(jnp.bfloat16)

    # im2col: pack the 9 taps along K (lane-aligned 128-wide column blocks) so
    # the whole 3x3 conv of this tile is a single K=9*Cp MXU matmul.
    for kh in range(3):
        for kw in range(3):
            tap = slab[kh:kh + TH, kw:kw + W, :]
            patch_ref[:, (kh * 3 + kw) * cp:(kh * 3 + kw + 1) * cp] = (
                tap.reshape(TH * W, cp))

    acc = jnp.dot(patch_ref[...], w_ref[...],
                  preferred_element_type=jnp.float32)       # (TH*W, Co) f32

    o_ref[0] = acc.reshape(TH, W, co).astype(o_ref.dtype)   # bf16 to HBM
    s_ref[0, 0] = jnp.sum(acc, axis=0, keepdims=True)
    ss_ref[0, 0] = jnp.sum(acc * acc, axis=0, keepdims=True)


def _bn_residual_kernel(y_ref, scale_ref, shift_ref, res_ref, o_ref):
    # Folded BatchNorm of the second conv + residual add, one lane-dense pass.
    o_ref[...] = (y_ref[...].astype(jnp.float32) * scale_ref[...]
                  + shift_ref[...] + res_ref[...])


# ------------------------------ Pallas wrappers ----------------------------- #
def conv3x3_with_stats(x_nhwc, wmat, scale=None, shift=None, *, row_tile):
    """x_nhwc: (N, H, W, Cp) bf16 (unpadded spatially).  wmat: (9*Cp, Co) bf16.

    Returns the conv output (N, H, W, Co) bf16 plus batch mean / inv-std of
    the f32 conv output (biased variance, training-mode BatchNorm)."""
    n, h, w, cp = x_nhwc.shape
    co = wmat.shape[-1]
    rt = h // row_tile
    prenorm = scale is not None

    in_specs = [
        # Whole bf16 sample stays resident across the row-tile axis; Pallas
        # re-DMAs it only when the batch index changes.
        pl.BlockSpec((1, h, w, cp), lambda b, r: (b, 0, 0, 0)),
        pl.BlockSpec((9 * cp, co), lambda b, r: (0, 0)),
    ]
    args = [x_nhwc, wmat]
    if prenorm:
        in_specs += [
            pl.BlockSpec((1, 1, cp), lambda b, r: (0, 0, 0)),
            pl.BlockSpec((1, 1, cp), lambda b, r: (0, 0, 0)),
        ]
        args += [scale.reshape(1, 1, cp), shift.reshape(1, 1, cp)]

    kern = functools.partial(_conv3x3_stats_kernel, TH=row_tile, H=h, W=w,
                             prenorm=prenorm)
    y, s, ss = pl.pallas_call(
        kern,
        out_shape=(
            jax.ShapeDtypeStruct((n, h, w, co), jnp.bfloat16),
            jax.ShapeDtypeStruct((n, rt, 1, co), jnp.float32),
            jax.ShapeDtypeStruct((n, rt, 1, co), jnp.float32),
        ),
        grid=(n, rt),
        in_specs=in_specs,
        out_specs=(
            pl.BlockSpec((1, row_tile, w, co), lambda b, r: (b, r, 0, 0)),
            pl.BlockSpec((1, 1, 1, co), lambda b, r: (b, r, 0, 0)),
            pl.BlockSpec((1, 1, 1, co), lambda b, r: (b, r, 0, 0)),
        ),
        scratch_shapes=[
            pltpu.VMEM((row_tile + 2, w + 2, cp), jnp.bfloat16),   # halo slab
            pltpu.VMEM((row_tile * w, 9 * cp), jnp.bfloat16),      # im2col patch
        ],
        compiler_params=pltpu.CompilerParams(
            dimension_semantics=("parallel", "parallel"),
            vmem_limit_bytes=_vmem_limit()),
    )(*args)

    count = n * h * w
    mean = jnp.sum(s, axis=(0, 1, 2)) / count
    ex2 = jnp.sum(ss, axis=(0, 1, 2)) / count
    # TODO(synk): E[x^2]-E[x]^2 in f32 can cancel for very large activations;
    # a Welford/compensated accumulation would be safer at huge N*H*W.
    var = jnp.maximum(ex2 - mean * mean, 0.0)   # biased var (PyTorch training BN)
    invstd = jax.lax.rsqrt(var + BN_EPS)
    return y, mean, invstd


def bn_residual(y_bf16, scale, shift, res_f32, *, row_tile):
    """out = y * scale + shift + res, streamed tile-by-tile (no pad copies)."""
    n, h, w, cp = y_bf16.shape
    rt = h // row_tile
    return pl.pallas_call(
        _bn_residual_kernel,
        out_shape=jax.ShapeDtypeStruct((n, h, w, cp), jnp.float32),
        grid=(n, rt),
        in_specs=[
            pl.BlockSpec((1, row_tile, w, cp), lambda b, r: (b, r, 0, 0)),
            pl.BlockSpec((1, 1, cp), lambda b, r: (0, 0, 0)),
            pl.BlockSpec((1, 1, cp), lambda b, r: (0, 0, 0)),
            pl.BlockSpec((1, row_tile, w, cp), lambda b, r: (b, r, 0, 0)),
        ],
        out_specs=pl.BlockSpec((1, row_tile, w, cp), lambda b, r: (b, r, 0, 0)),
        compiler_params=pltpu.CompilerParams(
            dimension_semantics=("parallel", "parallel"),
            vmem_limit_bytes=_vmem_limit()),
    )(y_bf16, scale.reshape(1, 1, cp), shift.reshape(1, 1, cp), res_f32)


# ------------------------------- JAX glue ----------------------------------- #
def _prep_weight(w, cp):
    # PyTorch (Cout, Cin, 3, 3) -> (9*Cp, Cp) bf16, taps stacked along K in
    # (kh, kw, cin) order to match the in-kernel im2col packing.
    co, ci, kh, kw = w.shape
    wm = jnp.transpose(w, (2, 3, 1, 0))                      # (3, 3, Ci, Co)
    wm = jnp.pad(wm, ((0, 0), (0, 0), (0, cp - ci), (0, cp - co)))
    return wm.reshape(9 * cp, cp).astype(jnp.bfloat16)


def _pad_vec(v, cp):
    return jnp.pad(v.astype(jnp.float32), (0, cp - v.shape[0]))


def resblock_forward(params, x_nchw):
    n, c, h, w = x_nchw.shape
    cp = _round_up(c, LANE)
    # NCHW -> NHWC once; channels zero-padded to 128 lanes.  gamma/beta are
    # zero-padded too, so padded lanes stay exactly zero through both convs.
    x = jnp.transpose(x_nchw, (0, 2, 3, 1)).astype(jnp.float32)
    x = jnp.pad(x, ((0, 0), (0, 0), (0, 0), (0, cp - c)))
    x_bf = x.astype(jnp.bfloat16)                            # conv1 operand

    w1 = _prep_weight(params["w1"], cp)
    w2 = _prep_weight(params["w2"], cp)
    g1, b1 = _pad_vec(params["gamma1"], cp), _pad_vec(params["beta1"], cp)
    g2, b2 = _pad_vec(params["gamma2"], cp), _pad_vec(params["beta2"], cp)

    th = _pick_row_tile(h, w, cp, cp, _vmem_limit())

    # conv1 (reflect pad + 3x3 conv) with fused BN batch-stat accumulation.
    y1, mean1, invstd1 = conv3x3_with_stats(x_bf, w1, row_tile=th)
    scale1 = g1 * invstd1
    shift1 = b1 - mean1 * scale1

    # conv2: BN1-normalize + ReLU folded into the conv kernel's input read.
    y2, mean2, invstd2 = conv3x3_with_stats(y1, w2, scale1, shift1, row_tile=th)
    scale2 = g2 * invstd2
    shift2 = b2 - mean2 * scale2

    # BN2-normalize + residual add in one streaming pass (f32 residual).
    out = bn_residual(y2, scale2, shift2, x, row_tile=th)
    return jnp.transpose(out[..., :c], (0, 3, 1, 2))         # back to NCHW

# TODO(synk): for very large images the whole bf16 sample is still resident in
# the conv input block; a manual halo DMA (memory_space=pl.ANY +
# pltpu.make_async_copy) would bound input residency to TH+2 rows as well.
# TODO(synk): for C << 128 the 9 taps could share one 128-wide K block
# (K = 9*C) to avoid per-tap lane padding waste.


def init_resblock_params(key, c):
    k1, k2 = jax.random.split(key)
    std = (2.0 / (c * 9)) ** 0.5
    return dict(
        w1=jax.random.normal(k1, (c, c, 3, 3), jnp.float32) * std,
        w2=jax.random.normal(k2, (c, c, 3, 3), jnp.float32) * std,
        gamma1=jnp.ones((c,), jnp.float32), beta1=jnp.zeros((c,), jnp.float32),
        gamma2=jnp.ones((c,), jnp.float32), beta2=jnp.zeros((c,), jnp.float32),
    )


def resblock_reference(params, x):
    # Pure-JAX fp32 reference of the PyTorch ResBlock forward (training-mode BN).
    def conv3x3(z, wgt):
        zp = jnp.pad(z, ((0, 0), (0, 0), (1, 1), (1, 1)), mode="reflect")
        return jax.lax.conv_general_dilated(
            zp, wgt, (1, 1), "VALID",
            dimension_numbers=("NCHW", "OIHW", "NCHW"))

    def bn(z, gamma, beta):
        mean = jnp.mean(z, axis=(0, 2, 3), keepdims=True)
        var = jnp.mean((z - mean) ** 2, axis=(0, 2, 3), keepdims=True)
        zn = (z - mean) * jax.lax.rsqrt(var + BN_EPS)
        return zn * gamma.reshape(1, -1, 1, 1) + beta.reshape(1, -1, 1, 1)

    y = jnp.maximum(bn(conv3x3(x, params["w1"]), params["gamma1"],
                       params["beta1"]), 0.0)
    y = bn(conv3x3(y, params["w2"]), params["gamma2"], params["beta2"])
    return x + y


if __name__ == "__main__":
    key = jax.random.PRNGKey(0)
    pkey, xkey = jax.random.split(key)
    in_channels = 4
    params = init_resblock_params(pkey, in_channels)
    x = jax.random.normal(xkey, (2, in_channels, 16, 16), jnp.float32)  # NCHW

    fwd = jax.jit(resblock_forward)
    out = jax.block_until_ready(fwd(params, x))
    assert out.shape == x.shape, out.shape

    ref = jax.block_until_ready(resblock_reference(params, x))
    err = float(jnp.max(jnp.abs(out - ref)))
    assert err < 1e-1, f"max abs error vs fp32 reference: {err}"
    print("KERNEL_OK")
</pallas_src>

<mosaic_0001>
module attributes {stable_mosaic.version = 11 : i64} {
  func.func @_conv3x3_stats_kernel(%arg0: i32, %arg1: i32, %arg2: memref<1x16x16x128xbf16, #tpu.memory_space<vmem>>, %arg3: memref<1152x128xbf16, #tpu.memory_space<vmem>>, %arg4: memref<1x8x16x128xbf16, #tpu.memory_space<vmem>>, %arg5: memref<1x1x1x128xf32, #tpu.memory_space<vmem>>, %arg6: memref<1x1x1x128xf32, #tpu.memory_space<vmem>>, %arg7: memref<10x18x128xbf16, #tpu.memory_space<vmem>>, %arg8: memref<128x1152xbf16, #tpu.memory_space<vmem>>) attributes {dimension_semantics = [#tpu.dimension_semantics<parallel>, #tpu.dimension_semantics<parallel>], iteration_bounds = array<i64: 2, 2>, scalar_prefetch = 0 : i64, scratch_operands = 2 : i64, tpu.core_type = #tpu.core_type<tc>, window_params = [{transform_indices = @transform_0, window_bounds = array<i64: 1, 16, 16, 128>}, {pipeline_mode = #tpu.pipeline_mode<synchronous>, transform_indices = @transform_1, window_bounds = array<i64: 1152, 128>}, {transform_indices = @transform_2, window_bounds = array<i64: 1, 8, 16, 128>}, {transform_indices = @transform_3, window_bounds = array<i64: 1, 1, 1, 128>}, {transform_indices = @transform_4, window_bounds = array<i64: 1, 1, 1, 128>}]} {
    %c8_i32 = arith.constant 8 : i32
    %0 = arith.muli %arg1, %c8_i32 : i32
    %1 = tpu.assume_multiple %0, 8 : i32
    %c0_i32 = arith.constant 0 : i32
    %2 = arith.cmpi eq, %1, %c0_i32 : i32
    %c1_i32 = arith.constant 1 : i32
    %3 = arith.subi %1, %c1_i32 : i32
    %c1_i32_0 = arith.constant 1 : i32
    %4 = arith.select %2, %c1_i32_0, %3 : i32
    %c8_i32_1 = arith.constant 8 : i32
    %5 = arith.addi %1, %c8_i32_1 : i32
    %c16_i32 = arith.constant 16 : i32
    %6 = arith.cmpi sge, %5, %c16_i32 : i32
    %c8_i32_2 = arith.constant 8 : i32
    %7 = arith.addi %1, %c8_i32_2 : i32
    %c14_i32 = arith.constant 14 : i32
    %8 = arith.select %6, %c14_i32, %7 : i32
    %c0 = arith.constant 0 : index
    %9 = arith.index_cast %4 : i32 to index
    %c0_3 = arith.constant 0 : index
    %c0_4 = arith.constant 0 : index
    %10 = vector.load %arg2[%c0, %9, %c0_3, %c0_4] : memref<1x16x16x128xbf16, #tpu.memory_space<vmem>>, vector<1x1x16x128xbf16>
    %11 = vector.shape_cast %10 : vector<1x1x16x128xbf16> to vector<1x16x128xbf16>
    %c0_5 = arith.constant 0 : index
    %c1 = arith.constant 1 : index
    %c0_6 = arith.constant 0 : index
    %12 = vector.load %arg7[%c0_5, %c1, %c0_6] : memref<10x18x128xbf16, #tpu.memory_space<vmem>>, vector<1x16x128xbf16>
    tpu.vector_store %arg7[%c0_5, %c1, %c0_6], %11 {strides = array<i32>} : memref<10x18x128xbf16, #tpu.memory_space<vmem>>, vector<1x16x128xbf16>,
    %c0_7 = arith.constant 0 : index
    %13 = arith.index_cast %1 : i32 to index
    %c0_8 = arith.constant 0 : index
    %c0_9 = arith.constant 0 : index
    %14 = vector.load %arg2[%c0_7, %13, %c0_8, %c0_9] : memref<1x16x16x128xbf16, #tpu.memory_space<vmem>>, vector<1x8x16x128xbf16>
    %15 = vector.shape_cast %14 : vector<1x8x16x128xbf16> to vector<8x16x128xbf16>
    %c1_10 = arith.constant 1 : index
    %c1_11 = arith.constant 1 : index
    %c0_12 = arith.constant 0 : index
    %16 = vector.load %arg7[%c1_10, %c1_11, %c0_12] : memref<10x18x128xbf16, #tpu.memory_space<vmem>>, vector<8x16x128xbf16>
    tpu.vector_store %arg7[%c1_10, %c1_11, %c0_12], %15 {strides = array<i32>} : memref<10x18x128xbf16, #tpu.memory_space<vmem>>, vector<8x16x128xbf16>,
    %c0_13 = arith.constant 0 : index
    %17 = arith.index_cast %8 : i32 to index
    %c0_14 = arith.constant 0 : index
    %c0_15 = arith.constant 0 : index
    %18 = vector.load %arg2[%c0_13, %17, %c0_14, %c0_15] : memref<1x16x16x128xbf16, #tpu.memory_space<vmem>>, vector<1x1x16x128xbf16>
    %19 = vector.shape_cast %18 : vector<1x1x16x128xbf16> to vector<1x16x128xbf16>
    %c9 = arith.constant 9 : index
    %c1_16 = arith.constant 1 : index
    %c0_17 = arith.constant 0 : index
    %20 = vector.load %arg7[%c9, %c1_16, %c0_17] : memref<10x18x128xbf16, #tpu.memory_space<vmem>>, vector<1x16x128xbf16>
    tpu.vector_store %arg7[%c9, %c1_16, %c0_17], %19 {strides = array<i32>} : memref<10x18x128xbf16, #tpu.memory_space<vmem>>, vector<1x16x128xbf16>,
    %c0_18 = arith.constant 0 : index
    %c2 = arith.constant 2 : index
    %c0_19 = arith.constant 0 : index
    %21 = vector.load %arg7[%c0_18, %c2, %c0_19] : memref<10x18x128xbf16, #tpu.memory_space<vmem>>, vector<10x1x128xbf16>
    %c0_20 = arith.constant 0 : index
    %c0_21 = arith.constant 0 : index
    %c0_22 = arith.constant 0 : index
    %22 = vector.load %arg7[%c0_20, %c0_21, %c0_22] : memref<10x18x128xbf16, #tpu.memory_space<vmem>>, vector<10x1x128xbf16>
    tpu.vector_store %arg7[%c0_20, %c0_21, %c0_22], %21 {strides = array<i32>} : memref<10x18x128xbf16, #tpu.memory_space<vmem>>, vector<10x1x128xbf16>,
    %c0_23 = arith.constant 0 : index
    %c15 = arith.constant 15 : index
    %c0_24 = arith.constant 0 : index
    %23 = vector.load %arg7[%c0_23, %c15, %c0_24] : memref<10x18x128xbf16, #tpu.memory_space<vmem>>, vector<10x1x128xbf16>
    %c0_25 = arith.constant 0 : index
    %c17 = arith.constant 17 : index
    %c0_26 = arith.constant 0 : index
    %24 = vector.load %arg7[%c0_25, %c17, %c0_26] : memref<10x18x128xbf16, #tpu.memory_space<vmem>>, vector<10x1x128xbf16>
    tpu.vector_store %arg7[%c0_25, %c17, %c0_26], %23 {strides = array<i32>} : memref<10x18x128xbf16, #tpu.memory_space<vmem>>, vector<10x1x128xbf16>,
    %c0_27 = arith.constant 0 : index
    %c0_28 = arith.constant 0 : index
    %c0_29 = arith.constant 0 : index
    %25 = vector.load %arg7[%c0_27, %c0_28, %c0_29] : memref<10x18x128xbf16, #tpu.memory_space<vmem>>, vector<10x18x128xbf16>
    %26 = vector.extract_strided_slice %25 {offsets = [0, 0, 0], sizes = [8, 16, 128], strides = [1, 1, 1]} : vector<10x18x128xbf16> to vector<8x16x128xbf16>
    %27 = vector.shape_cast %26 : vector<8x16x128xbf16> to vector<128x128xbf16>
    %c0_30 = arith.constant 0 : index
    %c0_31 = arith.constant 0 : index
    %28 = vector.load %arg8[%c0_30, %c0_31] : memref<128x1152xbf16, #tpu.memory_space<vmem>>, vector<128x128xbf16>
    tpu.vector_store %arg8[%c0_30, %c0_31], %27 {strides = array<i32>} : memref<128x1152xbf16, #tpu.memory_space<vmem>>, vector<128x128xbf16>,
    %29 = vector.extract_strided_slice %25 {offsets = [0, 1, 0], sizes = [8, 16, 128], strides = [1, 1, 1]} : vector<10x18x128xbf16> to vector<8x16x128xbf16>
    %30 = vector.shape_cast %29 : vector<8x16x128xbf16> to vector<128x128xbf16>
    %c0_32 = arith.constant 0 : index
    %c128 = arith.constant 128 : index
    %31 = vector.load %arg8[%c0_32, %c128] : memref<128x1152xbf16, #tpu.memory_space<vmem>>, vector<128x128xbf16>
    tpu.vector_store %arg8[%c0_32, %c128], %30 {strides = array<i32>} : memref<128x1152xbf16, #tpu.memory_space<vmem>>, vector<128x128xbf16>,
    %32 = vector.extract_strided_slice %25 {offsets = [0, 2, 0], sizes = [8, 16, 128], strides = [1, 1, 1]} : vector<10x18x128xbf16> to vector<8x16x128xbf16>
    %33 = vector.shape_cast %32 : vector<8x16x128xbf16> to vector<128x128xbf16>
    %c0_33 = arith.constant 0 : index
    %c256 = arith.constant 256 : index
    %34 = vector.load %arg8[%c0_33, %c256] : memref<128x1152xbf16, #tpu.memory_space<vmem>>, vector<128x128xbf16>
    tpu.vector_store %arg8[%c0_33, %c256], %33 {strides = array<i32>} : memref<128x1152xbf16, #tpu.memory_space<vmem>>, vector<128x128xbf16>,
    %35 = vector.extract_strided_slice %25 {offsets = [1, 0, 0], sizes = [8, 16, 128], strides = [1, 1, 1]} : vector<10x18x128xbf16> to vector<8x16x128xbf16>
    %36 = vector.shape_cast %35 : vector<8x16x128xbf16> to vector<128x128xbf16>
    %c0_34 = arith.constant 0 : index
    %c384 = arith.constant 384 : index
    %37 = vector.load %arg8[%c0_34, %c384] : memref<128x1152xbf16, #tpu.memory_space<vmem>>, vector<128x128xbf16>
    tpu.vector_store %arg8[%c0_34, %c384], %36 {strides = array<i32>} : memref<128x1152xbf16, #tpu.memory_space<vmem>>, vector<128x128xbf16>,
    %38 = vector.extract_strided_slice %25 {offsets = [1, 1, 0], sizes = [8, 16, 128], strides = [1, 1, 1]} : vector<10x18x128xbf16> to vector<8x16x128xbf16>
    %39 = vector.shape_cast %38 : vector<8x16x128xbf16> to vector<128x128xbf16>
    %c0_35 = arith.constant 0 : index
    %c512 = arith.constant 512 : index
    %40 = vector.load %arg8[%c0_35, %c512] : memref<128x1152xbf16, #tpu.memory_space<vmem>>, vector<128x128xbf16>
    tpu.vector_store %arg8[%c0_35, %c512], %39 {strides = array<i32>} : memref<128x1152xbf16, #tpu.memory_space<vmem>>, vector<128x128xbf16>,
    %41 = vector.extract_strided_slice %25 {offsets = [1, 2, 0], sizes = [8, 16, 128], strides = [1, 1, 1]} : vector<10x18x128xbf16> to vector<8x16x128xbf16>
    %42 = vector.shape_cast %41 : vector<8x16x128xbf16> to vector<128x128xbf16>
    %c0_36 = arith.constant 0 : index
    %c640 = arith.constant 640 : index
    %43 = vector.load %arg8[%c0_36, %c640] : memref<128x1152xbf16, #tpu.memory_space<vmem>>, vector<128x128xbf16>
    tpu.vector_store %arg8[%c0_36, %c640], %42 {strides = array<i32>} : memref<128x1152xbf16, #tpu.memory_space<vmem>>, vector<128x128xbf16>,
    %44 = vector.extract_strided_slice %25 {offsets = [2, 0, 0], sizes = [8, 16, 128], strides = [1, 1, 1]} : vector<10x18x128xbf16> to vector<8x16x128xbf16>
    %45 = vector.shape_cast %44 : vector<8x16x128xbf16> to vector<128x128xbf16>
    %c0_37 = arith.constant 0 : index
    %c768 = arith.constant 768 : index
    %46 = vector.load %arg8[%c0_37, %c768] : memref<128x1152xbf16, #tpu.memory_space<vmem>>, vector<128x128xbf16>
    tpu.vector_store %arg8[%c0_37, %c768], %45 {strides = array<i32>} : memref<128x1152xbf16, #tpu.memory_space<vmem>>, vector<128x128xbf16>,
    %47 = vector.extract_strided_slice %25 {offsets = [2, 1, 0], sizes = [8, 16, 128], strides = [1, 1, 1]} : vector<10x18x128xbf16> to vector<8x16x128xbf16>
    %48 = vector.shape_cast %47 : vector<8x16x128xbf16> to vector<128x128xbf16>
    %c0_38 = arith.constant 0 : index
    %c896 = arith.constant 896 : index
    %49 = vector.load %arg8[%c0_38, %c896] : memref<128x1152xbf16, #tpu.memory_space<vmem>>, vector<128x128xbf16>
    tpu.vector_store %arg8[%c0_38, %c896], %48 {strides = array<i32>} : memref<128x1152xbf16, #tpu.memory_space<vmem>>, vector<128x128xbf16>,
    %50 = vector.extract_strided_slice %25 {offsets = [2, 2, 0], sizes = [8, 16, 128], strides = [1, 1, 1]} : vector<10x18x128xbf16> to vector<8x16x128xbf16>
    %51 = vector.shape_cast %50 : vector<8x16x128xbf16> to vector<128x128xbf16>
    %c0_39 = arith.constant 0 : index
    %c1024 = arith.constant 1024 : index
    %52 = vector.load %arg8[%c0_39, %c1024] : memref<128x1152xbf16, #tpu.memory_space<vmem>>, vector<128x128xbf16>
    tpu.vector_store %arg8[%c0_39, %c1024], %51 {strides = array<i32>} : memref<128x1152xbf16, #tpu.memory_space<vmem>>, vector<128x128xbf16>,
    %c0_40 = arith.constant 0 : index
    %c0_41 = arith.constant 0 : index
    %53 = vector.load %arg8[%c0_40, %c0_41] : memref<128x1152xbf16, #tpu.memory_space<vmem>>, vector<128x1152xbf16>
    %c0_42 = arith.constant 0 : index
    %c0_43 = arith.constant 0 : index
    %54 = vector.load %arg3[%c0_42, %c0_43] : memref<1152x128xbf16, #tpu.memory_space<vmem>>, vector<1152x128xbf16>
    %cst = arith.constant dense<0.000000e+00> : vector<128x128xf32>
    %55 = tpu.matmul %53, %54, %cst {dimension_numbers = #tpu.dot_dimension_numbers<[1], [0], [0], [1], [0, 0, 1, 1], [], []>} : vector<128x1152xbf16>, vector<1152x128xbf16>, vector<128x128xf32> -> vector<128x128xf32>
    %56 = vector.shape_cast %55 : vector<128x128xf32> to vector<8x16x128xf32>
    %57 = arith.truncf %56 : vector<8x16x128xf32> to vector<8x16x128xbf16>
    %c0_44 = arith.constant 0 : index
    %c0_45 = arith.constant 0 : index
    %c0_46 = arith.constant 0 : index
    %c0_47 = arith.constant 0 : index
    %58 = vector.load %arg4[%c0_44, %c0_45, %c0_46, %c0_47] : memref<1x8x16x128xbf16, #tpu.memory_space<vmem>>, vector<1x8x16x128xbf16>
    %59 = vector.shape_cast %58 : vector<1x8x16x128xbf16> to vector<8x16x128xbf16>
    %60 = vector.shape_cast %57 : vector<8x16x128xbf16> to vector<1x8x16x128xbf16>
    tpu.vector_store %arg4[%c0_44, %c0_45, %c0_46, %c0_47], %60 {strides = array<i32>} : memref<1x8x16x128xbf16, #tpu.memory_space<vmem>>, vector<1x8x16x128xbf16>,
    %cst_48 = arith.constant dense<0.000000e+00> : vector<128xf32>
    %61 = vector.multi_reduction <add>, %55, %cst_48 [0] : vector<128x128xf32> to vector<128xf32>
    %62 = vector.shape_cast %61 : vector<128xf32> to vector<1x128xf32>
    %c0_49 = arith.constant 0 : index
    %c0_50 = arith.constant 0 : index
    %c0_51 = arith.constant 0 : index
    %c0_52 = arith.constant 0 : index
    %63 = vector.load %arg5[%c0_49, %c0_50, %c0_51, %c0_52] : memref<1x1x1x128xf32, #tpu.memory_space<vmem>>, vector<1x1x1x128xf32>
    %64 = vector.shape_cast %63 : vector<1x1x1x128xf32> to vector<1x128xf32>
    %65 = vector.shape_cast %62 : vector<1x128xf32> to vector<1x1x1x128xf32>
    tpu.vector_store %arg5[%c0_49, %c0_50, %c0_51, %c0_52], %65 {strides = array<i32>} : memref<1x1x1x128xf32, #tpu.memory_space<vmem>>, vector<1x1x1x128xf32>,
    %66 = arith.mulf %55, %55 : vector<128x128xf32>
    %cst_53 = arith.constant dense<0.000000e+00> : vector<128xf32>
    %67 = vector.multi_reduction <add>, %66, %cst_53 [0] : vector<128x128xf32> to vector<128xf32>
    %68 = vector.shape_cast %67 : vector<128xf32> to vector<1x128xf32>
    %c0_54 = arith.constant 0 : index
    %c0_55 = arith.constant 0 : index
    %c0_56 = arith.constant 0 : index
    %c0_57 = arith.constant 0 : index
    %69 = vector.load %arg6[%c0_54, %c0_55, %c0_56, %c0_57] : memref<1x1x1x128xf32, #tpu.memory_space<vmem>>, vector<1x1x1x128xf32>
    %70 = vector.shape_cast %69 : vector<1x1x1x128xf32> to vector<1x128xf32>
    %71 = vector.shape_cast %68 : vector<1x128xf32> to vector<1x1x1x128xf32>
    tpu.vector_store %arg6[%c0_54, %c0_55, %c0_56, %c0_57], %71 {strides = array<i32>} : memref<1x1x1x128xf32, #tpu.memory_space<vmem>>, vector<1x1x1x128xf32>,
    return
  }
  func.func @transform_0(%arg0: i32, %arg1: i32) -> (i32, i32, i32, i32) {
    %c0_i32 = arith.constant 0 : i32
    %c0_i32_0 = arith.constant 0 : i32
    %c0_i32_1 = arith.constant 0 : i32
    %c0_i32_2 = arith.constant 0 : i32
    return %arg0, %c0_i32, %c0_i32_0, %c0_i32_1 : i32, i32, i32, i32
  }
  func.func @transform_1(%arg0: i32, %arg1: i32) -> (i32, i32) {
    %c0_i32 = arith.constant 0 : i32
    %c0_i32_0 = arith.constant 0 : i32
    %c0_i32_1 = arith.constant 0 : i32
    return %c0_i32, %c0_i32_0 : i32, i32
  }
  func.func @transform_2(%arg0: i32, %arg1: i32) -> (i32, i32, i32, i32) {
    %c0_i32 = arith.constant 0 : i32
    %c0_i32_0 = arith.constant 0 : i32
    %c0_i32_1 = arith.constant 0 : i32
    return %arg0, %arg1, %c0_i32, %c0_i32_0 : i32, i32, i32, i32
  }
  func.func @transform_3(%arg0: i32, %arg1: i32) -> (i32, i32, i32, i32) {
    %c0_i32 = arith.constant 0 : i32
    %c0_i32_0 = arith.constant 0 : i32
    %c0_i32_1 = arith.constant 0 : i32
    return %arg0, %arg1, %c0_i32, %c0_i32_0 : i32, i32, i32, i32
  }
  func.func @transform_4(%arg0: i32, %arg1: i32) -> (i32, i32, i32, i32) {
    %c0_i32 = arith.constant 0 : i32
    %c0_i32_0 = arith.constant 0 : i32
    %c0_i32_1 = arith.constant 0 : i32
    return %arg0, %arg1, %c0_i32, %c0_i32_0 : i32, i32, i32, i32
  }
}

module attributes {stable_mosaic.version = 11 : i64} {
  func.func @_bn_residual_kernel(%arg0: i32, %arg1: i32, %arg2: memref<1x8x16x128xbf16, #tpu.memory_space<vmem>>, %arg3: memref<1x1x128xf32, #tpu.memory_space<vmem>>, %arg4: memref<1x1x128xf32, #tpu.memory_space<vmem>>, %arg5: memref<1x8x16x128xf32, #tpu.memory_space<vmem>>, %arg6: memref<1x8x16x128xf32, #tpu.memory_space<vmem>>) attributes {dimension_semantics = [#tpu.dimension_semantics<parallel>, #tpu.dimension_semantics<parallel>], iteration_bounds = array<i64: 2, 2>, scalar_prefetch = 0 : i64, scratch_operands = 0 : i64, tpu.core_type = #tpu.core_type<tc>, window_params = [{transform_indices = @transform_0, window_bounds = array<i64: 1, 8, 16, 128>}, {pipeline_mode = #tpu.pipeline_mode<synchronous>, transform_indices = @transform_1, window_bounds = array<i64: 1, 1, 128>}, {pipeline_mode = #tpu.pipeline_mode<synchronous>, transform_indices = @transform_2, window_bounds = array<i64: 1, 1, 128>}, {transform_indices = @transform_3, window_bounds = array<i64: 1, 8, 16, 128>}, {transform_indices = @transform_4, window_bounds = array<i64: 1, 8, 16, 128>}]} {
    %c0 = arith.constant 0 : index
    %c0_0 = arith.constant 0 : index
    %c0_1 = arith.constant 0 : index
    %c0_2 = arith.constant 0 : index
    %0 = vector.load %arg2[%c0, %c0_0, %c0_1, %c0_2] : memref<1x8x16x128xbf16, #tpu.memory_space<vmem>>, vector<1x8x16x128xbf16>
    %1 = arith.extf %0 : vector<1x8x16x128xbf16> to vector<1x8x16x128xf32>
    %c0_3 = arith.constant 0 : index
    %c0_4 = arith.constant 0 : index
    %c0_5 = arith.constant 0 : index
    %2 = vector.load %arg3[%c0_3, %c0_4, %c0_5] : memref<1x1x128xf32, #tpu.memory_space<vmem>>, vector<1x1x128xf32>
    %3 = vector.shape_cast %2 : vector<1x1x128xf32> to vector<1x1x1x128xf32>
    %4 = vector.broadcast %3 : vector<1x1x1x128xf32> to vector<1x8x16x128xf32>
    %5 = arith.mulf %1, %4 : vector<1x8x16x128xf32>
    %c0_6 = arith.constant 0 : index
    %c0_7 = arith.constant 0 : index
    %c0_8 = arith.constant 0 : index
    %6 = vector.load %arg4[%c0_6, %c0_7, %c0_8] : memref<1x1x128xf32, #tpu.memory_space<vmem>>, vector<1x1x128xf32>
    %7 = vector.shape_cast %6 : vector<1x1x128xf32> to vector<1x1x1x128xf32>
    %8 = vector.broadcast %7 : vector<1x1x1x128xf32> to vector<1x8x16x128xf32>
    %9 = arith.addf %5, %8 : vector<1x8x16x128xf32>
    %c0_9 = arith.constant 0 : index
    %c0_10 = arith.constant 0 : index
    %c0_11 = arith.constant 0 : index
    %c0_12 = arith.constant 0 : index
    %10 = vector.load %arg5[%c0_9, %c0_10, %c0_11, %c0_12] : memref<1x8x16x128xf32, #tpu.memory_space<vmem>>, vector<1x8x16x128xf32>
    %11 = arith.addf %9, %10 : vector<1x8x16x128xf32>
    %c0_13 = arith.constant 0 : index
    %c0_14 = arith.constant 0 : index
    %c0_15 = arith.constant 0 : index
    %c0_16 = arith.constant 0 : index
    %12 = vector.load %arg6[%c0_13, %c0_14, %c0_15, %c0_16] : memref<1x8x16x128xf32, #tpu.memory_space<vmem>>, vector<1x8x16x128xf32>
    tpu.vector_store %arg6[%c0_13, %c0_14, %c0_15, %c0_16], %11 {strides = array<i32>} : memref<1x8x16x128xf32, #tpu.memory_space<vmem>>, vector<1x8x16x128xf32>,
    return
  }
  func.func @transform_0(%arg0: i32, %arg1: i32) -> (i32, i32, i32, i32) {
    %c0_i32 = arith.constant 0 : i32
    %c0_i32_0 = arith.constant 0 : i32
    %c0_i32_1 = arith.constant 0 : i32
    return %arg0, %arg1, %c0_i32, %c0_i32_0 : i32, i32, i32, i32
  }
  func.func @transform_1(%arg0: i32, %arg1: i32) -> (i32, i32, i32) {
    %c0_i32 = arith.constant 0 : i32
    %c0_i32_0 = arith.constant 0 : i32
    %c0_i32_1 = arith.constant 0 : i32
    %c0_i32_2 = arith.constant 0 : i32
    return %c0_i32, %c0_i32_0, %c0_i32_1 : i32, i32, i32
  }
  func.func @transform_2(%arg0: i32, %arg1: i32) -> (i32, i32, i32) {
    %c0_i32 = arith.constant 0 : i32
    %c0_i32_0 = arith.constant 0 : i32
    %c0_i32_1 = arith.constant 0 : i32
    %c0_i32_2 = arith.constant 0 : i32
    return %c0_i32, %c0_i32_0, %c0_i32_1 : i32, i32, i32
  }
  func.func @transform_3(%arg0: i32, %arg1: i32) -> (i32, i32, i32, i32) {
    %c0_i32 = arith.constant 0 : i32
    %c0_i32_0 = arith.constant 0 : i32
    %c0_i32_1 = arith.constant 0 : i32
    return %arg0, %arg1, %c0_i32, %c0_i32_0 : i32, i32, i32, i32
  }
  func.func @transform_4(%arg0: i32, %arg1: i32) -> (i32, i32, i32, i32) {
    %c0_i32 = arith.constant 0 : i32
    %c0_i32_0 = arith.constant 0 : i32
    %c0_i32_1 = arith.constant 0 : i32
    return %arg0, %arg1, %c0_i32, %c0_i32_0 : i32, i32, i32, i32
  }
}

module attributes {stable_mosaic.version = 11 : i64} {
  func.func @_conv3x3_stats_kernel(%arg0: i32, %arg1: i32, %arg2: memref<1x16x16x128xbf16, #tpu.memory_space<vmem>>, %arg3: memref<1152x128xbf16, #tpu.memory_space<vmem>>, %arg4: memref<1x1x128xf32, #tpu.memory_space<vmem>>, %arg5: memref<1x1x128xf32, #tpu.memory_space<vmem>>, %arg6: memref<1x8x16x128xbf16, #tpu.memory_space<vmem>>, %arg7: memref<1x1x1x128xf32, #tpu.memory_space<vmem>>, %arg8: memref<1x1x1x128xf32, #tpu.memory_space<vmem>>, %arg9: memref<10x18x128xbf16, #tpu.memory_space<vmem>>, %arg10: memref<128x1152xbf16, #tpu.memory_space<vmem>>) attributes {dimension_semantics = [#tpu.dimension_semantics<parallel>, #tpu.dimension_semantics<parallel>], iteration_bounds = array<i64: 2, 2>, scalar_prefetch = 0 : i64, scratch_operands = 2 : i64, tpu.core_type = #tpu.core_type<tc>, window_params = [{transform_indices = @transform_0, window_bounds = array<i64: 1, 16, 16, 128>}, {pipeline_mode = #tpu.pipeline_mode<synchronous>, transform_indices = @transform_1, window_bounds = array<i64: 1152, 128>}, {pipeline_mode = #tpu.pipeline_mode<synchronous>, transform_indices = @transform_2, window_bounds = array<i64: 1, 1, 128>}, {pipeline_mode = #tpu.pipeline_mode<synchronous>, transform_indices = @transform_3, window_bounds = array<i64: 1, 1, 128>}, {transform_indices = @transform_4, window_bounds = array<i64: 1, 8, 16, 128>}, {transform_indices = @transform_5, window_bounds = array<i64: 1, 1, 1, 128>}, {transform_indices = @transform_6, window_bounds = array<i64: 1, 1, 1, 128>}]} {
    %c8_i32 = arith.constant 8 : i32
    %0 = arith.muli %arg1, %c8_i32 : i32
    %1 = tpu.assume_multiple %0, 8 : i32
    %c0_i32 = arith.constant 0 : i32
    %2 = arith.cmpi eq, %1, %c0_i32 : i32
    %c1_i32 = arith.constant 1 : i32
    %3 = arith.subi %1, %c1_i32 : i32
    %c1_i32_0 = arith.constant 1 : i32
    %4 = arith.select %2, %c1_i32_0, %3 : i32
    %c8_i32_1 = arith.constant 8 : i32
    %5 = arith.addi %1, %c8_i32_1 : i32
    %c16_i32 = arith.constant 16 : i32
    %6 = arith.cmpi sge, %5, %c16_i32 : i32
    %c8_i32_2 = arith.constant 8 : i32
    %7 = arith.addi %1, %c8_i32_2 : i32
    %c14_i32 = arith.constant 14 : i32
    %8 = arith.select %6, %c14_i32, %7 : i32
    %c0 = arith.constant 0 : index
    %9 = arith.index_cast %4 : i32 to index
    %c0_3 = arith.constant 0 : index
    %c0_4 = arith.constant 0 : index
    %10 = vector.load %arg2[%c0, %9, %c0_3, %c0_4] : memref<1x16x16x128xbf16, #tpu.memory_space<vmem>>, vector<1x1x16x128xbf16>
    %11 = vector.shape_cast %10 : vector<1x1x16x128xbf16> to vector<1x16x128xbf16>
    %c0_5 = arith.constant 0 : index
    %c1 = arith.constant 1 : index
    %c0_6 = arith.constant 0 : index
    %12 = vector.load %arg9[%c0_5, %c1, %c0_6] : memref<10x18x128xbf16, #tpu.memory_space<vmem>>, vector<1x16x128xbf16>
    tpu.vector_store %arg9[%c0_5, %c1, %c0_6], %11 {strides = array<i32>} : memref<10x18x128xbf16, #tpu.memory_space<vmem>>, vector<1x16x128xbf16>,
    %c0_7 = arith.constant 0 : index
    %13 = arith.index_cast %1 : i32 to index
    %c0_8 = arith.constant 0 : index
    %c0_9 = arith.constant 0 : index
    %14 = vector.load %arg2[%c0_7, %13, %c0_8, %c0_9] : memref<1x16x16x128xbf16, #tpu.memory_space<vmem>>, vector<1x8x16x128xbf16>
    %15 = vector.shape_cast %14 : vector<1x8x16x128xbf16> to vector<8x16x128xbf16>
    %c1_10 = arith.constant 1 : index
    %c1_11 = arith.constant 1 : index
    %c0_12 = arith.constant 0 : index
    %16 = vector.load %arg9[%c1_10, %c1_11, %c0_12] : memref<10x18x128xbf16, #tpu.memory_space<vmem>>, vector<8x16x128xbf16>
    tpu.vector_store %arg9[%c1_10, %c1_11, %c0_12], %15 {strides = array<i32>} : memref<10x18x128xbf16, #tpu.memory_space<vmem>>, vector<8x16x128xbf16>,
    %c0_13 = arith.constant 0 : index
    %17 = arith.index_cast %8 : i32 to index
    %c0_14 = arith.constant 0 : index
    %c0_15 = arith.constant 0 : index
    %18 = vector.load %arg2[%c0_13, %17, %c0_14, %c0_15] : memref<1x16x16x128xbf16, #tpu.memory_space<vmem>>, vector<1x1x16x128xbf16>
    %19 = vector.shape_cast %18 : vector<1x1x16x128xbf16> to vector<1x16x128xbf16>
    %c9 = arith.constant 9 : index
    %c1_16 = arith.constant 1 : index
    %c0_17 = arith.constant 0 : index
    %20 = vector.load %arg9[%c9, %c1_16, %c0_17] : memref<10x18x128xbf16, #tpu.memory_space<vmem>>, vector<1x16x128xbf16>
    tpu.vector_store %arg9[%c9, %c1_16, %c0_17], %19 {strides = array<i32>} : memref<10x18x128xbf16, #tpu.memory_space<vmem>>, vector<1x16x128xbf16>,
    %c0_18 = arith.constant 0 : index
    %c2 = arith.constant 2 : index
    %c0_19 = arith.constant 0 : index
    %21 = vector.load %arg9[%c0_18, %c2, %c0_19] : memref<10x18x128xbf16, #tpu.memory_space<vmem>>, vector<10x1x128xbf16>
    %c0_20 = arith.constant 0 : index
    %c0_21 = arith.constant 0 : index
    %c0_22 = arith.constant 0 : index
    %22 = vector.load %arg9[%c0_20, %c0_21, %c0_22] : memref<10x18x128xbf16, #tpu.memory_space<vmem>>, vector<10x1x128xbf16>
    tpu.vector_store %arg9[%c0_20, %c0_21, %c0_22], %21 {strides = array<i32>} : memref<10x18x128xbf16, #tpu.memory_space<vmem>>, vector<10x1x128xbf16>,
    %c0_23 = arith.constant 0 : index
    %c15 = arith.constant 15 : index
    %c0_24 = arith.constant 0 : index
    %23 = vector.load %arg9[%c0_23, %c15, %c0_24] : memref<10x18x128xbf16, #tpu.memory_space<vmem>>, vector<10x1x128xbf16>
    %c0_25 = arith.constant 0 : index
    %c17 = arith.constant 17 : index
    %c0_26 = arith.constant 0 : index
    %24 = vector.load %arg9[%c0_25, %c17, %c0_26] : memref<10x18x128xbf16, #tpu.memory_space<vmem>>, vector<10x1x128xbf16>
    tpu.vector_store %arg9[%c0_25, %c17, %c0_26], %23 {strides = array<i32>} : memref<10x18x128xbf16, #tpu.memory_space<vmem>>, vector<10x1x128xbf16>,
    %c0_27 = arith.constant 0 : index
    %c0_28 = arith.constant 0 : index
    %c0_29 = arith.constant 0 : index
    %25 = vector.load %arg9[%c0_27, %c0_28, %c0_29] : memref<10x18x128xbf16, #tpu.memory_space<vmem>>, vector<10x18x128xbf16>
    %26 = arith.extf %25 : vector<10x18x128xbf16> to vector<10x18x128xf32>
    %c0_30 = arith.constant 0 : index
    %c0_31 = arith.constant 0 : index
    %c0_32 = arith.constant 0 : index
    %27 = vector.load %arg4[%c0_30, %c0_31, %c0_32] : memref<1x1x128xf32, #tpu.memory_space<vmem>>, vector<1x1x128xf32>
    %28 = vector.broadcast %27 : vector<1x1x128xf32> to vector<10x18x128xf32>
    %29 = arith.mulf %26, %28 : vector<10x18x128xf32>
    %c0_33 = arith.constant 0 : index
    %c0_34 = arith.constant 0 : index
    %c0_35 = arith.constant 0 : index
    %30 = vector.load %arg5[%c0_33, %c0_34, %c0_35] : memref<1x1x128xf32, #tpu.memory_space<vmem>>, vector<1x1x128xf32>
    %31 = vector.broadcast %30 : vector<1x1x128xf32> to vector<10x18x128xf32>
    %32 = arith.addf %29, %31 : vector<10x18x128xf32>
    %cst = arith.constant 0.000000e+00 : f32
    %33 = vector.broadcast %cst : f32 to vector<10x18x128xf32>
    %34 = arith.maximumf %32, %33 : vector<10x18x128xf32>
    %35 = arith.truncf %34 : vector<10x18x128xf32> to vector<10x18x128xbf16>
    %36 = vector.extract_strided_slice %35 {offsets = [0, 0, 0], sizes = [8, 16, 128], strides = [1, 1, 1]} : vector<10x18x128xbf16> to vector<8x16x128xbf16>
    %37 = vector.shape_cast %36 : vector<8x16x128xbf16> to vector<128x128xbf16>
    %c0_36 = arith.constant 0 : index
    %c0_37 = arith.constant 0 : index
    %38 = vector.load %arg10[%c0_36, %c0_37] : memref<128x1152xbf16, #tpu.memory_space<vmem>>, vector<128x128xbf16>
    tpu.vector_store %arg10[%c0_36, %c0_37], %37 {strides = array<i32>} : memref<128x1152xbf16, #tpu.memory_space<vmem>>, vector<128x128xbf16>,
    %39 = vector.extract_strided_slice %35 {offsets = [0, 1, 0], sizes = [8, 16, 128], strides = [1, 1, 1]} : vector<10x18x128xbf16> to vector<8x16x128xbf16>
    %40 = vector.shape_cast %39 : vector<8x16x128xbf16> to vector<128x128xbf16>
    %c0_38 = arith.constant 0 : index
    %c128 = arith.constant 128 : index
    %41 = vector.load %arg10[%c0_38, %c128] : memref<128x1152xbf16, #tpu.memory_space<vmem>>, vector<128x128xbf16>
    tpu.vector_store %arg10[%c0_38, %c128], %40 {strides = array<i32>} : memref<128x1152xbf16, #tpu.memory_space<vmem>>, vector<128x128xbf16>,
    %42 = vector.extract_strided_slice %35 {offsets = [0, 2, 0], sizes = [8, 16, 128], strides = [1, 1, 1]} : vector<10x18x128xbf16> to vector<8x16x128xbf16>
    %43 = vector.shape_cast %42 : vector<8x16x128xbf16> to vector<128x128xbf16>
    %c0_39 = arith.constant 0 : index
    %c256 = arith.constant 256 : index
    %44 = vector.load %arg10[%c0_39, %c256] : memref<128x1152xbf16, #tpu.memory_space<vmem>>, vector<128x128xbf16>
    tpu.vector_store %arg10[%c0_39, %c256], %43 {strides = array<i32>} : memref<128x1152xbf16, #tpu.memory_space<vmem>>, vector<128x128xbf16>,
    %45 = vector.extract_strided_slice %35 {offsets = [1, 0, 0], sizes = [8, 16, 128], strides = [1, 1, 1]} : vector<10x18x128xbf16> to vector<8x16x128xbf16>
    %46 = vector.shape_cast %45 : vector<8x16x128xbf16> to vector<128x128xbf16>
    %c0_40 = arith.constant 0 : index
    %c384 = arith.constant 384 : index
    %47 = vector.load %arg10[%c0_40, %c384] : memref<128x1152xbf16, #tpu.memory_space<vmem>>, vector<128x128xbf16>
    tpu.vector_store %arg10[%c0_40, %c384], %46 {strides = array<i32>} : memref<128x1152xbf16, #tpu.memory_space<vmem>>, vector<128x128xbf16>,
    %48 = vector.extract_strided_slice %35 {offsets = [1, 1, 0], sizes = [8, 16, 128], strides = [1, 1, 1]} : vector<10x18x128xbf16> to vector<8x16x128xbf16>
    %49 = vector.shape_cast %48 : vector<8x16x128xbf16> to vector<128x128xbf16>
    %c0_41 = arith.constant 0 : index
    %c512 = arith.constant 512 : index
    %50 = vector.load %arg10[%c0_41, %c512] : memref<128x1152xbf16, #tpu.memory_space<vmem>>, vector<128x128xbf16>
    tpu.vector_store %arg10[%c0_41, %c512], %49 {strides = array<i32>} : memref<128x1152xbf16, #tpu.memory_space<vmem>>, vector<128x128xbf16>,
    %51 = vector.extract_strided_slice %35 {offsets = [1, 2, 0], sizes = [8, 16, 128], strides = [1, 1, 1]} : vector<10x18x128xbf16> to vector<8x16x128xbf16>
    %52 = vector.shape_cast %51 : vector<8x16x128xbf16> to vector<128x128xbf16>
    %c0_42 = arith.constant 0 : index
    %c640 = arith.constant 640 : index
    %53 = vector.load %arg10[%c0_42, %c640] : memref<128x1152xbf16, #tpu.memory_space<vmem>>, vector<128x128xbf16>
    tpu.vector_store %arg10[%c0_42, %c640], %52 {strides = array<i32>} : memref<128x1152xbf16, #tpu.memory_space<vmem>>, vector<128x128xbf16>,
    %54 = vector.extract_strided_slice %35 {offsets = [2, 0, 0], sizes = [8, 16, 128], strides = [1, 1, 1]} : vector<10x18x128xbf16> to vector<8x16x128xbf16>
    %55 = vector.shape_cast %54 : vector<8x16x128xbf16> to vector<128x128xbf16>
    %c0_43 = arith.constant 0 : index
    %c768 = arith.constant 768 : index
    %56 = vector.load %arg10[%c0_43, %c768] : memref<128x1152xbf16, #tpu.memory_space<vmem>>, vector<128x128xbf16>
    tpu.vector_store %arg10[%c0_43, %c768], %55 {strides = array<i32>} : memref<128x1152xbf16, #tpu.memory_space<vmem>>, vector<128x128xbf16>,
    %57 = vector.extract_strided_slice %35 {offsets = [2, 1, 0], sizes = [8, 16, 128], strides = [1, 1, 1]} : vector<10x18x128xbf16> to vector<8x16x128xbf16>
    %58 = vector.shape_cast %57 : vector<8x16x128xbf16> to vector<128x128xbf16>
    %c0_44 = arith.constant 0 : index
    %c896 = arith.constant 896 : index
    %59 = vector.load %arg10[%c0_44, %c896] : memref<128x1152xbf16, #tpu.memory_space<vmem>>, vector<128x128xbf16>
    tpu.vector_store %arg10[%c0_44, %c896], %58 {strides = array<i32>} : memref<128x1152xbf16, #tpu.memory_space<vmem>>, vector<128x128xbf16>,
    %60 = vector.extract_strided_slice %35 {offsets = [2, 2, 0], sizes = [8, 16, 128], strides = [1, 1, 1]} : vector<10x18x128xbf16> to vector<8x16x128xbf16>
    %61 = vector.shape_cast %60 : vector<8x16x128xbf16> to vector<128x128xbf16>
    %c0_45 = arith.constant 0 : index
    %c1024 = arith.constant 1024 : index
    %62 = vector.load %arg10[%c0_45, %c1024] : memref<128x1152xbf16, #tpu.memory_space<vmem>>, vector<128x128xbf16>
    tpu.vector_store %arg10[%c0_45, %c1024], %61 {strides = array<i32>} : memref<128x1152xbf16, #tpu.memory_space<vmem>>, vector<128x128xbf16>,
    %c0_46 = arith.constant 0 : index
    %c0_47 = arith.constant 0 : index
    %63 = vector.load %arg10[%c0_46, %c0_47] : memref<128x1152xbf16, #tpu.memory_space<vmem>>, vector<128x1152xbf16>
    %c0_48 = arith.constant 0 : index
    %c0_49 = arith.constant 0 : index
    %64 = vector.load %arg3[%c0_48, %c0_49] : memref<1152x128xbf16, #tpu.memory_space<vmem>>, vector<1152x128xbf16>
    %cst_50 = arith.constant dense<0.000000e+00> : vector<128x128xf32>
    %65 = tpu.matmul %63, %64, %cst_50 {dimension_numbers = #tpu.dot_dimension_numbers<[1], [0], [0], [1], [0, 0, 1, 1], [], []>} : vector<128x1152xbf16>, vector<1152x128xbf16>, vector<128x128xf32> -> vector<128x128xf32>
    %66 = vector.shape_cast %65 : vector<128x128xf32> to vector<8x16x128xf32>
    %67 = arith.truncf %66 : vector<8x16x128xf32> to vector<8x16x128xbf16>
    %c0_51 = arith.constant 0 : index
    %c0_52 = arith.constant 0 : index
    %c0_53 = arith.constant 0 : index
    %c0_54 = arith.constant 0 : index
    %68 = vector.load %arg6[%c0_51, %c0_52, %c0_53, %c0_54] : memref<1x8x16x128xbf16, #tpu.memory_space<vmem>>, vector<1x8x16x128xbf16>
    %69 = vector.shape_cast %68 : vector<1x8x16x128xbf16> to vector<8x16x128xbf16>
    %70 = vector.shape_cast %67 : vector<8x16x128xbf16> to vector<1x8x16x128xbf16>
    tpu.vector_store %arg6[%c0_51, %c0_52, %c0_53, %c0_54], %70 {strides = array<i32>} : memref<1x8x16x128xbf16, #tpu.memory_space<vmem>>, vector<1x8x16x128xbf16>,
    %cst_55 = arith.constant dense<0.000000e+00> : vector<128xf32>
    %71 = vector.multi_reduction <add>, %65, %cst_55 [0] : vector<128x128xf32> to vector<128xf32>
    %72 = vector.shape_cast %71 : vector<128xf32> to vector<1x128xf32>
    %c0_56 = arith.constant 0 : index
    %c0_57 = arith.constant 0 : index
    %c0_58 = arith.constant 0 : index
    %c0_59 = arith.constant 0 : index
    %73 = vector.load %arg7[%c0_56, %c0_57, %c0_58, %c0_59] : memref<1x1x1x128xf32, #tpu.memory_space<vmem>>, vector<1x1x1x128xf32>
    %74 = vector.shape_cast %73 : vector<1x1x1x128xf32> to vector<1x128xf32>
    %75 = vector.shape_cast %72 : vector<1x128xf32> to vector<1x1x1x128xf32>
    tpu.vector_store %arg7[%c0_56, %c0_57, %c0_58, %c0_59], %75 {strides = array<i32>} : memref<1x1x1x128xf32, #tpu.memory_space<vmem>>, vector<1x1x1x128xf32>,
    %76 = arith.mulf %65, %65 : vector<128x128xf32>
    %cst_60 = arith.constant dense<0.000000e+00> : vector<128xf32>
    %77 = vector.multi_reduction <add>, %76, %cst_60 [0] : vector<128x128xf32> to vector<128xf32>
    %78 = vector.shape_cast %77 : vector<128xf32> to vector<1x128xf32>
    %c0_61 = arith.constant 0 : index
    %c0_62 = arith.constant 0 : index
    %c0_63 = arith.constant 0 : index
    %c0_64 = arith.constant 0 : index
    %79 = vector.load %arg8[%c0_61, %c0_62, %c0_63, %c0_64] : memref<1x1x1x128xf32, #tpu.memory_space<vmem>>, vector<1x1x1x128xf32>
    %80 = vector.shape_cast %79 : vector<1x1x1x128xf32> to vector<1x128xf32>
    %81 = vector.shape_cast %78 : vector<1x128xf32> to vector<1x1x1x128xf32>
    tpu.vector_store %arg8[%c0_61, %c0_62, %c0_63, %c0_64], %81 {strides = array<i32>} : memref<1x1x1x128xf32, #tpu.memory_space<vmem>>, vector<1x1x1x128xf32>,
    return
  }
  func.func @transform_0(%arg0: i32, %arg1: i32) -> (i32, i32, i32, i32) {
    %c0_i32 = arith.constant 0 : i32
    %c0_i32_0 = arith.constant 0 : i32
    %c0_i32_1 = arith.constant 0 : i32
    %c0_i32_2 = arith.constant 0 : i32
    return %arg0, %c0_i32, %c0_i32_0, %c0_i32_1 : i32, i32, i32, i32
  }
  func.func @transform_1(%arg0: i32, %arg1: i32) -> (i32, i32) {
    %c0_i32 = arith.constant 0 : i32
    %c0_i32_0 = arith.constant 0 : i32
    %c0_i32_1 = arith.constant 0 : i32
    return %c0_i32, %c0_i32_0 : i32, i32
  }
  func.func @transform_2(%arg0: i32, %arg1: i32) -> (i32, i32, i32) {
    %c0_i32 = arith.constant 0 : i32
    %c0_i32_0 = arith.constant 0 : i32
    %c0_i32_1 = arith.constant 0 : i32
    %c0_i32_2 = arith.constant 0 : i32
    return %c0_i32, %c0_i32_0, %c0_i32_1 : i32, i32, i32
  }
  func.func @transform_3(%arg0: i32, %arg1: i32) -> (i32, i32, i32) {
    %c0_i32 = arith.constant 0 : i32
    %c0_i32_0 = arith.constant 0 : i32
    %c0_i32_1 = arith.constant 0 : i32
    %c0_i32_2 = arith.constant 0 : i32
    return %c0_i32, %c0_i32_0, %c0_i32_1 : i32, i32, i32
  }
  func.func @transform_4(%arg0: i32, %arg1: i32) -> (i32, i32, i32, i32) {
    %c0_i32 = arith.constant 0 : i32
    %c0_i32_0 = arith.constant 0 : i32
    %c0_i32_1 = arith.constant 0 : i32
    return %arg0, %arg1, %c0_i32, %c0_i32_0 : i32, i32, i32, i32
  }
  func.func @transform_5(%arg0: i32, %arg1: i32) -> (i32, i32, i32, i32) {
    %c0_i32 = arith.constant 0 : i32
    %c0_i32_0 = arith.constant 0 : i32
    %c0_i32_1 = arith.constant 0 : i32
    return %arg0, %arg1, %c0_i32, %c0_i32_0 : i32, i32, i32, i32
  }
  func.func @transform_6(%arg0: i32, %arg1: i32) -> (i32, i32, i32, i32) {
    %c0_i32 = arith.constant 0 : i32
    %c0_i32_0 = arith.constant 0 : i32
    %c0_i32_1 = arith.constant 0 : i32
    return %arg0, %arg1, %c0_i32, %c0_i32_0 : i32, i32, i32, i32
  }
}

</mosaic_0001>

<bundles_post_ra>
// kernel: resblock_forward.5
= control target key start
LH: loop header
LB: loop body
LE: loop exit
PB: predicated region body
PF: predicated region fallthrough
CT: control target
= control target key end

     0   :  { %s686_s15 = smov 0   ;;  %s688_s16 = smov 0   ;;  %s836_s0 = inlined_call_operand.vmem [shape: bf16[2,16,16,128], index: 0, kind: input, shape index: {}]   ;;  %s837_s1 = inlined_call_operand.vmem [shape: f32[1,1,128], index: 1, kind: input, shape index: {}]   ;;  %s838_s2 = inlined_call_operand.vmem [shape: f32[1,1,128], index: 2, kind: input, shape index: {}]   ;;  %s839_s3 = inlined_call_operand.vmem [shape: f32[2,16,16,128], index: 3, kind: input, shape index: {}]   ;;  %s840_s4 = inlined_call_operand.vmem [shape: f32[2,16,16,128], index: 4, kind: output, shape index: {}]  }
   0x1   :  { %s690_s17 = smov 0   ;;  %s692_s18 = smov 0  }
   0x2   :  { %s694_s19 = smov 0  }
   0x3 LB: > { %s23_s20 = sadd.s32 1, %s651_s17  ;;  %s26_s21 = sadd.s32 1, %s655_s18  ;;  %s659_s19 = sphi %s694_s19, %s14_s19   ;;  %s655_s18 = sphi %s692_s18, %s844_s18   ;;  %s651_s17 = sphi %s690_s17, %s843_s17   ;;  %s647_s16 = sphi %s688_s16, %s842_s16   ;;  %s643_s15 = sphi %s686_s15, %s841_s15  }
   0x4   : > { %p24_p0 = scmp.ge.s32.totalorder %s23_s20, 2  ;;  %p525_p1 = scmp.ge.s32.totalorder %s659_s19, 1 }
   0x5   : > { %p202_p2 = scmp.lt.s32.totalorder %s659_s19, 5 }
   0x6   : > { %s846_s20 = smov (%p24_p0, %s23_s20), 0  ;;  %s848_s21 = smov (!%p24_p0, %s26_s21), %s655_s18 }
   0x7   : > { %p203_p3 = pnand %p525_p1, %p202_p2  ;;  %p28_p4 = scmp.ge.s32.totalorder %s848_s21, 2 }
   0x8   : > { %s526_s22 = sshll.u32 (!%p203_p3), %s643_s15, 3  ;;  %p249_p5 = scmp.lt.s32.totalorder (!%p203_p3), %s647_s16, 1 }
   0x9   : > { %s850_s21 = smov (%p28_p4, %s848_s21), 0  ;;  %206 = sbr.rel (%p203_p3) target bundleno = 44 (0x2c), region = 36 }
   0xa   : > { %p251_p6 = scmp.lt.s32.totalorder (!%p203_p3), %s526_s22, 15 }
   0xe   : > { %s852_s16 = smov (!%p249_p5, %s647_s16), 1  ;;  %s854_s22 = smov (!%p251_p6, %s526_s22), 15  ;;  %v728_v0 = vld [vmem:[%s837_s1] ss:$0 sm:$0xff] }
   0xf   : > { %s528_s23 = sshll.u32 %s852_s16, 5  ;;  %s527_s24 = sshll.u32 %s854_s22, 1  ;;  %v741_v3 = vld [vmem:[%s838_s2] ss:$0 sm:$0xff] }
  0x10   : > { %s716_s25 = sadd.s32 %s528_s23, %s527_s24 }
  0x11   : > { %s529_s26 = sshll.u32 %s716_s25, 2  ;;  %s533_s27 = sshll.u32 %s716_s25, 3 }
  0x12   : > { %s723_s30 = scalar_lea.vmem %s836_s0, %s529_s26  ;;  %s736_s9 = scalar_lea.vmem %s839_s3, %s533_s27 }
  0x13   : > { %v541_v1 = vld [vmem:[%s723_s30] sm:$0xff]   ;;  %v572_v5 = vld [vmem:[%s723_s30 + $0x8] sm:$0xff]   ;;  %v573_v8 = vld [vmem:[%s723_s30 + $0x10] sm:$0xff]   ;;  %s763_s14 = scalar_lea.vmem %s840_s4, %s533_s27 }
  0x14   : > { %v542_v2 = vunpack.c.l.bf16 %v541_v1  ;;  %v543_v4 = vunpack.c.h.bf16 %v541_v1  ;;  %v546_v6 = vunpack.c.l.bf16 %v572_v5  ;;  %v547_v7 = vunpack.c.h.bf16 %v572_v5  ;;  %v574_v13 = vld [vmem:[%s723_s30 + $0x18] sm:$0xff]   ;;  %v353_v14 = vld [vmem:[%s736_s9] sm:$0xff]  ;;  %v354_v15 = vld [vmem:[%s736_s9 + $0x8] sm:$0xff] }
  0x15   : > { %v550_v11 = vunpack.c.l.bf16 %v573_v8  ;;  %v551_v12 = vunpack.c.h.bf16 %v573_v8  ;;  %v554_v18 = vunpack.c.l.bf16 %v574_v13  ;;  %v555_v19 = vunpack.c.h.bf16 %v574_v13  ;;  %v355_v22 = vld [vmem:[%s736_s9 + $0x10] sm:$0xff]  ;;  %v356_v23 = vld [vmem:[%s736_s9 + $0x18] sm:$0xff]  ;;  %v357_v28 = vld [vmem:[%s736_s9 + $0x20] sm:$0xff] }
  0x16   : > { %v317_v9 = vmul.f32 %v728_v0, %v542_v2  ;;  %v318_v10 = vmul.f32 %v728_v0, %v543_v4  ;;  %v319_v16 = vmul.f32 %v728_v0, %v546_v6  ;;  %v320_v17 = vmul.f32 %v728_v0, %v547_v7  ;;  %v358_v29 = vld [vmem:[%s736_s9 + $0x28] sm:$0xff]  ;;  %v575_v32 = vld [vmem:[%s723_s30 + $0x20] sm:$0xff]   ;;  %v359_v37 = vld [vmem:[%s736_s9 + $0x30] sm:$0xff] }
  0x17   : > { %v321_v24 = vmul.f32 %v728_v0, %v550_v11  ;;  %v322_v25 = vmul.f32 %v728_v0, %v551_v12  ;;  %v323_v30 = vmul.f32 %v728_v0, %v554_v18  ;;  %v324_v31 = vmul.f32 %v728_v0, %v555_v19  ;;  %v360_v38 = vld [vmem:[%s736_s9 + $0x38] sm:$0xff]  ;;  %v576_v39 = vld [vmem:[%s723_s30 + $0x28] sm:$0xff]   ;;  %v577_v44 = vld [vmem:[%s723_s30 + $0x30] sm:$0xff]  }
  0x18   : > { %v337_v20 = vadd.f32 %v741_v3, %v317_v9  ;;  %v338_v21 = vadd.f32 %v741_v3, %v318_v10  ;;  %v339_v26 = vadd.f32 %v741_v3, %v319_v16  ;;  %v340_v27 = vadd.f32 %v741_v3, %v320_v17  ;;  %v578_v49 = vld [vmem:[%s723_s30 + $0x38] sm:$0xff]   ;;  %v361_v58 = vld [vmem:[%s736_s9 + $0x40] sm:$0xff]  ;;  %v362_v59 = vld [vmem:[%s736_s9 + $0x48] sm:$0xff] }
  0x19   : > { %v341_v35 = vadd.f32 %v741_v3, %v321_v24  ;;  %v342_v36 = vadd.f32 %v741_v3, %v322_v25  ;;  %v343_v42 = vadd.f32 %v741_v3, %v323_v30  ;;  %v344_v43 = vadd.f32 %v741_v3, %v324_v31  ;;  %v363_v4 = vld [vmem:[%s736_s9 + $0x50] sm:$0xff]  ;;  %v364_v5 = vld [vmem:[%s736_s9 + $0x58] sm:$0xff]  ;;  %v365_v10 = vld [vmem:[%s736_s9 + $0x60] sm:$0xff] }
  0x1a   : > { %v369_v33 = vadd.f32 %v353_v14, %v337_v20  ;;  %v370_v34 = vadd.f32 %v354_v15, %v338_v21  ;;  %v371_v40 = vadd.f32 %v355_v22, %v339_v26  ;;  %v372_v41 = vadd.f32 %v356_v23, %v340_v27  ;;  %v366_v17 = vld [vmem:[%s736_s9 + $0x68] sm:$0xff]  ;;  %v367_v20 = vld [vmem:[%s736_s9 + $0x70] sm:$0xff]  ;;  %v368_v23 = vld [vmem:[%s736_s9 + $0x78] sm:$0xff] }
  0x1b   : > { %v373_v45 = vadd.f32 %v357_v28, %v341_v35  ;;  %v374_v46 = vadd.f32 %v358_v29, %v342_v36  ;;  %v558_v47 = vunpack.c.l.bf16 %v575_v32  ;;  %v559_v48 = vunpack.c.h.bf16 %v575_v32 }
  0x1c   : > { %385 = vst [vmem:[%s763_s14] sm:$0xff] %v369_v33  ;;  %v375_v50 = vadd.f32 %v359_v37, %v343_v42  ;;  %v376_v51 = vadd.f32 %v360_v38, %v344_v43  ;;  %v562_v52 = vunpack.c.l.bf16 %v576_v39  ;;  %v563_v53 = vunpack.c.h.bf16 %v576_v39 }
  0x1d   : > { %386 = vst [vmem:[%s763_s14 + $0x8] sm:$0xff] %v370_v34  ;;  %v325_v54 = vmul.f32 %v728_v0, %v558_v47  ;;  %v326_v55 = vmul.f32 %v728_v0, %v559_v48  ;;  %v566_v56 = vunpack.c.l.bf16 %v577_v44  ;;  %v567_v57 = vunpack.c.h.bf16 %v577_v44 }
  0x1e   : > { %387 = vst [vmem:[%s763_s14 + $0x10] sm:$0xff] %v371_v40  ;;  %v327_v60 = vmul.f32 %v728_v0, %v562_v52  ;;  %v328_v61 = vmul.f32 %v728_v0, %v563_v53  ;;  %v570_v62 = vunpack.c.l.bf16 %v578_v49  ;;  %v571_v63 = vunpack.c.h.bf16 %v578_v49 }
  0x1f   : > { %388 = vst [vmem:[%s763_s14 + $0x18] sm:$0xff] %v372_v41  ;;  %v345_v1 = vadd.f32 %v741_v3, %v325_v54  ;;  %v346_v2 = vadd.f32 %v741_v3, %v326_v55  ;;  %v329_v6 = vmul.f32 %v728_v0, %v566_v56  ;;  %v330_v7 = vmul.f32 %v728_v0, %v567_v57 }
  0x20   : > { %389 = vst [vmem:[%s763_s14 + $0x20] sm:$0xff] %v373_v45  ;;  %v347_v8 = vadd.f32 %v741_v3, %v327_v60  ;;  %v348_v9 = vadd.f32 %v741_v3, %v328_v61  ;;  %v331_v11 = vmul.f32 %v728_v0, %v570_v62  ;;  %v332_v12 = vmul.f32 %v728_v0, %v571_v63 }
  0x21   : > { %390 = vst [vmem:[%s763_s14 + $0x28] sm:$0xff] %v374_v46  ;;  %v377_v13 = vadd.f32 %v361_v58, %v345_v1  ;;  %v378_v14 = vadd.f32 %v362_v59, %v346_v2  ;;  %v349_v15 = vadd.f32 %v741_v3, %v329_v6  ;;  %v350_v16 = vadd.f32 %v741_v3, %v330_v7 }
  0x22   : > { %391 = vst [vmem:[%s763_s14 + $0x30] sm:$0xff] %v375_v50  ;;  %v379_v18 = vadd.f32 %v363_v4, %v347_v8  ;;  %v380_v19 = vadd.f32 %v364_v5, %v348_v9  ;;  %v351_v0 = vadd.f32 %v741_v3, %v331_v11  ;;  %v352_v21 = vadd.f32 %v741_v3, %v332_v12 }
  0x23   : > { %392 = vst [vmem:[%s763_s14 + $0x38] sm:$0xff] %v376_v51  ;;  %v381_v22 = vadd.f32 %v365_v10, %v349_v15  ;;  %v382_v24 = vadd.f32 %v366_v17, %v350_v16 }
  0x24   : > { %393 = vst [vmem:[%s763_s14 + $0x40] sm:$0xff] %v377_v13  ;;  %v383_v25 = vadd.f32 %v367_v20, %v351_v0  ;;  %v384_v26 = vadd.f32 %v368_v23, %v352_v21 }
  0x25   : > { %394 = vst [vmem:[%s763_s14 + $0x48] sm:$0xff] %v378_v14 }
  0x26   : > { %395 = vst [vmem:[%s763_s14 + $0x50] sm:$0xff] %v379_v18 }
  0x27   : > { %396 = vst [vmem:[%s763_s14 + $0x58] sm:$0xff] %v380_v19 }
  0x28   : > { %397 = vst [vmem:[%s763_s14 + $0x60] sm:$0xff] %v381_v22 }
  0x29   : > { %398 = vst [vmem:[%s763_s14 + $0x68] sm:$0xff] %v382_v24 }
  0x2a   : > { %399 = vst [vmem:[%s763_s14 + $0x70] sm:$0xff] %v383_v25 }
  0x2b   : > { %400 = vst [vmem:[%s763_s14 + $0x78] sm:$0xff] %v384_v26 }
  0x2c PF: > { %s14_s19 = sadd.s32 1, %s659_s19   ;;  %s841_s15 = smov %s651_s17 }
  0x2d   : > { %p11_p7 = scmp.ge.s32.totalorder %s14_s19, 6   ;;  %s842_s16 = smov %s655_s18 }
  0x2e   : > { %s843_s17 = smov %s846_s20  ;;  %s844_s18 = smov %s850_s21 }
  0x2f   :  { %13 = sbr.rel (!%p11_p7) target bundleno = 3 (0x3), region = 69 }

// kernel: resblock_forward.3
= control target key start
LH: loop header
LB: loop body
LE: loop exit
PB: predicated region body
PF: predicated region fallthrough
CT: control target
= control target key end

     0   :  { %s3986_s15 = smov 0   ;;  %s3988_s16 = smov 0   ;;  %s4848_s0 = inlined_call_operand.vmem [shape: bf16[2,16,16,128], index: 0, kind: input, shape index: {}]   ;;  %s4849_s1 = inlined_call_operand.vmem [shape: bf16[1152,128], index: 1, kind: input, shape index: {}]   ;;  %s4850_s2 = inlined_call_operand.vmem [shape: bf16[2,16,16,128], index: 2, kind: output, shape index: {0}]   ;;  %s4851_s3 = inlined_call_operand.vmem [shape: f32[2,2,1,128], index: 3, kind: output, shape index: {1}]   ;;  %s4852_s4 = inlined_call_operand.vmem [shape: f32[2,2,1,128], index: 4, kind: output, shape index: {2}]  }
   0x1   :  { %s3990_s17 = smov 0   ;;  %s3992_s18 = smov 0  }
   0x2   :  { %s3994_s19 = smov 0  }
   0x3 LB: > { %s24_s20 = sadd.s32 1, %s3951_s17  ;;  %s27_s21 = sadd.s32 1, %s3955_s18  ;;  %s3959_s19 = sphi %s3994_s19, %s15_s19   ;;  %s3955_s18 = sphi %s3992_s18, %s4868_s18   ;;  %s3951_s17 = sphi %s3990_s17, %s4867_s17   ;;  %s3947_s16 = sphi %s3988_s16, %s4866_s16   ;;  %s3943_s15 = sphi %s3986_s15, %s4865_s15  }
   0x4   : > { %p25_p0 = scmp.ge.s32.totalorder %s24_s20, 2  ;;  %p3036_p1 = scmp.ge.s32.totalorder %s3959_s19, 1 }
   0x5   : > { %p185_p2 = scmp.lt.s32.totalorder %s3959_s19, 5 }
   0x6   : > { %s4870_s20 = smov (%p25_p0, %s24_s20), 0  ;;  %s4872_s21 = smov (!%p25_p0, %s27_s21), %s3955_s18 }
   0x7   : > { %p186_p3 = pnand %p3036_p1, %p185_p2  ;;  %p29_p4 = scmp.ge.s32.totalorder %s4872_s21, 2 }
   0x8   : > { %p230_p5 = scmp.lt.s32.totalorder (!%p186_p3), %s3947_s16, 1  ;;  %s3664_s26 = sshll.u32 (!%p186_p3), %s3943_s15, 6 }
   0x9   : > { %s4874_s21 = smov (%p29_p4, %s4872_s21), 0  ;;  %189 = sbr.rel (%p186_p3) target bundleno = 526 (0x20e), region = 28 }
   0xa   : > { %s4028_s27 = sshll.u32 (!%p186_p3), %s3943_s15, 3  ;;  %p248_p9 = scmp.lt.s32.totalorder (!%p186_p3), %s3943_s15, 1 }
   0xb   : > { %p261_p6 = scmp.eq.s32.totalorder (!%p186_p3), %s4028_s27, 0  ;;  %s3046_s9 = sadd.s32 (!%p186_p3), 4294967295, %s4028_s27 }
   0xc   : > { %p238_p8 = scmp.lt.s32.totalorder (!%p186_p3), %s4028_s27, 15 }
   0xe   : > { %v3745_v0 = vld [vmem:[%s4849_s1 + $0x38] sm:$0xff]  ;;  %v3744_v1 = vld [vmem:[%s4849_s1 + $0x30] sm:$0xff]  ;;  %s4876_s16 = smov (!%p230_p5, %s3947_s16), 1  ;;  %v3743_v2 = vld [vmem:[%s4849_s1 + $0x28] sm:$0xff]  ;;  %vm272_vm0 = vsmask.f32 256 }
   0xf   : > { %3857 = vmatpush.bf16.msra.mxu1 %v3745_v0  ;;  %3858 = vmatpush.bf16.msra.mxu2 %v3745_v0  ;;  %s3661_s28 = sshll.u32 %s4876_s16, 7  ;;  %vm273_vm1 = vsmask.f32 4368  ;;  %vm295_vm2 = vcmask 1043456   ;;  %vm296_vm3 = vsmask.f32 7938 }
  0x10   : > { %3859 = vmatpush.bf16.msra.mxu3 %v3745_v0  ;;  %2321 = vmatpush.bf16.msra.mxu0 %v3745_v0  ;;  %s4037_s7 = scalar_lea.vmem %s4848_s0, %s3661_s28  ;;  %v3742_v6 = vld [vmem:[%s4849_s1 + $0x20] sm:$0xff]  ;;  %v494_v12 = vld [vmem:[#allocation2 + $0x18] sm:$0xf]  ;;  %vm4054_vm4 = vmor %vm272_vm0, %vm273_vm1  ;;  %s4878_s9 = smov (%p261_p6, %s3046_s9), 1  ;;  %vm302_vm6 = vcmask 1040384   ;;  %vm1034_vm9 = vcmask 1042432  }
  0x11   : > { %s4041_s8 = scalar_lea.vmem %s4037_s7, %s3664_s26  ;;  %vm4063_vm5 = vmand %vm295_vm2, %vm296_vm3  ;;  %v508_v32 = vld [vmem:[#allocation2 + $0x30] sm:$0xf]  ;;  %v522_v38 = vld [vmem:[#allocation2 + $0x48] sm:$0xf]  ;;  %s3662_s12 = sshll.u32 %s4878_s9, 3  ;;  %vm1035_vm12 = vcmask 1046532  }
  0x12   : > { %v312_v3 = vld [vmem:[%s4041_s8 + $0x8] sm:$0xf]  ;;  %v313_v4 = vld [vmem:[%s4041_s8 + $0xc] sm:$0xf]  ;;  %v316_v5 = vld [vmem:[%s4041_s8 + $0x18] sm:$0xf]  ;;  %s269_s22 = scalar_lea.vmem %s4037_s7, %s3662_s12 }
  0x13   : > { %3860 = vmatpush.bf16.msra.mxu1 %v3744_v1  ;;  %3861 = vmatpush.bf16.msra.mxu2 %v3744_v1  ;;  %v344_v7 = vshrl.u32 %v312_v3, 16  ;;  %v347_v8 = vshll.u32 %v312_v3, 16  ;;  %v352_v9 = vshrl.u32 %v313_v4, 16  ;;  %v355_v10 = vshll.u32 %v313_v4, 16  ;;  %v317_v11 = vld [vmem:[%s4041_s8 + $0x1c] sm:$0xf]  ;;  %vm4107_vm7 = vmand %vm302_vm6, %vm272_vm0 }
  0x14   : > { %3862 = vmatpush.bf16.msra.mxu3 %v3744_v1  ;;  %2322 = vmatpush.bf16.msra.mxu0 %v3744_v1  ;;  %v378_v13 = vshrl.u32 %v316_v5, 16  ;;  %v381_v14 = vshll.u32 %v316_v5, 16  ;;  %v386_v15 = vshrl.u32 %v317_v11, 16  ;;  %v389_v16 = vshll.u32 %v317_v11, 16  ;;  %v320_v17 = vld [vmem:[%s4041_s8 + $0x28] sm:$0xf]  ;;  %vm4394_vm13 = vmor %vm1034_vm9, %vm1035_vm12 }
  0x15   : > { %v346_v19 = vrot.slane %v344_v7, 7  ;;  %v4058_v20 = vrot.slane %v352_v9, 7  ;;  %v321_v21 = vld [vmem:[%s4041_s8 + $0x2c] sm:$0xf]  ;;  %v412_v22 = vshrl.u32 %v320_v17, 16  ;;  %v415_v23 = vshll.u32 %v320_v17, 16  ;;  %vm4410_vm14 = vmand %vm302_vm6, %vm296_vm3 }
  0x16   : > { %v380_v25 = vrot.slane %v378_v13, 7  ;;  %v4067_v26 = vrot.slane %v386_v15, 7  ;;  %v420_v27 = vshrl.u32 %v321_v21, 16  ;;  %v423_v28 = vshll.u32 %v321_v21, 16  ;;  %v3741_v39 = vld [vmem:[%s4849_s1 + $0x18] sm:$0xff]  ;;  %v3740_v52 = vld [vmem:[%s4849_s1 + $0x10] sm:$0xff] }
  0x17   : > { %3863 = vmatpush.bf16.msra.mxu1 %v3743_v2  ;;  %3864 = vmatpush.bf16.msra.mxu2 %v3743_v2  ;;  %v349_v29 = vor.u32 %v347_v8, %v346_v19  ;;  %v350_v30 = vrot.slane %v346_v19, 4  ;;  %v357_v31 = vor.u32 %v355_v10, %v4058_v20  ;;  %v414_v33 = vrot.slane %v412_v22, 7  ;;  %v270_v47 = vld [vmem:[%s269_s22] sm:$0xf]  ;;  %v4099_v55 = vld [vmem:[%s269_s22 + $0x4] sm:$0xf] }
  0x18   : > { %3865 = vmatpush.bf16.msra.mxu3 %v3743_v2  ;;  %2323 = vmatpush.bf16.msra.mxu0 %v3743_v2  ;;  %v383_v34 = vor.u32 %v381_v14, %v380_v25  ;;  %v384_v35 = vrot.slane %v380_v25, 4  ;;  %v391_v36 = vor.u32 %v389_v16, %v4067_v26  ;;  %v4075_v37 = vrot.slane %v420_v27, 7  ;;  %v298_v54 = vld [vmem:[#allocation2] sm:$0xf]  ;;  %v3739_v57 = vld [vmem:[%s4849_s1 + $0x8] sm:$0xff]  ;;  %v3761_v17 = vld [vmem:[%s4849_s1 + $0xb8] sm:$0xff] }
  0x19   : > { %v358_v40 = vsel %vm4054_vm4, %v350_v30, %v357_v31  ;;  %v495_v41 = vsel %vm4063_vm5, %v349_v29, %v494_v12  ;;  %v417_v42 = vor.u32 %v415_v23, %v414_v33  ;;  %v418_v43 = vrot.slane %v414_v33, 4  ;;  %v4112_v59 = vld [vmem:[%s4041_s8 + $0x10] sm:$0xf]  ;;  %v4117_v63 = vld [vmem:[%s4041_s8 + $0x20] sm:$0xf]  ;;  %v3753_v19 = vld [vmem:[%s4849_s1 + $0x78] sm:$0xff] }
  0x1a   : > { %496 = vst [vmem:[#allocation2 + $0x18] sm:$0xf] %v495_v41  ;;  %v392_v44 = vsel %vm4054_vm4, %v384_v35, %v391_v36  ;;  %v509_v45 = vsel %vm4063_vm5, %v383_v34, %v508_v32  ;;  %v425_v46 = vor.u32 %v423_v28, %v4075_v37  ;;  %v276_v49 = vshrl.u32 %v270_v47, 16  ;;  %v3738_v3 = vld [vmem:[%s4849_s1] sm:$0xff]  ;;  %v4136_v14 = vld [vmem:[%s4041_s8 + $0x14] sm:$0xf] }
  0x1b   : > { %3866 = vmatpush.bf16.msra.mxu1 %v3742_v6  ;;  %3867 = vmatpush.bf16.msra.mxu2 %v3742_v6  ;;  %497 = vst [vmem:[#allocation2 + $0x1c] sm:$0xf] %v358_v40  ;;  %v523_v48 = vsel %vm4063_vm5, %v417_v42, %v522_v38  ;;  %v279_v50 = vshll.u32 %v270_v47, 16  ;;  %v284_v2 = vshrl.u32 %v4099_v55, 16  ;;  %v361_v9 = vshrl.u32 %v4112_v59, 16  ;;  %v3769_v21 = vld [vmem:[%s4849_s1 + $0xf8] sm:$0xff] }
  0x1c   : > { %3868 = vmatpush.bf16.msra.mxu3 %v3742_v6  ;;  %2324 = vmatpush.bf16.msra.mxu0 %v3742_v6  ;;  %510 = vst [vmem:[#allocation2 + $0x30] sm:$0xf] %v509_v45  ;;  %v426_v51 = vsel %vm4054_vm4, %v418_v43, %v425_v46  ;;  %v4097_v53 = vrot.slane %v276_v49, 7  ;;  %v395_v15 = vshrl.u32 %v4117_v63, 16  ;;  %v4140_v16 = vld [vmem:[%s4041_s8 + $0x30] sm:$0xf] }
  0x1d   : > { %511 = vst [vmem:[#allocation2 + $0x34] sm:$0xf] %v392_v44  ;;  %v287_v22 = vshll.u32 %v4099_v55, 16  ;;  %v4155_v25 = vrot.slane %v284_v2, 7  ;;  %v364_v27 = vshll.u32 %v4112_v59, 16  ;;  %v369_v30 = vshrl.u32 %v4136_v14, 16 }
  0x1e   : > { %524 = vst [vmem:[#allocation2 + $0x48] sm:$0xf] %v523_v48  ;;  %v281_v56 = vor.u32 %v279_v50, %v4097_v53  ;;  %v4159_v28 = vld [vmem:[%s4041_s8 + $0x24] sm:$0xf]  ;;  %v398_v31 = vshll.u32 %v4117_v63, 16  ;;  %v282_v32 = vrot.slane %v4097_v53, 4 }
  0x1f   : > { %3869 = vmatpush.bf16.msra.mxu1 %v3741_v39  ;;  %3870 = vmatpush.bf16.msra.mxu2 %v3741_v39  ;;  %525 = vst [vmem:[#allocation2 + $0x4c] sm:$0xf] %v426_v51  ;;  %v3777_v33 = vld [vmem:[%s4849_s1 + $0x138] sm:$0xff]  ;;  %v4171_v34 = vrot.slane %v361_v9, 7  ;;  %v4173_v35 = vrot.slane %v395_v15, 7  ;;  %v3760_v36 = vld [vmem:[%s4849_s1 + $0xb0] sm:$0xff] }
  0x20   : > { %3871 = vmatpush.bf16.msra.mxu3 %v3741_v39  ;;  %2325 = vmatpush.bf16.msra.mxu0 %v3741_v39  ;;  %v299_v62 = vsel %vm4063_vm5, %v281_v56, %v298_v54  ;;  %v3752_v38 = vld [vmem:[%s4849_s1 + $0x70] sm:$0xff]  ;;  %v403_v39 = vshrl.u32 %v4159_v28, 16  ;;  %v429_v40 = vshrl.u32 %v4140_v16, 16  ;;  %v4193_v44 = vrot.slane %v369_v30, 7  ;;  %v3759_v51 = vld [vmem:[%s4849_s1 + $0xa8] sm:$0xff]  ;;  %s264_s28 = sadd.s32 8, %s4028_s27 }
  0x21   : > { %v578_v60 = vld [vmem:[#allocation2 + $0x18] sm:$0x2]  ;;  %v632_v61 = vld [vmem:[#allocation2 + $0x18] sm:$0x1]  ;;  %300 = vst [vmem:[#allocation2] sm:$0xf] %v299_v62  ;;  %v366_v9 = vor.u32 %v364_v27, %v4171_v34 }
  0x22   : > { %v3055_v0 = vrot.slane %v578_v60, 9  ;;  %v4119_v1 = vld [vmem:[#allocation2 + $0x1c] sm:$0xf]  ;;  %v3768_v42 = vld [vmem:[%s4849_s1 + $0xf0] sm:$0xff]  ;;  %v432_v46 = vshll.u32 %v4140_v16, 16  ;;  %v367_v48 = vrot.slane %v4171_v34, 4 }
  0x23   : > { %3872 = vmatpush.bf16.msra.mxu1 %v3740_v52  ;;  %3873 = vmatpush.bf16.msra.mxu2 %v3740_v52  ;;  %772 = vst [vmem:[#allocation3 + $0xb4] sm:$0xf] %v4119_v1  ;;  %v580_v4 = vld [vmem:[#allocation2 + $0x30] sm:$0x2]  ;;  %v638_v5 = vld [vmem:[#allocation2 + $0x30] sm:$0x1] }
  0x24   : > { %3874 = vmatpush.bf16.msra.mxu3 %v3740_v52  ;;  %2326 = vmatpush.bf16.msra.mxu0 %v3740_v52  ;;  %v633_v6 = vsel %vm4107_vm7, %v3055_v0, %v632_v61  ;;  %1128 = vst [vmem:[#allocation3 + $0x78] sm:$0xf] %v4119_v1  ;;  %v3057_v7 = vrot.slane %v580_v4, 9  ;;  %v4129_v8 = vld [vmem:[#allocation2 + $0x34] sm:$0xf]  ;;  %v372_v49 = vshll.u32 %v4136_v14, 16  ;;  %v289_v61 = vor.u32 %v287_v22, %v4155_v25 }
  0x25   : > { %634 = vst [vmem:[#allocation2 + $0x18] sm:$0x1] %v633_v6  ;;  %v582_v10 = vld [vmem:[#allocation2 + $0x48] sm:$0x2]  ;;  %v644_v11 = vld [vmem:[#allocation2 + $0x48] sm:$0x1] }
  0x26   : > { %1212 = vst [vmem:[#allocation3 + $0x3c] sm:$0xf] %v4119_v1  ;;  %v639_v12 = vsel %vm4107_vm7, %v3057_v7, %v638_v5  ;;  %v3059_v13 = vrot.slane %v582_v10, 9  ;;  %v4162_v29 = vld [vmem:[#allocation2 + $0x4c] sm:$0xf]  ;;  %v3776_v43 = vld [vmem:[%s4849_s1 + $0x130] sm:$0xff]  ;;  %v290_v59 = vsel %vm4054_vm4, %v282_v32, %v289_v61 }
  0x27   : > { %3875 = vmatpush.bf16.msra.mxu1 %v3739_v57  ;;  %3876 = vmatpush.bf16.msra.mxu2 %v3739_v57  ;;  %640 = vst [vmem:[#allocation2 + $0x30] sm:$0x1] %v639_v12  ;;  %v4196_v45 = vld [vmem:[%s4041_s8 + $0x34] sm:$0xf]  ;;  %v3751_v52 = vld [vmem:[%s4849_s1 + $0x68] sm:$0xff]  ;;  %v4218_v56 = vrot.slane %v403_v39, 7  ;;  %v374_v12 = vor.u32 %v372_v49, %v4193_v44 }
  0x28   : > { %3877 = vmatpush.bf16.msra.mxu3 %v3739_v57  ;;  %2327 = vmatpush.bf16.msra.mxu0 %v3739_v57  ;;  %776 = vst [vmem:[#allocation3 + $0x144] sm:$0xf] %v4129_v8  ;;  %v645_v23 = vsel %vm4107_vm7, %v3059_v13, %v644_v11  ;;  %v576_v50 = vld [vmem:[#allocation2] sm:$0x2]  ;;  %v3767_v54 = vld [vmem:[%s4849_s1 + $0xe8] sm:$0xff]  ;;  %v437_v57 = vshrl.u32 %v4196_v45, 16 }
  0x29   : > { %1132 = vst [vmem:[#allocation3 + $0x108] sm:$0xf] %v4129_v8  ;;  %v3775_v55 = vld [vmem:[%s4849_s1 + $0x128] sm:$0xff]  ;;  %v626_v62 = vld [vmem:[#allocation2] sm:$0x1]  ;;  %v3053_v2 = vrot.slane %v576_v50, 9 }
  0x2a   : > { %1216 = vst [vmem:[#allocation3 + $0xcc] sm:$0xf] %v4129_v8  ;;  %v3688_v60 = vld [vmem:[#allocation3 + $0xb0] sm:$0xf0]  ;;  %v406_v4 = vshll.u32 %v4159_v28, 16  ;;  %v3758_v5 = vld [vmem:[%s4849_s1 + $0xa0] sm:$0xff] }
  0x2b   : > { %3878 = vmatpush.bf16.msra.mxu1 %v3738_v3  ;;  %3879 = vmatpush.bf16.msra.mxu2 %v3738_v3  ;;  %646 = vst [vmem:[#allocation2 + $0x48] sm:$0x1] %v645_v23  ;;  %v3750_v6 = vld [vmem:[%s4849_s1 + $0x60] sm:$0xff]  ;;  %v431_v10 = vrot.slane %v429_v40, 7  ;;  %v4242_v13 = vrot.slane %v437_v57, 7  ;;  %v440_v14 = vshll.u32 %v4196_v45, 16 }
  0x2c   : > { %3880 = vmatpush.bf16.msra.mxu3 %v3738_v3  ;;  %2328 = vmatpush.bf16.msra.mxu0 %v3738_v3  ;;  %v4183_v41 = vld [vmem:[#allocation2 + $0x18] sm:$0xf]  ;;  %780 = vst [vmem:[#allocation3 + $0x1d4] sm:$0xf] %v4162_v29  ;;  %v501_v3 = vld [vmem:[#allocation2 + $0x24] sm:$0xf]  ;;  %v408_v53 = vor.u32 %v406_v4, %v4218_v56 }
  0x2d   : > { %771 = vst [vmem:[#allocation3 + $0x90] sm:$0xf] %v4183_v41  ;;  %v3766_v7 = vld [vmem:[%s4849_s1 + $0xe0] sm:$0xff]  ;;  %v401_v22 = vrot.slane %v4173_v35, 4  ;;  %v515_v23 = vld [vmem:[#allocation2 + $0x3c] sm:$0xf]  ;;  %v502_v28 = vsel %vm4063_vm5, %v366_v9, %v501_v3  ;;  %v434_v63 = vor.u32 %v432_v46, %v431_v10 }
  0x2e   : > { %1127 = vst [vmem:[#allocation3 + $0x54] sm:$0xf] %v4183_v41  ;;  %v4200_v47 = vld [vmem:[#allocation2 + $0x30] sm:$0xf]  ;;  %v435_v30 = vrot.slane %v431_v10, 4  ;;  %v3757_v45 = vld [vmem:[%s4849_s1 + $0x98] sm:$0xff] }
  0x2f   : > { %2419 = vmatpush.bf16.msrb.mxu2 %v3761_v17  ;;  %2370 = vmatpush.bf16.msrb.mxu1 %v3753_v19  ;;  %1211 = vst [vmem:[#allocation3 + $0x18] sm:$0xf] %v4183_v41  ;;  %v3706_v16 = vld [vmem:[#allocation3 + $0x140] sm:$0xf0]  ;;  %v3774_v17 = vld [vmem:[%s4849_s1 + $0x120] sm:$0xff]  ;;  %v400_v19 = vor.u32 %v398_v31, %v4173_v35  ;;  %v442_v35 = vor.u32 %v440_v14, %v4242_v13  ;;  %p265_p7 = scmp.ge.s32.totalorder %s264_s28, 16 }
  0x30   : > { %2468 = vmatpush.bf16.msrb.mxu3 %v3769_v21  ;;  %2517 = vmatpush.bf16.msrb.mxu0 %v3777_v33  ;;  %775 = vst [vmem:[#allocation3 + $0x120] sm:$0xf] %v4200_v47  ;;  %v627_v21 = vsel %vm4107_vm7, %v3053_v2, %v626_v62  ;;  %v375_v33 = vsel %vm4054_vm4, %v367_v48, %v374_v12  ;;  %v3749_v46 = vld [vmem:[%s4849_s1 + $0x58] sm:$0xff]  ;;  %v310_v2 = vld [vmem:[%s4041_s8] sm:$0xf]  ;;  %s4882_s27 = smov (!%p238_p8, %s4028_s27), 15 }
  0x31   : > { %1131 = vst [vmem:[#allocation3 + $0xe4] sm:$0xf] %v4200_v47  ;;  %v409_v40 = vsel %vm4054_vm4, %v401_v22, %v408_v53  ;;  %v3765_v48 = vld [vmem:[%s4849_s1 + $0xd8] sm:$0xff]  ;;  %v311_v10 = vld [vmem:[%s4041_s8 + $0x4] sm:$0xf]  ;;  %v330_v53 = vshll.u32 %v310_v2, 16 }
  0x32   : > { %1215 = vst [vmem:[#allocation3 + $0xa8] sm:$0xf] %v4200_v47  ;;  %v4224_v0 = vld [vmem:[#allocation2 + $0x48] sm:$0xf]  ;;  %vm783_vm8 = vsmask.f32 3328 }
  0x33   : > { %2420 = vmatpush.bf16.msrb.mxu2 %v3760_v36  ;;  %2371 = vmatpush.bf16.msrb.mxu1 %v3752_v38  ;;  %779 = vst [vmem:[#allocation3 + $0x1b0] sm:$0xf] %v4224_v0  ;;  %v3724_v32 = vld [vmem:[#allocation3 + $0x1d0] sm:$0xf0]  ;;  %v529_v36 = vld [vmem:[#allocation2 + $0x54] sm:$0xf]  ;;  %v516_v38 = vsel %vm4063_vm5, %v400_v19, %v515_v23 }
  0x34   : > { %2469 = vmatpush.bf16.msrb.mxu3 %v3768_v42  ;;  %2518 = vmatpush.bf16.msrb.mxu0 %v3776_v43  ;;  %v3157_v11 = vld [vmem:[#allocation3 + $0x90] sm:$0xf]  ;;  %1135 = vst [vmem:[#allocation3 + $0x174] sm:$0xf] %v4224_v0  ;;  %v530_v34 = vsel %vm4063_vm5, %v434_v63, %v529_v36  ;;  %v443_v43 = vsel %vm4054_vm4, %v435_v30, %v442_v35  ;;  %v291_v63 = vrot.slane %v4155_v25, 4  ;;  %s4880_s28 = smov (%p265_p7, %s264_s28), 14 }
  0x35   : > { %v3158_v15 = vor.u32 %v3688_v60, %v3157_v11  ;;  %1136 = vst [vmem:[#allocation3 + $0x198] sm:$0xf] %v4162_v29  ;;  %v487_v36 = vld [vmem:[#allocation2 + $0xc] sm:$0xf]  ;;  %v491_v25 = vld [vmem:[#allocation2 + $0x14] sm:$0x1] }
  0x36   : > { %1219 = vst [vmem:[#allocation3 + $0x138] sm:$0xf] %v4224_v0  ;;  %vm784_vm10 = vsmask.f32 7440  ;;  %s3665_s29 = sshll.u32 %s4880_s28, 3  ;;  %s3041_s5 = sshll.u32 %s4876_s16, 5 }
  0x37   : > { %2421 = vmatpush.bf16.msrb.mxu2 %v3759_v51  ;;  %2372 = vmatpush.bf16.msrb.mxu1 %v3751_v52  ;;  %v3229_v27 = vld [vmem:[#allocation3 + $0x120] sm:$0xf]  ;;  %1220 = vst [vmem:[#allocation3 + $0x15c] sm:$0xf] %v4162_v29  ;;  %vm4378_vm11 = vmor %vm783_vm8, %vm784_vm10  ;;  %s545_s30 = scalar_lea.vmem %s4037_s7, %s3665_s29  ;;  %s3040_s7 = sshll.u32 %s4882_s27, 1 }
  0x38   : > { %2470 = vmatpush.bf16.msrb.mxu3 %v3767_v54  ;;  %2519 = vmatpush.bf16.msrb.mxu0 %v3775_v55  ;;  %v3230_v31 = vor.u32 %v3706_v16, %v3229_v27  ;;  %301 = vst [vmem:[#allocation2 + $0x4] sm:$0xf] %v290_v59  ;;  %v327_v16 = vshrl.u32 %v310_v2, 16  ;;  %v335_v59 = vshrl.u32 %v311_v10, 16  ;;  %s242_s6 = sadd.s32 %s3041_s5, %s3040_s7  ;;  %s4884_s15 = smov (!%p248_p9, %s3943_s15), 1 }
  0x39   : > { %2339 = vmatmul.bf16.vlgmr.msra.gmra.mxu1 %v3158_v15  ;;  %628 = vst [vmem:[#allocation2] sm:$0x1] %v627_v21  ;;  %s3042_s9 = sshll.u32 %s242_s6, 2  ;;  %s3043_s27 = sshll.u32 %s4876_s16, 1 }
  0x3a   : > { %2349 = vmatmul.bf16.vlgmr.msra.gmra.mxu2 %v3230_v31  ;;  %v3301_v39 = vld [vmem:[#allocation3 + $0x1b0] sm:$0xf]  ;;  %503 = vst [vmem:[#allocation2 + $0x24] sm:$0xf] %v502_v28  ;;  %v329_v22 = vrot.slane %v327_v16, 7  ;;  %v337_v27 = vrot.slane %v335_v59, 7  ;;  %s4801_s12 = scalar_lea.vmem %s4850_s2, %s3042_s9  ;;  %s251_s13 = sadd.s32 %s3043_s27, %s4884_s15 }
  0x3b   : > { %2422 = vmatpush.bf16.msrb.mxu2 %v3758_v5  ;;  %2373 = vmatpush.bf16.msrb.mxu1 %v3750_v6  ;;  %v3302_v42 = vor.u32 %v3724_v32, %v3301_v39  ;;  %504 = vst [vmem:[#allocation2 + $0x28] sm:$0xf] %v375_v33  ;;  %v338_v28 = vshll.u32 %v311_v10, 16  ;;  %s259_s25 = scalar_lea.vmem %s4852_s4, %s251_s13 }
  0x3c   : > { %2471 = vmatpush.bf16.msrb.mxu3 %v3766_v7  ;;  %2520 = vmatpush.bf16.msrb.mxu0 %v3774_v17  ;;  %517 = vst [vmem:[#allocation2 + $0x3c] sm:$0xf] %v516_v38  ;;  %v332_v32 = vor.u32 %v330_v53, %v329_v22  ;;  %v333_v33 = vrot.slane %v329_v22, 4  ;;  %v342_v35 = vrot.slane %v337_v27, 4 }
  0x3d   : > { %2359 = vmatmul.bf16.vlgmr.msra.gmra.mxu3 %v3302_v42  ;;  %518 = vst [vmem:[#allocation2 + $0x40] sm:$0xf] %v409_v40  ;;  %v340_v40 = vor.u32 %v338_v28, %v337_v27  ;;  %v304_v42 = vld [vmem:[#allocation2 + $0x8] sm:$0x1]  ;;  %v3754_v28 = vld [vmem:[%s4849_s1 + $0x80] sm:$0xff] }
  0x3e   : > { %531 = vst [vmem:[#allocation2 + $0x54] sm:$0xf] %v530_v34  ;;  %v492_v59 = vsel %vm4107_vm7, %v342_v35, %v491_v25  ;;  %v3253_v24 = vld [vmem:[#allocation3 + $0x138] sm:$0xf] }
  0x3f   : > { %2423 = vmatpush.bf16.msrb.mxu2 %v3757_v45  ;;  %2374 = vmatpush.bf16.msrb.mxu1 %v3749_v46  ;;  %v4286_v49 = vld [vmem:[#allocation2 + $0x4] sm:$0xf]  ;;  %532 = vst [vmem:[#allocation2 + $0x58] sm:$0xf] %v443_v43  ;;  %v3773_v45 = vld [vmem:[%s4849_s1 + $0x118] sm:$0xff]  ;;  %v341_v2 = vsel %vm4054_vm4, %v333_v33, %v340_v40 }
  0x40   : > { %2472 = vmatpush.bf16.msrb.mxu3 %v3765_v48  ;;  %v4288_v50 = vld [vmem:[#allocation2] sm:$0xf]  ;;  %768 = vst [vmem:[#allocation3 + $0x24] sm:$0xf] %v4286_v49  ;;  %v796_v48 = vshll.u32 %v4286_v49, 16  ;;  %2521 = vmatpush.bf16.msrb.mxu0 %v3773_v45 }
  0x41   : > { %767 = vst [vmem:[#allocation3] sm:$0xf] %v4288_v50  ;;  %v579_v51 = vld [vmem:[#allocation2 + $0x24] sm:$0x2]  ;;  %v635_v54 = vld [vmem:[#allocation2 + $0x24] sm:$0x1] }
  0x42   : > { %v3056_v52 = vrot.slane %v579_v51, 9  ;;  %v4292_v55 = vld [vmem:[#allocation2 + $0x28] sm:$0xf]  ;;  %v787_v17 = vshrl.u32 %v4288_v50, 16  ;;  %v790_v19 = vshll.u32 %v4288_v50, 16  ;;  %v4366_v16 = vrot.slane %v796_v48, 5 }
  0x43   : > { %774 = vst [vmem:[#allocation3 + $0xfc] sm:$0xf] %v4292_v55  ;;  %v581_v57 = vld [vmem:[#allocation2 + $0x3c] sm:$0x2]  ;;  %v641_v62 = vld [vmem:[#allocation2 + $0x3c] sm:$0x1] }
  0x44   : > { %v636_v60 = vsel %vm4107_vm7, %v3056_v52, %v635_v54  ;;  %1130 = vst [vmem:[#allocation3 + $0xc0] sm:$0xf] %v4292_v55  ;;  %v3058_v61 = vrot.slane %v581_v57, 9  ;;  %v4299_v3 = vld [vmem:[#allocation2 + $0x40] sm:$0xf]  ;;  %v789_v30 = vrot.slane %v787_v17, 4  ;;  %v488_v52 = vsel %vm4063_vm5, %v332_v32, %v487_v36 }
  0x45   : > { %637 = vst [vmem:[#allocation2 + $0x24] sm:$0x1] %v636_v60  ;;  %v583_v4 = vld [vmem:[#allocation2 + $0x54] sm:$0x2]  ;;  %v647_v7 = vld [vmem:[#allocation2 + $0x54] sm:$0x1] }
  0x46   : > { %1214 = vst [vmem:[#allocation3 + $0x84] sm:$0xf] %v4292_v55  ;;  %v642_v5 = vsel %vm4107_vm7, %v3058_v61, %v641_v62  ;;  %v3060_v6 = vrot.slane %v583_v4, 9  ;;  %v4309_v15 = vld [vmem:[#allocation2 + $0x58] sm:$0xf]  ;;  %v792_v31 = vrot.slane %v790_v19, 5 }
  0x47   : > { %v3670_v9 = vld [vmem:[#allocation3 + $0x20] sm:$0xf0]  ;;  %643 = vst [vmem:[#allocation2 + $0x3c] sm:$0x1] %v642_v5  ;;  %v3756_v54 = vld [vmem:[%s4849_s1 + $0x90] sm:$0xff]  ;;  %v359_v61 = vrot.slane %v4058_v20, 4 }
  0x48   : > { %v3085_v11 = vld [vmem:[#allocation3] sm:$0xf]  ;;  %778 = vst [vmem:[#allocation3 + $0x18c] sm:$0xf] %v4299_v3  ;;  %v648_v12 = vsel %vm4107_vm7, %v3060_v6, %v647_v7  ;;  %v793_v46 = vor.u32 %v792_v31, %v789_v30  ;;  %v3748_v57 = vld [vmem:[%s4849_s1 + $0x50] sm:$0xff]  ;;  %v800_v6 = vshrl.u32 %v4286_v49, 16  ;;  %2424 = vmatpush.bf16.msrb.mxu2 %v3756_v54 }
  0x49   : > { %v3086_v14 = vor.u32 %v3670_v9, %v3085_v11  ;;  %1134 = vst [vmem:[#allocation3 + $0x150] sm:$0xf] %v4299_v3  ;;  %v3764_v60 = vld [vmem:[%s4849_s1 + $0xd0] sm:$0xff]  ;;  %v498_v5 = vld [vmem:[#allocation2 + $0x20] sm:$0x1]  ;;  %v3755_v20 = vld [vmem:[%s4849_s1 + $0x88] sm:$0xff]  ;;  %v305_v9 = vsel %vm4107_vm7, %v291_v63, %v304_v42  ;;  %2375 = vmatpush.bf16.msrb.mxu1 %v3748_v57 }
  0x4a   : > { %1218 = vst [vmem:[#allocation3 + $0x114] sm:$0xf] %v4299_v3  ;;  %v3697_v38 = vld [vmem:[#allocation3 + $0xf8] sm:$0xf0]  ;;  %2473 = vmatpush.bf16.msrb.mxu3 %v3764_v60  ;;  %v3747_v11 = vld [vmem:[%s4849_s1 + $0x48] sm:$0xff]  ;;  %v499_v22 = vsel %vm4107_vm7, %v359_v61, %v498_v5  ;;  %v3073_v30 = vrot.slane %v4288_v50, 9 }
  0x4b   : > { %2329 = vmatmul.bf16.vlgmr.msra.gmra.mxu0 %v3086_v14  ;;  %649 = vst [vmem:[#allocation2 + $0x54] sm:$0x1] %v648_v12  ;;  %v3772_v4 = vld [vmem:[%s4849_s1 + $0x110] sm:$0xff]  ;;  %v3763_v12 = vld [vmem:[%s4849_s1 + $0xc8] sm:$0xff]  ;;  %v794_v14 = vrot.slane %v793_v46, 4  ;;  %v1039_v31 = vrot.slane %v4286_v49, 5 }
  0x4c   : > { %v4314_v21 = vld [vmem:[#allocation2 + $0x24] sm:$0xf]  ;;  %782 = vst [vmem:[#allocation3 + $0x21c] sm:$0xf] %v4309_v15  ;;  %v3771_v17 = vld [vmem:[%s4849_s1 + $0x108] sm:$0xff]  ;;  %2522 = vmatpush.bf16.msrb.mxu0 %v3772_v4  ;;  %2425 = vmatpush.bf16.msrb.mxu2 %v3755_v20 }
  0x4d   : > { %773 = vst [vmem:[#allocation3 + $0xd8] sm:$0xf] %v4314_v21  ;;  %v656_v19 = vld [vmem:[#allocation2 + $0x4] sm:$0x8]  ;;  %2376 = vmatpush.bf16.msrb.mxu1 %v3747_v11  ;;  %v799_v35 = vsel %vm4378_vm11, %v794_v14, %v4366_v16  ;;  %v1040_v36 = vsel %vm4394_vm13, %v3073_v30, %v1039_v31  ;;  %v658_v40 = vld [vmem:[#allocation2 + $0x1c] sm:$0x8] }
  0x4e   : > { %1129 = vst [vmem:[#allocation3 + $0x9c] sm:$0xf] %v4314_v21  ;;  %v4319_v23 = vld [vmem:[#allocation2 + $0x3c] sm:$0xf]  ;;  %2474 = vmatpush.bf16.msrb.mxu3 %v3763_v12  ;;  %v3746_v32 = vld [vmem:[%s4849_s1 + $0x40] sm:$0xff]  ;;  %v3065_v54 = vrot.slane %v658_v40, 11 }
  0x4f   : > { %1213 = vst [vmem:[#allocation3 + $0x60] sm:$0xf] %v4314_v21  ;;  %v3715_v34 = vld [vmem:[#allocation3 + $0x188] sm:$0xf0]  ;;  %v835_v12 = vshrl.u32 %v4183_v41, 16  ;;  %v838_v14 = vshll.u32 %v4183_v41, 16 }
  0x50   : > { %777 = vst [vmem:[#allocation3 + $0x168] sm:$0xf] %v4319_v23  ;;  %v3762_v33 = vld [vmem:[%s4849_s1 + $0xc0] sm:$0xff]  ;;  %2523 = vmatpush.bf16.msrb.mxu0 %v3771_v17  ;;  %2426 = vmatpush.bf16.msrb.mxu2 %v3754_v28  ;;  %v376_v28 = vrot.slane %v4193_v44, 4  ;;  %v505_v30 = vld [vmem:[#allocation2 + $0x2c] sm:$0x1] }
  0x51   : > { %1133 = vst [vmem:[#allocation3 + $0x12c] sm:$0xf] %v4319_v23  ;;  %v3770_v42 = vld [vmem:[%s4849_s1 + $0x100] sm:$0xff]  ;;  %2377 = vmatpush.bf16.msrb.mxu1 %v3746_v32 }
  0x52   : > { %1217 = vst [vmem:[#allocation3 + $0xf0] sm:$0xf] %v4319_v23  ;;  %v4326_v39 = vld [vmem:[#allocation2 + $0x54] sm:$0xf]  ;;  %2475 = vmatpush.bf16.msrb.mxu3 %v3762_v33  ;;  %v837_v33 = vrot.slane %v835_v12, 4 }
  0x53   : > { %781 = vst [vmem:[#allocation3 + $0x1f8] sm:$0xf] %v4326_v39  ;;  %v3733_v62 = vld [vmem:[#allocation3 + $0x218] sm:$0xf0] }
  0x54   : > { %v3193_v43 = vld [vmem:[#allocation3 + $0xd8] sm:$0xf]  ;;  %1137 = vst [vmem:[#allocation3 + $0x1bc] sm:$0xf] %v4326_v39  ;;  %2524 = vmatpush.bf16.msrb.mxu0 %v3770_v42  ;;  %v506_v42 = vsel %vm4107_vm7, %v376_v28, %v505_v30 }
  0x55   : > { %v3194_v51 = vor.u32 %v3697_v38, %v3193_v43  ;;  %1138 = vst [vmem:[#allocation3 + $0x1e0] sm:$0xf] %v4309_v15  ;;  %v3793_v38 = vld [vmem:[%s4849_s1 + $0x1b8] sm:$0xff]  ;;  %v802_v43 = vrot.slane %v800_v6, 4 }
  0x56   : > { %1221 = vst [vmem:[#allocation3 + $0x180] sm:$0xf] %v4326_v39  ;;  %2615 = vmatpush.bf16.msra.mxu2 %v3793_v38 }
  0x57   : > { %2344 = vmatmul.bf16.gmra.mxu1 %v3194_v51  ;;  %v3265_v7 = vld [vmem:[#allocation3 + $0x168] sm:$0xf]  ;;  %1222 = vst [vmem:[#allocation3 + $0x1a4] sm:$0xf] %v4309_v15  ;;  %v803_v6 = vor.u32 %v802_v43, %v4366_v16  ;;  %v3801_v16 = vld [vmem:[%s4849_s1 + $0x1f8] sm:$0xff] }
  0x58   : > { %v3266_v10 = vor.u32 %v3715_v34, %v3265_v7  ;;  %489 = vst [vmem:[#allocation2 + $0xc] sm:$0xf] %v488_v52  ;;  %v3063_v34 = vrot.slane %v656_v19, 11  ;;  %2664 = vmatpush.bf16.msra.mxu3 %v3801_v16 }
  0x59   : > { %490 = vst [vmem:[#allocation2 + $0x10] sm:$0xf] %v341_v2  ;;  %v804_v32 = vrot.slane %v803_v6, 4 }
  0x5a   : > { %2354 = vmatmul.bf16.gmra.mxu2 %v3266_v10  ;;  %v3337_v53 = vld [vmem:[#allocation3 + $0x1f8] sm:$0xf]  ;;  %306 = vst [vmem:[#allocation2 + $0x8] sm:$0x1] %v305_v9 }
  0x5b   : > { %v3338_v27 = vor.u32 %v3733_v62, %v3337_v53  ;;  %493 = vst [vmem:[#allocation2 + $0x14] sm:$0x1] %v492_v59  ;;  %v3785_v59 = vld [vmem:[%s4849_s1 + $0x178] sm:$0xff]  ;;  %v844_v53 = vshll.u32 %v4119_v1, 16 }
  0x5c   : > { %500 = vst [vmem:[#allocation2 + $0x20] sm:$0x1] %v499_v22  ;;  %v3809_v22 = vld [vmem:[%s4849_s1 + $0x238] sm:$0xff]  ;;  %2566 = vmatpush.bf16.msra.mxu1 %v3785_v59 }
  0x5d   : > { %2364 = vmatmul.bf16.gmra.mxu3 %v3338_v27  ;;  %994 = vst [vmem:[#allocation3 + $0x4] sm:$0xf] %v799_v35  ;;  %v848_v27 = vshrl.u32 %v4119_v1, 16  ;;  %2713 = vmatpush.bf16.msra.mxu0 %v3809_v22  ;;  %v840_v35 = vrot.slane %v838_v14, 5  ;;  %v846_v43 = vrot.slane %v844_v53, 5 }
  0x5e   : > { %1109 = vst [vmem:[#allocation3 + $0x8] sm:$0xf] %v1040_v36  ;;  %v1041_v36 = vrot.slane %v1039_v31, 4 }
  0x5f   : > { %v577_v45 = vld [vmem:[#allocation2 + $0xc] sm:$0x2]  ;;  %v629_v46 = vld [vmem:[#allocation2 + $0xc] sm:$0x1]  ;;  %507 = vst [vmem:[#allocation2 + $0x2c] sm:$0x1] %v506_v42 }
  0x60   : > { %v3054_v48 = vrot.slane %v577_v45, 9  ;;  %v4414_v51 = vld [vmem:[#allocation2 + $0x10] sm:$0xf]  ;;  %v850_v45 = vrot.slane %v848_v27, 4  ;;  %v862_v42 = vshll.u32 %v4314_v21, 16 }
  0x61   : > { %v657_v52 = vld [vmem:[#allocation2 + $0x10] sm:$0x8]  ;;  %770 = vst [vmem:[#allocation3 + $0x6c] sm:$0xf] %v4414_v51  ;;  %v707_v57 = vld [vmem:[#allocation2 + $0x8] sm:$0x1] }
  0x62   : > { %v3064_v60 = vrot.slane %v657_v52, 11  ;;  %v820_v61 = vshll.u32 %v4414_v51, 16  ;;  %v630_v62 = vsel %vm4107_vm7, %v3054_v48, %v629_v46  ;;  %1126 = vst [vmem:[#allocation3 + $0x30] sm:$0xf] %v4414_v51  ;;  %v708_v2 = vsel %vm4410_vm14, %v3063_v34, %v707_v57  ;;  %v710_v4 = vld [vmem:[#allocation2 + $0x14] sm:$0x1] }
  0x63   : > { %v824_v5 = vshrl.u32 %v4414_v51, 16  ;;  %631 = vst [vmem:[#allocation2 + $0xc] sm:$0x1] %v630_v62  ;;  %v713_v9 = vld [vmem:[#allocation2 + $0x20] sm:$0x1]  ;;  %v1046_v17 = vrot.slane %v4414_v51, 5  ;;  %v841_v57 = vor.u32 %v840_v35, %v837_v33  ;;  %v851_v6 = vor.u32 %v850_v45, %v846_v43 }
  0x64   : > { %v711_v7 = vsel %vm4410_vm14, %v3064_v60, %v710_v4  ;;  %v4427_v20 = vrot.slane %v820_v61, 5  ;;  %709 = vst [vmem:[#allocation2 + $0x8] sm:$0x1] %v708_v2  ;;  %v714_v11 = vsel %vm4410_vm14, %v3065_v54, %v713_v9  ;;  %v3784_v45 = vld [vmem:[%s4849_s1 + $0x170] sm:$0xff] }
  0x65   : > { %v826_v10 = vrot.slane %v824_v5, 4  ;;  %712 = vst [vmem:[#allocation2 + $0x14] sm:$0x1] %v711_v7  ;;  %v1048_v40 = vrot.slane %v1046_v17, 4  ;;  %v3792_v5 = vld [vmem:[%s4849_s1 + $0x1b0] sm:$0xff]  ;;  %v842_v53 = vrot.slane %v841_v57, 4  ;;  %2567 = vmatpush.bf16.msra.mxu1 %v3784_v45 }
  0x66   : > { %715 = vst [vmem:[#allocation2 + $0x20] sm:$0x1] %v714_v11  ;;  %2616 = vmatpush.bf16.msra.mxu2 %v3792_v5  ;;  %v852_v28 = vrot.slane %v851_v6, 4  ;;  %v3676_v5 = vld [vmem:[#allocation3 + $0x54] sm:$0xf] }
  0x67   : > { %v827_v19 = vor.u32 %v826_v10, %v4427_v20  ;;  %v3131_v6 = vld [vmem:[#allocation3 + $0x74] sm:$0xf0]  ;;  %v3799_v45 = vld [vmem:[%s4849_s1 + $0x1e8] sm:$0xff] }
  0x68   : > { %v3679_v12 = vld [vmem:[#allocation3 + $0x68] sm:$0xf0] }
  0x69   : > { %v828_v38 = vrot.slane %v827_v19, 4  ;;  %v3095_v59 = vld [vmem:[#allocation3 + $0x2c] sm:$0xf0] }
  0x6a   : > { %v740_v34 = vld [vmem:[#allocation2 + $0xc] sm:$0xf] }
  0x6b   : > { %769 = vst [vmem:[#allocation3 + $0x48] sm:$0xf] %v740_v34  ;;  %v739_v46 = vld [vmem:[#allocation2 + $0x8] sm:$0x1]  ;;  %v811_v44 = vshrl.u32 %v740_v34, 16  ;;  %v814_v48 = vshll.u32 %v740_v34, 16 }
  0x6c   : > { %1125 = vst [vmem:[#allocation3 + $0xc] sm:$0xf] %v740_v34  ;;  %v806_v51 = vshll.u32 %v739_v46, 16  ;;  %v1042_v52 = vrot.slane %v739_v46, 5  ;;  %v742_v54 = vld [vmem:[#allocation2 + $0x14] sm:$0x1] }
  0x6d   : > { %v813_v49 = vrot.slane %v811_v44, 4  ;;  %v816_v31 = vrot.slane %v814_v48, 5  ;;  %v830_v60 = vshll.u32 %v742_v54, 16  ;;  %v3074_v61 = vrot.slane %v740_v34, 9  ;;  %v4458_v11 = vld [vmem:[#allocation2 + $0x20] sm:$0x1] }
  0x6e   : > { %v808_v62 = vrot.slane %v806_v51, 5  ;;  %v1043_v2 = vsel %vm4394_vm13, %v1041_v36, %v1042_v52  ;;  %v1049_v4 = vrot.slane %v742_v54, 5  ;;  %v854_v16 = vshll.u32 %v4458_v11, 16  ;;  %v3666_v44 = vld [vmem:[#allocation3 + $0x4] sm:$0xf] }
  0x6f   : > { %1110 = vst [vmem:[#allocation3 + $0x2c] sm:$0xf] %v1043_v2  ;;  %v817_v7 = vor.u32 %v816_v31, %v813_v49  ;;  %v832_v9 = vrot.slane %v830_v60, 5  ;;  %v1047_v10 = vsel %vm4394_vm13, %v3074_v61, %v1046_v17  ;;  %v859_v36 = vshrl.u32 %v4314_v21, 16 }
  0x70   : > { %v809_v14 = vsel %vm4378_vm11, %v804_v32, %v808_v62  ;;  %1111 = vst [vmem:[#allocation3 + $0x50] sm:$0xf] %v1047_v10  ;;  %v1050_v17 = vsel %vm4394_vm13, %v1048_v40, %v1049_v4  ;;  %v856_v30 = vrot.slane %v854_v16, 5  ;;  %v3800_v40 = vld [vmem:[%s4849_s1 + $0x1f0] sm:$0xff]  ;;  %v1053_v46 = vrot.slane %v4119_v1, 5 }
  0x71   : > { %995 = vst [vmem:[#allocation3 + $0x28] sm:$0xf] %v809_v14  ;;  %v818_v19 = vrot.slane %v817_v7, 4  ;;  %v833_v22 = vsel %vm4378_vm11, %v828_v38, %v832_v9  ;;  %v3093_v38 = vld [vmem:[#allocation3 + $0x8] sm:$0xf]  ;;  %v847_v51 = vsel %vm4378_vm11, %v842_v53, %v846_v43  ;;  %2665 = vmatpush.bf16.msra.mxu3 %v3800_v40  ;;  %v861_v57 = vrot.slane %v859_v36, 4 }
  0x72   : > { %v3121_v27 = vld [vmem:[#allocation3 + $0x48] sm:$0xf]  ;;  %1168 = vst [vmem:[#allocation3 + $0x34] sm:$0xf] %v833_v22  ;;  %v857_v54 = vsel %vm4378_vm11, %v852_v28, %v856_v30  ;;  %v864_v49 = vrot.slane %v862_v42, 5  ;;  %v3075_v1 = vrot.slane %v4183_v41, 9 }
  0x73   : > { %v3122_v33 = vor.u32 %v3679_v12, %v3121_v27  ;;  %v3667_v32 = vld [vmem:[#allocation3 + $0xc] sm:$0xf]  ;;  %v823_v35 = vsel %vm4378_vm11, %v818_v19, %v4427_v20  ;;  %997 = vst [vmem:[#allocation3 + $0x70] sm:$0xf] %v833_v22  ;;  %v3808_v20 = vld [vmem:[%s4849_s1 + $0x230] sm:$0xff]  ;;  %v1055_v61 = vrot.slane %v1053_v46, 4 }
  0x74   : > { %v3098_v34 = vor.u32 %v3667_v32, %v3095_v59  ;;  %1167 = vst [vmem:[#allocation3 + $0x10] sm:$0xf] %v823_v35  ;;  %2714 = vmatpush.bf16.msra.mxu0 %v3808_v20  ;;  %v1056_v43 = vrot.slane %v4458_v11, 5  ;;  %v659_v62 = vld [vmem:[#allocation2 + $0x28] sm:$0x8]  ;;  %v865_v2 = vor.u32 %v864_v49, %v861_v57  ;;  %v1054_v4 = vsel %vm4394_vm13, %v3075_v1, %v1053_v46 }
  0x75   : > { %2334 = vmatmul.bf16.gmra.mxu0 %v3122_v33  ;;  %996 = vst [vmem:[#allocation3 + $0x4c] sm:$0xf] %v823_v35  ;;  %v3791_v7 = vld [vmem:[%s4849_s1 + $0x1a8] sm:$0xff]  ;;  %v3066_v9 = vrot.slane %v659_v62, 11  ;;  %v872_v53 = vshrl.u32 %v4292_v55, 16  ;;  %v883_v30 = vshrl.u32 %v4200_v47, 16  ;;  %2666 = vmatpush.bf16.msra.mxu3 %v3799_v45 }
  0x76   : > { %v3671_v48 = vld [vmem:[#allocation3 + $0x28] sm:$0xf0]  ;;  %2476 = vmatmul.bf16.vlgmr.msrb.gmra.mxu3 %v3098_v34  ;;  %1112 = vst [vmem:[#allocation3 + $0x74] sm:$0xf] %v1050_v17  ;;  %v1057_v41 = vsel %vm4394_vm13, %v1055_v61, %v1056_v43  ;;  %2617 = vmatpush.bf16.msra.mxu2 %v3791_v7  ;;  %v716_v14 = vld [vmem:[#allocation2 + $0x2c] sm:$0x1] }
  0x77   : > { %v3094_v52 = vor.u32 %v3671_v48, %v3093_v38  ;;  %1195 = vst [vmem:[#allocation3 + $0x14] sm:$0xf] %v1047_v10  ;;  %v868_v10 = vshll.u32 %v4292_v55, 16  ;;  %v866_v16 = vrot.slane %v865_v2, 4  ;;  %v3129_v19 = vld [vmem:[#allocation3 + $0x50] sm:$0xf]  ;;  %v717_v28 = vsel %vm4410_vm14, %v3066_v9, %v716_v14 }
  0x78   : > { %v3087_v31 = vld [vmem:[#allocation3 + $0x24] sm:$0xf0]  ;;  %1196 = vst [vmem:[#allocation3 + $0x38] sm:$0xf] %v1050_v17  ;;  %v3134_v17 = vor.u32 %v3676_v5, %v3131_v6  ;;  %v393_v32 = vrot.slane %v4067_v26, 4  ;;  %v886_v35 = vshll.u32 %v4200_v47, 16 }
  0x79   : > { %v3090_v60 = vor.u32 %v3666_v44, %v3087_v31  ;;  %2427 = vmatmul.bf16.vlgmr.msrb.gmra.mxu2 %v3094_v52  ;;  %1169 = vst [vmem:[#allocation3 + $0x58] sm:$0xf] %v847_v51  ;;  %v3672_v12 = vld [vmem:[#allocation3 + $0x30] sm:$0xf0]  ;;  %v870_v22 = vrot.slane %v868_v10, 5  ;;  %v874_v40 = vrot.slane %v872_v53, 4 }
  0x7a   : > { %1170 = vst [vmem:[#allocation3 + $0x7c] sm:$0xf] %v857_v54  ;;  %v3123_v42 = vld [vmem:[#allocation3 + $0x6c] sm:$0xf0]  ;;  %v512_v38 = vld [vmem:[#allocation2 + $0x38] sm:$0x1] }
  0x7b   : > { %2378 = vmatmul.bf16.vlgmr.msrb.gmra.mxu1 %v3090_v60  ;;  %1253 = vst [vmem:[#allocation3 + $0x1c] sm:$0xf] %v847_v51  ;;  %v3101_v11 = vld [vmem:[#allocation3 + $0x10] sm:$0xf]  ;;  %v871_v33 = vsel %vm4378_vm11, %v866_v16, %v870_v22  ;;  %v885_v46 = vrot.slane %v883_v30, 4  ;;  %v3076_v44 = vrot.slane %v4314_v21, 9  ;;  %v875_v1 = vor.u32 %v874_v40, %v870_v22 }
  0x7c   : > { %1254 = vst [vmem:[#allocation3 + $0x40] sm:$0xf] %v857_v54  ;;  %v3102_v59 = vor.u32 %v3672_v12, %v3101_v11  ;;  %v3675_v36 = vld [vmem:[#allocation3 + $0x4c] sm:$0xf]  ;;  %v3783_v20 = vld [vmem:[%s4849_s1 + $0x168] sm:$0xff]  ;;  %v1060_v48 = vrot.slane %v4292_v55, 5  ;;  %v513_v55 = vsel %vm4107_vm7, %v393_v32, %v512_v38 }
  0x7d   : > { %998 = vst [vmem:[#allocation3 + $0x94] sm:$0xf] %v847_v51  ;;  %v3680_v27 = vld [vmem:[#allocation3 + $0x70] sm:$0xf0]  ;;  %v3126_v51 = vor.u32 %v3675_v36, %v3123_v42  ;;  %2568 = vmatpush.bf16.msra.mxu1 %v3783_v20  ;;  %v888_v52 = vrot.slane %v886_v35, 5  ;;  %v410_v57 = vrot.slane %v4218_v56, 4 }
  0x7e   : > { %999 = vst [vmem:[#allocation3 + $0xb8] sm:$0xf] %v857_v54  ;;  %v3130_v34 = vor.u32 %v3680_v27, %v3129_v19  ;;  %v3807_v26 = vld [vmem:[%s4849_s1 + $0x228] sm:$0xff]  ;;  %v892_v54 = vshll.u32 %v4129_v8, 16  ;;  %v1061_v49 = vsel %vm4394_vm13, %v3076_v44, %v1060_v48  ;;  %v519_v31 = vld [vmem:[#allocation2 + $0x44] sm:$0x1] }
  0x7f   : > { %1113 = vst [vmem:[#allocation3 + $0x98] sm:$0xf] %v1054_v4  ;;  %2715 = vmatpush.bf16.msra.mxu0 %v3807_v26  ;;  %v889_v21 = vor.u32 %v888_v52, %v885_v46  ;;  %v1062_v60 = vrot.slane %v1060_v48, 4  ;;  %v520_v56 = vsel %vm4107_vm7, %v410_v57, %v519_v31  ;;  %v3790_v62 = vld [vmem:[%s4849_s1 + $0x1a0] sm:$0xff]  ;;  %v876_v5 = vrot.slane %v875_v1, 4 }
  0x80   : > { %1114 = vst [vmem:[#allocation3 + $0xbc] sm:$0xf] %v1057_v41  ;;  %v4521_v61 = vrot.slane %v892_v54, 5  ;;  %v660_v7 = vld [vmem:[#allocation2 + $0x34] sm:$0x8]  ;;  %2618 = vmatpush.bf16.msra.mxu2 %v3790_v62  ;;  %v907_v35 = vshrl.u32 %v4319_v23, 16 }
  0x81   : > { %1281 = vst [vmem:[#allocation3 + $0x20] sm:$0xf] %v1054_v4  ;;  %v890_v2 = vrot.slane %v889_v21, 4  ;;  %v3137_v9 = vld [vmem:[#allocation3 + $0x58] sm:$0xf]  ;;  %v3067_v19 = vrot.slane %v660_v7, 11 }
  0x82   : > { %1282 = vst [vmem:[#allocation3 + $0x44] sm:$0xf] %v1057_v41  ;;  %v3681_v10 = vld [vmem:[#allocation3 + $0x78] sm:$0xf0]  ;;  %v3167_v12 = vld [vmem:[#allocation3 + $0xbc] sm:$0xf0] }
  0x83   : > { %1197 = vst [vmem:[#allocation3 + $0x5c] sm:$0xf] %v1054_v4  ;;  %v3685_v4 = vld [vmem:[#allocation3 + $0x9c] sm:$0xf]  ;;  %v895_v11 = vsel %vm4378_vm11, %v890_v2, %v4521_v61  ;;  %v3138_v22 = vor.u32 %v3681_v10, %v3137_v9  ;;  %v661_v32 = vld [vmem:[#allocation2 + $0x40] sm:$0x8] }
  0x84   : > { %1198 = vst [vmem:[#allocation3 + $0x80] sm:$0xf] %v1057_v41  ;;  %v910_v36 = vshll.u32 %v4319_v23, 16  ;;  %v909_v40 = vrot.slane %v907_v35, 4  ;;  %v916_v20 = vshll.u32 %v4299_v3, 16  ;;  %v3798_v26 = vld [vmem:[%s4849_s1 + $0x1e0] sm:$0xff] }
  0x85   : > { %2525 = vmatmul.bf16.vlgmr.msrb.gmra.mxu0 %v3102_v59  ;;  %718 = vst [vmem:[#allocation2 + $0x2c] sm:$0x1] %v717_v28  ;;  %v896_v59 = vshrl.u32 %v4129_v8, 16  ;;  %v3684_v28 = vld [vmem:[#allocation3 + $0x94] sm:$0xf]  ;;  %v3782_v44 = vld [vmem:[%s4849_s1 + $0x160] sm:$0xff]  ;;  %2667 = vmatpush.bf16.msra.mxu3 %v3798_v26 }
  0x86   : > { %2481 = vmatmul.bf16.gmra.mxu3 %v3134_v17  ;;  %1171 = vst [vmem:[#allocation3 + $0xa0] sm:$0xf] %v871_v33  ;;  %v3165_v53 = vld [vmem:[#allocation3 + $0x98] sm:$0xf]  ;;  %v912_v45 = vrot.slane %v910_v36, 5  ;;  %v3806_v48 = vld [vmem:[%s4849_s1 + $0x220] sm:$0xff]  ;;  %2569 = vmatpush.bf16.msra.mxu1 %v3782_v44 }
  0x87   : > { %1000 = vst [vmem:[#allocation3 + $0xdc] sm:$0xf] %v871_v33  ;;  %v3689_v27 = vld [vmem:[#allocation3 + $0xb8] sm:$0xf0]  ;;  %v3159_v30 = vld [vmem:[#allocation3 + $0xb4] sm:$0xf0]  ;;  %2716 = vmatpush.bf16.msra.mxu0 %v3806_v48 }
  0x88   : > { %1255 = vst [vmem:[#allocation3 + $0x64] sm:$0xf] %v871_v33  ;;  %v3170_v33 = vor.u32 %v3685_v4, %v3167_v12  ;;  %v898_v38 = vrot.slane %v896_v59, 4  ;;  %v3166_v46 = vor.u32 %v3689_v27, %v3165_v53  ;;  %v3077_v52 = vrot.slane %v4200_v47, 9  ;;  %v526_v62 = vld [vmem:[#allocation2 + $0x50] sm:$0x1] }
  0x89   : > { %2432 = vmatmul.bf16.gmra.mxu2 %v3130_v34  ;;  %1115 = vst [vmem:[#allocation3 + $0xe0] sm:$0xf] %v1061_v49  ;;  %v1067_v54 = vrot.slane %v4129_v8, 5  ;;  %v913_v57 = vor.u32 %v912_v45, %v909_v40  ;;  %v918_v21 = vrot.slane %v916_v20, 5  ;;  %v3203_v12 = vld [vmem:[#allocation3 + $0x104] sm:$0xf0] }
  0x8a   : > { %1199 = vst [vmem:[#allocation3 + $0xa4] sm:$0xf] %v1061_v49  ;;  %v899_v47 = vor.u32 %v898_v38, %v4521_v61  ;;  %v934_v35 = vshll.u32 %v4224_v0, 16  ;;  %v1074_v38 = vrot.slane %v4299_v3, 5  ;;  %v3797_v40 = vld [vmem:[%s4849_s1 + $0x1d8] sm:$0xff] }
  0x8b   : > { %2383 = vmatmul.bf16.gmra.mxu1 %v3126_v51  ;;  %1283 = vst [vmem:[#allocation3 + $0x68] sm:$0xf] %v1061_v49  ;;  %v3068_v51 = vrot.slane %v661_v32, 11  ;;  %v3162_v49 = vor.u32 %v3684_v28, %v3159_v30  ;;  %v1068_v1 = vsel %vm4394_vm13, %v3077_v52, %v1067_v54  ;;  %v1069_v4 = vrot.slane %v1067_v54, 4  ;;  %v3781_v45 = vld [vmem:[%s4849_s1 + $0x158] sm:$0xff]  ;;  %2668 = vmatpush.bf16.msra.mxu3 %v3797_v40 }
  0x8c   : > { %v748_v43 = vld [vmem:[#allocation2 + $0x2c] sm:$0x1]  ;;  %514 = vst [vmem:[#allocation2 + $0x38] sm:$0x1] %v513_v55  ;;  %v914_v55 = vrot.slane %v913_v57, 4  ;;  %v3805_v20 = vld [vmem:[%s4849_s1 + $0x218] sm:$0xff]  ;;  %2570 = vmatpush.bf16.msra.mxu1 %v3781_v45 }
  0x8d   : > { %v878_v6 = vshll.u32 %v748_v43, 16  ;;  %v1063_v41 = vrot.slane %v748_v43, 5  ;;  %521 = vst [vmem:[#allocation2 + $0x44] sm:$0x1] %v520_v56  ;;  %v427_v56 = vrot.slane %v4075_v37, 4  ;;  %v1076_v48 = vrot.slane %v1074_v38, 4  ;;  %2717 = vmatpush.bf16.msra.mxu0 %v3805_v20 }
  0x8e   : > { %1173 = vst [vmem:[#allocation3 + $0xe8] sm:$0xf] %v895_v11  ;;  %v919_v43 = vsel %vm4378_vm11, %v914_v55, %v918_v21  ;;  %v3173_v2 = vld [vmem:[#allocation3 + $0xa0] sm:$0xf]  ;;  %v3693_v27 = vld [vmem:[#allocation3 + $0xdc] sm:$0xf] }
  0x8f   : > { %v880_v14 = vrot.slane %v878_v6, 5  ;;  %v1064_v16 = vsel %vm4394_vm13, %v1062_v60, %v1063_v41  ;;  %1002 = vst [vmem:[#allocation3 + $0x124] sm:$0xf] %v895_v11  ;;  %v920_v60 = vshrl.u32 %v4299_v3, 16  ;;  %v900_v41 = vrot.slane %v899_v47, 4  ;;  %v3788_v47 = vld [vmem:[%s4849_s1 + $0x190] sm:$0xff] }
  0x90   : > { %1116 = vst [vmem:[#allocation3 + $0x104] sm:$0xf] %v1064_v16  ;;  %v527_v37 = vsel %vm4107_vm7, %v427_v56, %v526_v62  ;;  %v3078_v3 = vrot.slane %v4319_v23, 9  ;;  %v936_v52 = vrot.slane %v934_v35, 5  ;;  %v662_v57 = vld [vmem:[#allocation2 + $0x4c] sm:$0x8] }
  0x91   : > { %v881_v17 = vsel %vm4378_vm11, %v876_v5, %v880_v14  ;;  %1200 = vst [vmem:[#allocation3 + $0xc8] sm:$0xf] %v1064_v16  ;;  %v3789_v5 = vld [vmem:[%s4849_s1 + $0x198] sm:$0xff]  ;;  %v922_v61 = vrot.slane %v920_v60, 4  ;;  %v940_v23 = vshll.u32 %v4162_v29, 16  ;;  %v3069_v55 = vrot.slane %v662_v57, 11 }
  0x92   : > { %1172 = vst [vmem:[#allocation3 + $0xc4] sm:$0xf] %v881_v17  ;;  %2619 = vmatpush.bf16.msra.mxu2 %v3789_v5  ;;  %v3239_v62 = vld [vmem:[#allocation3 + $0x14c] sm:$0xf0]  ;;  %v325_v5 = vld [vmem:[%s4041_s8 + $0x3c] sm:$0xf] }
  0x93   : > { %1001 = vst [vmem:[#allocation3 + $0x100] sm:$0xf] %v881_v17  ;;  %v719_v42 = vld [vmem:[#allocation2 + $0x38] sm:$0x1]  ;;  %v923_v59 = vor.u32 %v922_v61, %v918_v21  ;;  %v3796_v45 = vld [vmem:[%s4849_s1 + $0x1d0] sm:$0xff] }
  0x94   : > { %1256 = vst [vmem:[#allocation3 + $0x88] sm:$0xf] %v881_v17  ;;  %v720_v34 = vsel %vm4410_vm14, %v3067_v19, %v719_v42  ;;  %v722_v31 = vld [vmem:[#allocation2 + $0x44] sm:$0x1]  ;;  %v324_v21 = vld [vmem:[%s4041_s8 + $0x38] sm:$0xf]  ;;  %2669 = vmatpush.bf16.msra.mxu3 %v3796_v45  ;;  %s252_s8 = scalar_lea.vmem %s4851_s3, %s251_s13 }
  0x95   : > { %2530 = vmatmul.bf16.gmra.mxu0 %v3138_v22  ;;  %1284 = vst [vmem:[#allocation3 + $0x8c] sm:$0xf] %v1064_v16  ;;  %v723_v8 = vsel %vm4410_vm14, %v3068_v51, %v722_v31  ;;  %v3201_v22 = vld [vmem:[#allocation3 + $0xe0] sm:$0xf]  ;;  %v924_v36 = vrot.slane %v923_v59, 4  ;;  %v3780_v20 = vld [vmem:[%s4849_s1 + $0x150] sm:$0xff] }
  0x96   : > { %2486 = vmatmul.bf16.gmra.mxu3 %v3170_v33  ;;  %721 = vst [vmem:[#allocation2 + $0x38] sm:$0x1] %v720_v34  ;;  %v931_v33 = vshrl.u32 %v4224_v0, 16  ;;  %v3209_v60 = vld [vmem:[#allocation3 + $0xe8] sm:$0xf]  ;;  %2620 = vmatpush.bf16.msra.mxu2 %v3788_v47 }
  0x97   : > { %1257 = vst [vmem:[#allocation3 + $0xac] sm:$0xf] %v895_v11  ;;  %v3694_v11 = vld [vmem:[#allocation3 + $0xe4] sm:$0xf]  ;;  %2571 = vmatpush.bf16.msra.mxu1 %v3780_v20 }
  0x98   : > { %1117 = vst [vmem:[#allocation3 + $0x128] sm:$0xf] %v1068_v1  ;;  %v3698_v53 = vld [vmem:[#allocation3 + $0x100] sm:$0xf0]  ;;  %v3206_v28 = vor.u32 %v3694_v11, %v3203_v12 }
  0x99   : > { %2437 = vmatmul.bf16.gmra.mxu2 %v3166_v46  ;;  %1201 = vst [vmem:[#allocation3 + $0xec] sm:$0xf] %v1068_v1  ;;  %v3690_v7 = vld [vmem:[#allocation3 + $0xc0] sm:$0xf0]  ;;  %v3202_v34 = vor.u32 %v3698_v53, %v3201_v22  ;;  %v933_v46 = vrot.slane %v931_v33, 4 }
  0x9a   : > { %1285 = vst [vmem:[#allocation3 + $0xb0] sm:$0xf] %v1068_v1  ;;  %v3174_v19 = vor.u32 %v3690_v7, %v3173_v2  ;;  %v3195_v17 = vld [vmem:[#allocation3 + $0xfc] sm:$0xf0]  ;;  %v4594_v2 = vrot.slane %v940_v23, 5  ;;  %v444_v7 = vrot.slane %v4242_v13, 4 }
  0x9b   : > { %2388 = vmatmul.bf16.gmra.mxu1 %v3162_v49  ;;  %724 = vst [vmem:[#allocation2 + $0x44] sm:$0x1] %v723_v8  ;;  %v3198_v44 = vor.u32 %v3693_v27, %v3195_v17  ;;  %v1075_v49 = vsel %vm4394_vm13, %v3078_v3, %v1074_v38  ;;  %v937_v31 = vor.u32 %v936_v52, %v933_v46  ;;  %v955_v13 = vshrl.u32 %v4326_v39, 16  ;;  %v3804_v46 = vld [vmem:[%s4849_s1 + $0x210] sm:$0xff] }
  0x9c   : > { %1175 = vst [vmem:[#allocation3 + $0x130] sm:$0xf] %v919_v43  ;;  %v958_v17 = vshll.u32 %v4326_v39, 16  ;;  %v1081_v38 = vrot.slane %v4162_v29, 5  ;;  %2718 = vmatpush.bf16.msra.mxu0 %v3804_v46 }
  0x9d   : > { %v751_v6 = vld [vmem:[#allocation2 + $0x38] sm:$0x1]  ;;  %1004 = vst [vmem:[#allocation3 + $0x16c] sm:$0xf] %v919_v43  ;;  %v938_v56 = vrot.slane %v937_v31, 4 }
  0x9e   : > { %v902_v9 = vshll.u32 %v751_v6, 16  ;;  %v1070_v10 = vrot.slane %v751_v6, 5  ;;  %1259 = vst [vmem:[#allocation3 + $0xf4] sm:$0xf] %v919_v43  ;;  %v3703_v43 = vld [vmem:[#allocation3 + $0x12c] sm:$0xf] }
  0x9f   : > { %528 = vst [vmem:[#allocation2 + $0x50] sm:$0x1] %v527_v37  ;;  %v446_v6 = vshrl.u32 %v324_v21, 16  ;;  %v3237_v11 = vld [vmem:[#allocation3 + $0x128] sm:$0xf]  ;;  %v943_v12 = vsel %vm4378_vm11, %v938_v56, %v4594_v2  ;;  %v3242_v27 = vor.u32 %v3703_v43, %v3239_v62 }
  0xa0   : > { %v904_v14 = vrot.slane %v902_v9, 5  ;;  %v1071_v16 = vsel %vm4394_vm13, %v1069_v4, %v1070_v10  ;;  %1119 = vst [vmem:[#allocation3 + $0x170] sm:$0xf] %v1075_v49  ;;  %v944_v4 = vshrl.u32 %v4162_v29, 16  ;;  %v449_v9 = vshll.u32 %v324_v21, 16 }
  0xa1   : > { %1118 = vst [vmem:[#allocation3 + $0x14c] sm:$0xf] %v1071_v16  ;;  %v457_v10 = vshll.u32 %v325_v5, 16  ;;  %v3712_v43 = vld [vmem:[#allocation3 + $0x174] sm:$0xf] }
  0xa2   : > { %v905_v30 = vsel %vm4378_vm11, %v900_v41, %v904_v14  ;;  %1202 = vst [vmem:[#allocation3 + $0x110] sm:$0xf] %v1071_v16  ;;  %v754_v32 = vld [vmem:[#allocation2 + $0x44] sm:$0x1]  ;;  %v454_v41 = vshrl.u32 %v325_v5, 16  ;;  %v946_v53 = vrot.slane %v944_v4, 4 }
  0xa3   : > { %1174 = vst [vmem:[#allocation3 + $0x10c] sm:$0xf] %v905_v30  ;;  %v926_v42 = vshll.u32 %v754_v32, 16  ;;  %v1077_v51 = vrot.slane %v754_v32, 5  ;;  %v533_v14 = vld [vmem:[#allocation2 + $0x5c] sm:$0x1] }
  0xa4   : > { %1003 = vst [vmem:[#allocation3 + $0x148] sm:$0xf] %v905_v30  ;;  %v4604_v59 = vrot.slane %v454_v41, 7  ;;  %v534_v33 = vsel %vm4107_vm7, %v444_v7, %v533_v14  ;;  %v3245_v21 = vld [vmem:[#allocation3 + $0x130] sm:$0xf] }
  0xa5   : > { %2535 = vmatmul.bf16.gmra.mxu0 %v3174_v19  ;;  %1258 = vst [vmem:[#allocation3 + $0xd0] sm:$0xf] %v905_v30  ;;  %v928_v26 = vrot.slane %v926_v42, 5  ;;  %v1078_v1 = vsel %vm4394_vm13, %v1076_v48, %v1077_v51  ;;  %v3702_v30 = vld [vmem:[#allocation3 + $0x124] sm:$0xf]  ;;  %v3079_v48 = vrot.slane %v4224_v0, 9 }
  0xa6   : > { %2491 = vmatmul.bf16.gmra.mxu3 %v3206_v28  ;;  %1286 = vst [vmem:[#allocation3 + $0xd4] sm:$0xf] %v1071_v16  ;;  %v725_v8 = vld [vmem:[#allocation2 + $0x50] sm:$0x1]  ;;  %v448_v16 = vrot.slane %v446_v6, 7  ;;  %v964_v0 = vshll.u32 %v4309_v15, 16 }
  0xa7   : > { %v929_v54 = vsel %vm4378_vm11, %v924_v36, %v928_v26  ;;  %1120 = vst [vmem:[#allocation3 + $0x194] sm:$0xf] %v1078_v1  ;;  %v726_v37 = vsel %vm4410_vm14, %v3069_v55, %v725_v8  ;;  %v536_v28 = vld [vmem:[#allocation2 + $0x60] sm:$0xf]  ;;  %v459_v36 = vor.u32 %v457_v10, %v4604_v59  ;;  %v960_v26 = vrot.slane %v958_v17, 5  ;;  %v3787_v8 = vld [vmem:[%s4849_s1 + $0x188] sm:$0xff] }
  0xa8   : > { %1176 = vst [vmem:[#allocation3 + $0x154] sm:$0xf] %v929_v54  ;;  %v3707_v22 = vld [vmem:[#allocation3 + $0x148] sm:$0xf0]  ;;  %v451_v32 = vor.u32 %v449_v9, %v448_v16  ;;  %v452_v35 = vrot.slane %v448_v16, 4  ;;  %v1082_v52 = vsel %vm4394_vm13, %v3079_v48, %v1081_v38  ;;  %2621 = vmatpush.bf16.msra.mxu2 %v3787_v8  ;;  %v966_v41 = vrot.slane %v964_v0, 5 }
  0xa9   : > { %2442 = vmatmul.bf16.gmra.mxu2 %v3202_v34  ;;  %1005 = vst [vmem:[#allocation3 + $0x190] sm:$0xf] %v929_v54  ;;  %v957_v34 = vrot.slane %v955_v13, 4  ;;  %v3238_v40 = vor.u32 %v3707_v22, %v3237_v11  ;;  %v3275_v6 = vld [vmem:[#allocation3 + $0x194] sm:$0xf0] }
  0xaa   : > { %1260 = vst [vmem:[#allocation3 + $0x118] sm:$0xf] %v929_v54  ;;  %v3699_v61 = vld [vmem:[#allocation3 + $0x108] sm:$0xf0]  ;;  %v460_v29 = vsel %vm4054_vm4, %v452_v35, %v459_v36  ;;  %v537_v3 = vsel %vm4063_vm5, %v451_v32, %v536_v28  ;;  %v1083_v54 = vrot.slane %v1081_v38, 4  ;;  %v3795_v28 = vld [vmem:[%s4849_s1 + $0x1c8] sm:$0xff] }
  0xab   : > { %2393 = vmatmul.bf16.gmra.mxu1 %v3198_v44  ;;  %1203 = vst [vmem:[#allocation3 + $0x134] sm:$0xf] %v1075_v49  ;;  %v3210_v19 = vor.u32 %v3699_v61, %v3209_v60  ;;  %v3231_v42 = vld [vmem:[#allocation3 + $0x144] sm:$0xf0]  ;;  %v947_v44 = vor.u32 %v946_v53, %v4594_v2  ;;  %v961_v31 = vor.u32 %v960_v26, %v957_v34  ;;  %v3273_v14 = vld [vmem:[#allocation3 + $0x170] sm:$0xf] }
  0xac   : > { %1204 = vst [vmem:[#allocation3 + $0x158] sm:$0xf] %v1078_v1  ;;  %v3234_v51 = vor.u32 %v3702_v30, %v3231_v42  ;;  %v3711_v53 = vld [vmem:[#allocation3 + $0x16c] sm:$0xf]  ;;  %v3779_v30 = vld [vmem:[%s4849_s1 + $0x148] sm:$0xff]  ;;  %v1088_v32 = vrot.slane %v4309_v15, 5  ;;  %2670 = vmatpush.bf16.msra.mxu3 %v3795_v28 }
  0xad   : > { %1287 = vst [vmem:[#allocation3 + $0xf8] sm:$0xf] %v1075_v49  ;;  %v663_v49 = vld [vmem:[#allocation2 + $0x58] sm:$0x8]  ;;  %v948_v23 = vrot.slane %v947_v44, 4  ;;  %v962_v2 = vrot.slane %v961_v31, 4  ;;  %2572 = vmatpush.bf16.msra.mxu1 %v3779_v30 }
  0xae   : > { %1288 = vst [vmem:[#allocation3 + $0x11c] sm:$0xf] %v1078_v1  ;;  %v3070_v56 = vrot.slane %v663_v49, 11  ;;  %v3716_v16 = vld [vmem:[#allocation3 + $0x190] sm:$0xf0]  ;;  %v3080_v35 = vrot.slane %v4326_v39, 9 }
  0xaf   : > { %727 = vst [vmem:[#allocation2 + $0x50] sm:$0x1] %v726_v37  ;;  %v3708_v4 = vld [vmem:[#allocation3 + $0x150] sm:$0xf0]  ;;  %v968_v37 = vshrl.u32 %v4309_v15, 16  ;;  %v967_v11 = vsel %vm4378_vm11, %v962_v2, %v966_v41  ;;  %v3274_v17 = vor.u32 %v3716_v16, %v3273_v14  ;;  %v461_v36 = vrot.slane %v4604_v59, 4 }
  0xb0   : > { %1177 = vst [vmem:[#allocation3 + $0x178] sm:$0xf] %v943_v12  ;;  %v3246_v10 = vor.u32 %v3708_v4, %v3245_v21  ;;  %v1089_v45 = vsel %vm4394_vm13, %v3080_v35, %v1088_v32  ;;  %v1090_v15 = vrot.slane %v1088_v32, 4  ;;  %v3786_v2 = vld [vmem:[%s4849_s1 + $0x180] sm:$0xff] }
  0xb1   : > { %1006 = vst [vmem:[#allocation3 + $0x1b4] sm:$0xf] %v943_v12  ;;  %v970_v22 = vrot.slane %v968_v37, 4  ;;  %2622 = vmatpush.bf16.msra.mxu2 %v3786_v2  ;;  %v3778_v16 = vld [vmem:[%s4849_s1 + $0x140] sm:$0xff] }
  0xb2   : > { %1261 = vst [vmem:[#allocation3 + $0x13c] sm:$0xf] %v943_v12  ;;  %2573 = vmatpush.bf16.msra.mxu1 %v3778_v16  ;;  %v3674_v16 = vld [vmem:[#allocation3 + $0x40] sm:$0xf0] }
  0xb3   : > { %535 = vst [vmem:[#allocation2 + $0x5c] sm:$0x1] %v534_v33  ;;  %v3803_v33 = vld [vmem:[%s4849_s1 + $0x208] sm:$0xff]  ;;  %v971_v38 = vor.u32 %v970_v22, %v966_v41 }
  0xb4   : > { %538 = vst [vmem:[#allocation2 + $0x60] sm:$0xf] %v537_v3  ;;  %2719 = vmatpush.bf16.msra.mxu0 %v3803_v33  ;;  %v3721_v3 = vld [vmem:[#allocation3 + $0x1bc] sm:$0xf] }
  0xb5   : > { %2540 = vmatmul.bf16.gmra.mxu0 %v3210_v19  ;;  %539 = vst [vmem:[#allocation2 + $0x64] sm:$0xf] %v460_v29  ;;  %v3278_v19 = vor.u32 %v3712_v43, %v3275_v6  ;;  %v972_v20 = vrot.slane %v971_v38, 4 }
  0xb6   : > { %2496 = vmatmul.bf16.gmra.mxu3 %v3242_v27  ;;  %v757_v57 = vld [vmem:[#allocation2 + $0x50] sm:$0x1]  ;;  %1121 = vst [vmem:[#allocation3 + $0x1b8] sm:$0xf] %v1082_v52  ;;  %v3267_v27 = vld [vmem:[#allocation3 + $0x18c] sm:$0xf0] }
  0xb7   : > { %v950_v1 = vshll.u32 %v757_v57, 16  ;;  %v1084_v55 = vrot.slane %v757_v57, 5  ;;  %1205 = vst [vmem:[#allocation3 + $0x17c] sm:$0xf] %v1082_v52  ;;  %v3270_v42 = vor.u32 %v3711_v53, %v3267_v27  ;;  %v3281_v29 = vld [vmem:[#allocation3 + $0x178] sm:$0xf] }
  0xb8   : > { %1289 = vst [vmem:[#allocation3 + $0x140] sm:$0xf] %v1082_v52  ;;  %v3311_v57 = vld [vmem:[#allocation3 + $0x1dc] sm:$0xf0] }
  0xb9   : > { %2447 = vmatmul.bf16.gmra.mxu2 %v3238_v40  ;;  %v952_v60 = vrot.slane %v950_v1, 5  ;;  %v1085_v47 = vsel %vm4394_vm13, %v1083_v54, %v1084_v55  ;;  %1179 = vst [vmem:[#allocation3 + $0x1c0] sm:$0xf] %v967_v11  ;;  %v540_v40 = vld [vmem:[#allocation2 + $0x68] sm:$0x1]  ;;  %v4672_v1 = vpop.f32.mrf.mxu1 }
  0xba   : > { %1122 = vst [vmem:[#allocation3 + $0x1dc] sm:$0xf] %v1085_v47  ;;  %v728_v62 = vld [vmem:[#allocation2 + $0x5c] sm:$0x1]  ;;  %v541_v59 = vsel %vm4107_vm7, %v461_v36, %v540_v40 }
  0xbb   : > { %2398 = vmatmul.bf16.gmra.mxu1 %v3234_v51  ;;  %v953_v5 = vsel %vm4378_vm11, %v948_v23, %v952_v60  ;;  %1206 = vst [vmem:[#allocation3 + $0x1a0] sm:$0xf] %v1085_v47  ;;  %v584_v61 = vld [vmem:[#allocation2 + $0x60] sm:$0x2]  ;;  %v729_v7 = vsel %vm4410_vm14, %v3070_v56, %v728_v62  ;;  %v650_v12 = vld [vmem:[#allocation2 + $0x60] sm:$0x1]  ;;  %v3314_v62 = vor.u32 %v3721_v3, %v3311_v57 }
  0xbc   : > { %1178 = vst [vmem:[#allocation3 + $0x19c] sm:$0xf] %v953_v5  ;;  %v3061_v9 = vrot.slane %v584_v61, 9  ;;  %v4656_v34 = vld [vmem:[#allocation2 + $0x64] sm:$0xf] }
  0xbd   : > { %1007 = vst [vmem:[#allocation3 + $0x1d8] sm:$0xf] %v953_v5  ;;  %v664_v51 = vld [vmem:[#allocation2 + $0x64] sm:$0x8]  ;;  %v3309_v55 = vld [vmem:[#allocation3 + $0x1b8] sm:$0xf]  ;;  %v4681_v41 = vpop.f32.mrf.mxu2 }
  0xbe   : > { %1262 = vst [vmem:[#allocation3 + $0x160] sm:$0xf] %v953_v5  ;;  %v651_v13 = vsel %vm4107_vm7, %v3061_v9, %v650_v12  ;;  %v3071_v0 = vrot.slane %v664_v51, 11  ;;  %v1151_v56 = vshll.u32 %v4656_v34, 16  ;;  %v1155_v4 = vshrl.u32 %v4656_v34, 16  ;;  %v3794_v12 = vld [vmem:[%s4849_s1 + $0x1c0] sm:$0xff] }
  0xbf   : > { %1290 = vst [vmem:[#allocation3 + $0x164] sm:$0xf] %v1085_v47  ;;  %v3720_v5 = vld [vmem:[#allocation3 + $0x1b4] sm:$0xf]  ;;  %2671 = vmatpush.bf16.msra.mxu3 %v3794_v12 }
  0xc0   : > { %730 = vst [vmem:[#allocation2 + $0x5c] sm:$0x1] %v729_v7  ;;  %v4674_v60 = vpop.f32.mrf.mxu3  ;;  %v1157_v14 = vrot.slane %v1155_v4, 4  ;;  %v3317_v33 = vld [vmem:[#allocation3 + $0x1c0] sm:$0xf] }
  0xc1   : > { %1008 = vst [vmem:[#allocation3 + $0x1fc] sm:$0xf] %v967_v11  ;;  %v3725_v43 = vld [vmem:[#allocation3 + $0x1d8] sm:$0xf0]  ;;  %v4695_v53 = vpop.f32.mrf.mxu1  ;;  %v3668_v4 = vld [vmem:[#allocation3 + $0x14] sm:$0xf] }
  0xc2   : > { %1263 = vst [vmem:[#allocation3 + $0x184] sm:$0xf] %v967_v11  ;;  %v3310_v7 = vor.u32 %v3725_v43, %v3309_v55  ;;  %v1153_v11 = vrot.slane %v1151_v56, 5  ;;  %v3109_v43 = vld [vmem:[#allocation3 + $0x18] sm:$0xf] }
  0xc3   : > { %652 = vst [vmem:[#allocation2 + $0x60] sm:$0x1] %v651_v13  ;;  %v3717_v52 = vld [vmem:[#allocation3 + $0x198] sm:$0xf0]  ;;  %v3802_v13 = vld [vmem:[%s4849_s1 + $0x200] sm:$0xff] }
  0xc4   : > { %1140 = vst [vmem:[#allocation3 + $0x228] sm:$0xf] %v4656_v34  ;;  %v3282_v21 = vor.u32 %v3717_v52, %v3281_v29  ;;  %v3303_v6 = vld [vmem:[#allocation3 + $0x1d4] sm:$0xf0]  ;;  %v1158_v27 = vor.u32 %v1157_v14, %v1153_v11  ;;  %2720 = vmatpush.bf16.msra.mxu0 %v3802_v13  ;;  %v3117_v14 = vld [vmem:[#allocation3 + $0x20] sm:$0xf] }
  0xc5   : > { %2545 = vmatmul.bf16.gmra.mxu0 %v3246_v10  ;;  %1123 = vst [vmem:[#allocation3 + $0x200] sm:$0xf] %v1089_v45  ;;  %v4704_v35 = vpop.f32.mrf.mxu2 }
  0xc6   : > { %2501 = vmatmul.bf16.gmra.mxu3 %v3278_v19  ;;  %1207 = vst [vmem:[#allocation3 + $0x1c4] sm:$0xf] %v1089_v45  ;;  %v3306_v19 = vor.u32 %v3720_v5, %v3303_v6  ;;  %v1159_v36 = vrot.slane %v1158_v27, 4  ;;  %v3103_v5 = vld [vmem:[#allocation3 + $0x34] sm:$0xf0] }
  0xc7   : > { %v760_v39 = vld [vmem:[#allocation2 + $0x5c] sm:$0x1]  ;;  %1291 = vst [vmem:[#allocation3 + $0x188] sm:$0xf] %v1089_v45  ;;  %v3106_v6 = vor.u32 %v3668_v4, %v3103_v5  ;;  %v3147_v27 = vld [vmem:[#allocation3 + $0x84] sm:$0xf0] }
  0xc8   : > { %v974_v46 = vshll.u32 %v760_v39, 16  ;;  %v1091_v26 = vrot.slane %v760_v39, 5  ;;  %1224 = vst [vmem:[#allocation3 + $0x1ec] sm:$0xf] %v4656_v34  ;;  %v2330_v30 = vpop.f32.mrf.mxu0  ;;  %v3729_v29 = vld [vmem:[#allocation3 + $0x1fc] sm:$0xf] }
  0xc9   : > { %2452 = vmatmul.bf16.gmra.mxu2 %v3274_v17  ;;  %542 = vst [vmem:[#allocation2 + $0x68] sm:$0x1] %v541_v59  ;;  %v4700_v17 = vpop.f32.mrf.mxu3  ;;  %v3183_v4 = vld [vmem:[#allocation3 + $0xcc] sm:$0xf0] }
  0xca   : > { %v976_v44 = vrot.slane %v974_v46, 5  ;;  %v1092_v48 = vsel %vm4394_vm13, %v1090_v15, %v1091_v26  ;;  %v4666_v54 = vld [vmem:[#allocation2 + $0x60] sm:$0xf] }
  0xcb   : > { %2403 = vmatmul.bf16.gmra.mxu1 %v3270_v42  ;;  %1124 = vst [vmem:[#allocation3 + $0x224] sm:$0xf] %v1092_v48  ;;  %v1142_v31 = vshrl.u32 %v4666_v54, 16  ;;  %v1145_v23 = vshll.u32 %v4666_v54, 16  ;;  %v3347_v40 = vld [vmem:[#allocation3 + $0x224] sm:$0xf0] }
  0xcc   : > { %v977_v49 = vsel %vm4378_vm11, %v972_v20, %v976_v44  ;;  %1208 = vst [vmem:[#allocation3 + $0x1e8] sm:$0xf] %v1092_v48  ;;  %v3345_v39 = vld [vmem:[#allocation3 + $0x200] sm:$0xf] }
  0xcd   : > { %1180 = vst [vmem:[#allocation3 + $0x1e4] sm:$0xf] %v977_v49  ;;  %v1144_v47 = vrot.slane %v1142_v31, 4  ;;  %v1147_v8 = vrot.slane %v1145_v23, 5 }
  0xce   : > { %1009 = vst [vmem:[#allocation3 + $0x220] sm:$0xf] %v977_v49 }
  0xcf   : > { %1264 = vst [vmem:[#allocation3 + $0x1a8] sm:$0xf] %v977_v49  ;;  %v1148_v61 = vor.u32 %v1147_v8, %v1144_v47 }
  0xd0   : > { %1292 = vst [vmem:[#allocation3 + $0x1ac] sm:$0xf] %v1092_v48  ;;  %v731_v37 = vld [vmem:[#allocation2 + $0x68] sm:$0x1]  ;;  %v2332_v52 = vpop.f32.mrf.mxu0 }
  0xd1   : > { %1139 = vst [vmem:[#allocation3 + $0x204] sm:$0xf] %v4666_v54  ;;  %v732_v9 = vsel %vm4410_vm14, %v3071_v0, %v731_v37  ;;  %v1149_v10 = vrot.slane %v1148_v61, 4  ;;  %v3669_v0 = vld [vmem:[#allocation3 + $0x1c] sm:$0xf] }
  0xd2   : > { %1223 = vst [vmem:[#allocation3 + $0x1c8] sm:$0xf] %v4666_v54  ;;  %v3734_v59 = vld [vmem:[#allocation3 + $0x220] sm:$0xf0] }
  0xd3   : > { %733 = vst [vmem:[#allocation2 + $0x68] sm:$0x1] %v732_v9  ;;  %v1154_v22 = vsel %vm4378_vm11, %v1149_v10, %v1153_v11  ;;  %v3346_v44 = vor.u32 %v3734_v59, %v3345_v39  ;;  %v3677_v39 = vld [vmem:[#allocation3 + $0x5c] sm:$0xf]  ;;  %v3139_v59 = vld [vmem:[#allocation3 + $0x7c] sm:$0xf0] }
  0xd4   : > { %1181 = vst [vmem:[#allocation3 + $0x208] sm:$0xf] %v1154_v22  ;;  %v3726_v32 = vld [vmem:[#allocation3 + $0x1e0] sm:$0xf0]  ;;  %v4709_v26 = vpop.f32.mrf.mxu1 }
  0xd5   : > { %2550 = vmatmul.bf16.gmra.mxu0 %v3282_v21  ;;  %1265 = vst [vmem:[#allocation3 + $0x1cc] sm:$0xf] %v1154_v22  ;;  %v3318_v15 = vor.u32 %v3726_v32, %v3317_v33  ;;  %v3339_v3 = vld [vmem:[#allocation3 + $0x21c] sm:$0xf0]  ;;  %v3678_v22 = vld [vmem:[#allocation3 + $0x64] sm:$0xf]  ;;  %v3118_v33 = vor.u32 %v3674_v16, %v3117_v14 }
  0xd6   : > { %2506 = vmatmul.bf16.gmra.mxu3 %v3314_v62  ;;  %v3342_v51 = vor.u32 %v3729_v29, %v3339_v3  ;;  %v3111_v21 = vld [vmem:[#allocation3 + $0x3c] sm:$0xf0]  ;;  %v3673_v62 = vld [vmem:[#allocation3 + $0x38] sm:$0xf0]  ;;  %v3142_v3 = vor.u32 %v3677_v39, %v3139_v59  ;;  %v3686_v16 = vld [vmem:[#allocation3 + $0xa4] sm:$0xf] }
  0xd7   : > { %v3114_v2 = vor.u32 %v3669_v0, %v3111_v21  ;;  %v3110_v61 = vor.u32 %v3673_v62, %v3109_v43  ;;  %v3683_v43 = vld [vmem:[#allocation3 + $0x88] sm:$0xf0]  ;;  %v3692_v39 = vld [vmem:[#allocation3 + $0xd0] sm:$0xf0] }
  0xd8   : > { %v3730_v38 = vld [vmem:[#allocation3 + $0x204] sm:$0xf] }
  0xd9   : > { %2457 = vmatmul.bf16.gmra.mxu2 %v3310_v7  ;;  %v3350_v20 = vor.u32 %v3730_v38, %v3347_v40  ;;  %v3145_v38 = vld [vmem:[#allocation3 + $0x60] sm:$0xf]  ;;  %v3682_v40 = vld [vmem:[#allocation3 + $0x80] sm:$0xf0] }
  0xda   : > { %v4702_v28 = vld [vmem:[#allocation2 + $0x68] sm:$0x1] }
  0xdb   : > { %2408 = vmatmul.bf16.gmra.mxu1 %v3306_v19  ;;  %v1161_v42 = vshll.u32 %v4702_v28, 16  ;;  %v3353_v49 = vld [vmem:[#allocation3 + $0x208] sm:$0xf] }
  0xdc   : > { %v4715_v23 = vpop.f32.mrf.mxu1 }
  0xdd   : > { %v1163_v45 = vrot.slane %v1161_v42, 5  ;;  %v4713_v57 = vpop.f32.mrf.mxu2 }
  0xdf   : > { %v1164_v46 = vsel %vm4378_vm11, %v1159_v36, %v1163_v45  ;;  %v3150_v45 = vor.u32 %v3678_v22, %v3147_v27 }
  0xe0   : > { %1182 = vst [vmem:[#allocation3 + $0x22c] sm:$0xf] %v1164_v46  ;;  %v4711_v48 = vpop.f32.mrf.mxu3 }
  0xe1   : > { %1266 = vst [vmem:[#allocation3 + $0x1f0] sm:$0xf] %v1164_v46  ;;  %v3146_v46 = vor.u32 %v3682_v40, %v3145_v38 }
  0xe5   : > { %2555 = vmatmul.bf16.gmra.mxu0 %v3318_v15  ;;  %v4719_v56 = vpop.f32.mrf.mxu2 }
  0xe6   : > { %2511 = vmatmul.bf16.gmra.mxu3 %v3350_v20 }
  0xe7   : > { %v3735_v31 = vld [vmem:[#allocation3 + $0x228] sm:$0xf0] }
  0xe8   : > { %v4717_v55 = vpop.f32.mrf.mxu3  ;;  %v3354_v47 = vor.u32 %v3735_v31, %v3353_v49 }
  0xe9   : > { %2462 = vmatmul.bf16.gmra.mxu2 %v3346_v44 }
  0xeb   : > { %2413 = vmatmul.bf16.gmra.mxu1 %v3342_v51 }
  0xf2   : > { %v2335_v8 = vpop.f32.mrf.mxu0 }
  0xf5   : > { %2560 = vmatmul.bf16.gmra.mxu0 %v3354_v47  ;;  %v3153_v47 = vld [vmem:[#allocation3 + $0x68] sm:$0xf] }
  0xf6   : > { %2672 = vmatmul.bf16.vlgmr.msra.gmra.mxu3 %v3114_v2  ;;  %v3687_v2 = vld [vmem:[#allocation3 + $0xac] sm:$0xf] }
  0xf8   : > { %v2379_v37 = vpop.f32.mrf.mxu1 }
  0xf9   : > { %v2380_v7 = vadd.f32 %v2379_v37, %v2330_v30  ;;  %2623 = vmatmul.bf16.vlgmr.msra.gmra.mxu2 %v3110_v61  ;;  %v2477_v9 = vpop.f32.mrf.mxu3  ;;  %v3154_v61 = vor.u32 %v3683_v43, %v3153_v47  ;;  %v3695_v43 = vld [vmem:[#allocation3 + $0xec] sm:$0xf] }
  0xfa   : > { %v2337_v10 = vpop.f32.mrf.mxu0 }
  0xfb   : > { %2574 = vmatmul.bf16.vlgmr.msra.gmra.mxu1 %v3106_v6 }
  0xfc   : > { %v2428_v11 = vpop.f32.mrf.mxu2 }
  0xfd   : > { %v2429_v12 = vadd.f32 %v2428_v11, %v2380_v7  ;;  %v3186_v11 = vor.u32 %v3687_v2, %v3183_v4 }
  0xff   : > { %v2478_v19 = vadd.f32 %v2477_v9, %v2429_v12  ;;  %v3691_v9 = vld [vmem:[#allocation3 + $0xc8] sm:$0xf0] }
 0x100   : > { %v2381_v13 = vpop.f32.mrf.mxu1 }
 0x101   : > { %v2382_v32 = vadd.f32 %v2381_v13, %v2332_v52  ;;  %v2479_v36 = vpop.f32.mrf.mxu3 }
 0x102   : > { %v2526_v42 = vpop.f32.mrf.mxu0 }
 0x103   : > { %v4721_v30 = vadd.f32 %v2526_v42, %v2478_v19  ;;  %v3175_v19 = vld [vmem:[#allocation3 + $0xc4] sm:$0xf0] }
 0x104   : > { %v2430_v15 = vpop.f32.mrf.mxu2 }
 0x105   : > { %2721 = vmatmul.bf16.vlgmr.msra.gmra.mxu0 %v3118_v33  ;;  %v2431_v20 = vadd.f32 %v2430_v15, %v2382_v32  ;;  %v3178_v33 = vor.u32 %v3686_v16, %v3175_v19  ;;  %v3189_v15 = vld [vmem:[#allocation3 + $0xb0] sm:$0xf] }
 0x106   : > { %2677 = vmatmul.bf16.gmra.mxu3 %v3150_v45 }
 0x107   : > { %v2480_v29 = vadd.f32 %v2479_v36, %v2431_v20  ;;  %v3696_v20 = vld [vmem:[#allocation3 + $0xf4] sm:$0xf] }
 0x108   : > { %v2384_v44 = vpop.f32.mrf.mxu1 }
 0x109   : > { %v2385_v51 = vadd.f32 %v2384_v44, %v2335_v8  ;;  %2628 = vmatmul.bf16.gmra.mxu2 %v3146_v46  ;;  %v2482_v52 = vpop.f32.mrf.mxu3  ;;  %v3181_v8 = vld [vmem:[#allocation3 + $0xa8] sm:$0xf]  ;;  %v3219_v46 = vld [vmem:[#allocation3 + $0x114] sm:$0xf0] }
 0x10a   : > { %v2528_v49 = vpop.f32.mrf.mxu0  ;;  %v3182_v27 = vor.u32 %v3691_v9, %v3181_v8 }
 0x10b   : > { %2579 = vmatmul.bf16.gmra.mxu1 %v3142_v3  ;;  %v4723_v31 = vadd.f32 %v2528_v49, %v2480_v29  ;;  %v3190_v3 = vor.u32 %v3692_v39, %v3189_v15  ;;  %v3700_v49 = vld [vmem:[#allocation3 + $0x110] sm:$0xf0] }
 0x10c   : > { %v2433_v0 = vpop.f32.mrf.mxu2 }
 0x10d   : > { %v2434_v21 = vadd.f32 %v2433_v0, %v2385_v51 }
 0x10f   : > { %v2483_v62 = vadd.f32 %v2482_v52, %v2434_v21  ;;  %v3217_v52 = vld [vmem:[#allocation3 + $0xf0] sm:$0xf] }
 0x110   : > { %v2386_v5 = vpop.f32.mrf.mxu1  ;;  %v3218_v4 = vor.u32 %v3700_v49, %v3217_v52  ;;  %v3709_v49 = vld [vmem:[#allocation3 + $0x158] sm:$0xf0] }
 0x111   : > { %v2387_v6 = vadd.f32 %v2386_v5, %v2337_v10  ;;  %v2484_v37 = vpop.f32.mrf.mxu3  ;;  %v546_v5 = vld [vmem:[%s545_s30] sm:$0xf] }
 0x112   : > { %v2531_v7 = vpop.f32.mrf.mxu0  ;;  %v552_v9 = vshll.u32 %v546_v5, 16 }
 0x113   : > { %v4725_v12 = vadd.f32 %v2531_v7, %v2483_v62  ;;  %v3211_v62 = vld [vmem:[#allocation3 + $0x10c] sm:$0xf0] }
 0x114   : > { %v2435_v14 = vpop.f32.mrf.mxu2 }
 0x115   : > { %2726 = vmatmul.bf16.gmra.mxu0 %v3154_v61  ;;  %v2436_v22 = vadd.f32 %v2435_v14, %v2387_v6  ;;  %v549_v61 = vshrl.u32 %v546_v5, 16  ;;  %v547_v14 = vld [vmem:[%s545_s30 + $0x4] sm:$0xf] }
 0x116   : > { %2682 = vmatmul.bf16.gmra.mxu3 %v3186_v11  ;;  %v557_v19 = vshrl.u32 %v547_v14, 16 }
 0x117   : > { %v2485_v13 = vadd.f32 %v2484_v37, %v2436_v22  ;;  %v3214_v37 = vor.u32 %v3695_v43, %v3211_v62  ;;  %v551_v8 = vrot.slane %v549_v61, 7 }
 0x118   : > { %v2389_v32 = vpop.f32.mrf.mxu1 }
 0x119   : > { %2633 = vmatmul.bf16.gmra.mxu2 %v3182_v27  ;;  %v2487_v10 = vpop.f32.mrf.mxu3  ;;  %v2390_v42 = vadd.f32 %v2389_v32, %v4672_v1  ;;  %v3222_v1 = vor.u32 %v3696_v20, %v3219_v46  ;;  %v554_v16 = vor.u32 %v552_v9, %v551_v8  ;;  %v569_v27 = vld [vmem:[#allocation2 + $0x6c] sm:$0xf]  ;;  %v559_v32 = vrot.slane %v557_v19, 7  ;;  %v3705_v20 = vld [vmem:[#allocation3 + $0x13c] sm:$0xf] }
 0x11a   : > { %v2533_v36 = vpop.f32.mrf.mxu0  ;;  %v555_v15 = vrot.slane %v551_v8, 4  ;;  %v3255_v46 = vld [vmem:[#allocation3 + $0x15c] sm:$0xf0]  ;;  %v1191_v19 = vrot.slane %v4702_v28, 5 }
 0x11b   : > { %2584 = vmatmul.bf16.gmra.mxu1 %v3178_v33  ;;  %v4729_v38 = vadd.f32 %v2533_v36, %v2485_v13  ;;  %v570_v36 = vsel %vm4063_vm5, %v554_v16, %v569_v27 }
 0x11c   : > { %v2438_v40 = vpop.f32.mrf.mxu2  ;;  %571 = vst [vmem:[#allocation2 + $0x6c] sm:$0xf] %v570_v36 }
 0x11d   : > { %v2439_v45 = vadd.f32 %v2438_v40, %v2390_v42  ;;  %v3225_v40 = vld [vmem:[#allocation3 + $0xf8] sm:$0xf] }
 0x11f   : > { %v2488_v59 = vadd.f32 %v2487_v10, %v2439_v45  ;;  %v560_v10 = vshll.u32 %v547_v14, 16  ;;  %v3701_v45 = vld [vmem:[#allocation3 + $0x118] sm:$0xf0] }
 0x120   : > { %v2391_v29 = vpop.f32.mrf.mxu1 }
 0x121   : > { %v2489_v44 = vpop.f32.mrf.mxu3  ;;  %v2392_v0 = vadd.f32 %v2391_v29, %v4695_v53  ;;  %v562_v39 = vor.u32 %v560_v10, %v559_v32 }
 0x122   : > { %v2536_v51 = vpop.f32.mrf.mxu0 }
 0x123   : > { %v4733_v21 = vadd.f32 %v2536_v51, %v2488_v59  ;;  %v563_v29 = vsel %vm4054_vm4, %v555_v15, %v562_v39  ;;  %v585_v5 = vld [vmem:[#allocation2 + $0x6c] sm:$0x2]  ;;  %v3710_v15 = vld [vmem:[#allocation3 + $0x160] sm:$0xf0] }
 0x124   : > { %v2440_v47 = vpop.f32.mrf.mxu2  ;;  %572 = vst [vmem:[#allocation2 + $0x70] sm:$0xf] %v563_v29  ;;  %v3714_v39 = vld [vmem:[#allocation3 + $0x184] sm:$0xf] }
 0x125   : > { %2731 = vmatmul.bf16.gmra.mxu0 %v3190_v3  ;;  %v2441_v2 = vadd.f32 %v2440_v47, %v2392_v0  ;;  %v3226_v3 = vor.u32 %v3701_v45, %v3225_v40  ;;  %v564_v0 = vrot.slane %v559_v32, 4  ;;  %v573_v47 = vld [vmem:[#allocation2 + $0x74] sm:$0x1] }
 0x126   : > { %2687 = vmatmul.bf16.gmra.mxu3 %v3222_v1  ;;  %v3258_v1 = vor.u32 %v3705_v20, %v3255_v46  ;;  %v3291_v20 = vld [vmem:[#allocation3 + $0x1a4] sm:$0xf0] }
 0x127   : > { %v2490_v6 = vadd.f32 %v2489_v44, %v2441_v2  ;;  %v3704_v2 = vld [vmem:[#allocation3 + $0x134] sm:$0xf]  ;;  %v574_v18 = vsel %vm4107_vm7, %v564_v0, %v573_v47 }
 0x128   : > { %v2394_v7 = vpop.f32.mrf.mxu1  ;;  %575 = vst [vmem:[#allocation2 + $0x74] sm:$0x1] %v574_v18 }
 0x129   : > { %2638 = vmatmul.bf16.gmra.mxu2 %v3218_v4  ;;  %v2492_v11 = vpop.f32.mrf.mxu3  ;;  %v2395_v22 = vadd.f32 %v2394_v7, %v4709_v26  ;;  %v3247_v4 = vld [vmem:[#allocation3 + $0x154] sm:$0xf0]  ;;  %v653_v7 = vld [vmem:[#allocation2 + $0x6c] sm:$0x1] }
 0x12a   : > { %v2538_v53 = vpop.f32.mrf.mxu0  ;;  %v3250_v9 = vor.u32 %v3704_v2, %v3247_v4  ;;  %v3713_v4 = vld [vmem:[#allocation3 + $0x17c] sm:$0xf] }
 0x12b   : > { %2589 = vmatmul.bf16.gmra.mxu1 %v3214_v37  ;;  %v4736_v13 = vadd.f32 %v2538_v53, %v2490_v6  ;;  %v3062_v6 = vrot.slane %v585_v5, 9  ;;  %v1188_v37 = vrot.slane %v4656_v34, 5  ;;  %v3081_v53 = vrot.slane %v4666_v54, 9  ;;  %v665_v32 = vld [vmem:[#allocation2 + $0x70] sm:$0x8] }
 0x12c   : > { %v2443_v33 = vpop.f32.mrf.mxu2  ;;  %v3072_v10 = vrot.slane %v665_v32, 11  ;;  %v3283_v5 = vld [vmem:[#allocation3 + $0x19c] sm:$0xf0] }
 0x12d   : > { %v2444_v42 = vadd.f32 %v2443_v33, %v2395_v22  ;;  %v1190_v16 = vrot.slane %v1188_v37, 4  ;;  %v1189_v33 = vsel %vm4394_vm13, %v3081_v53, %v1188_v37 }
 0x12e   : > { %1293 = vst [vmem:[#allocation3 + $0x1d0] sm:$0xf] %v1189_v33 }
 0x12f   : > { %v2493_v59 = vadd.f32 %v2492_v11, %v2444_v42  ;;  %v654_v11 = vsel %vm4107_vm7, %v3062_v6, %v653_v7  ;;  %v1192_v34 = vsel %vm4394_vm13, %v1190_v16, %v1191_v19  ;;  %v734_v28 = vld [vmem:[#allocation2 + $0x74] sm:$0x1]  ;;  %v3261_v42 = vld [vmem:[#allocation3 + $0x140] sm:$0xf]  ;;  %1209 = vst [vmem:[#allocation3 + $0x20c] sm:$0xf] %v1189_v33 }
 0x130   : > { %v2396_v26 = vpop.f32.mrf.mxu1  ;;  %655 = vst [vmem:[#allocation2 + $0x6c] sm:$0x1] %v654_v11  ;;  %v735_v45 = vsel %vm4410_vm14, %v3072_v10, %v734_v28  ;;  %v3262_v29 = vor.u32 %v3710_v15, %v3261_v42 }
 0x131   : > { %v2397_v44 = vadd.f32 %v2396_v26, %v4715_v23  ;;  %v2494_v51 = vpop.f32.mrf.mxu3  ;;  %v3254_v23 = vor.u32 %v3709_v49, %v3253_v24  ;;  %1294 = vst [vmem:[#allocation3 + $0x1f4] sm:$0xf] %v1192_v34  ;;  %v765_v26 = vld [vmem:[#allocation2 + $0x70] sm:$0xf]  ;;  %v3294_v24 = vor.u32 %v3714_v39, %v3291_v20 }
 0x132   : > { %v2541_v52 = vpop.f32.mrf.mxu0  ;;  %1210 = vst [vmem:[#allocation3 + $0x230] sm:$0xf] %v1192_v34  ;;  %v1237_v0 = vshll.u32 %v765_v26, 16  ;;  %v1241_v47 = vshrl.u32 %v765_v26, 16  ;;  %v1274_v11 = vrot.slane %v765_v26, 5 }
 0x133   : > { %v4743_v43 = vadd.f32 %v2541_v52, %v2493_v59  ;;  %736 = vst [vmem:[#allocation2 + $0x74] sm:$0x1] %v735_v45  ;;  %v3718_v52 = vld [vmem:[#allocation3 + $0x1a0] sm:$0xf0] }
 0x134   : > { %v2445_v62 = vpop.f32.mrf.mxu2  ;;  %1226 = vst [vmem:[#allocation3 + $0x234] sm:$0xf] %v765_v26  ;;  %v1239_v37 = vrot.slane %v1237_v0, 5  ;;  %v1243_v7 = vrot.slane %v1241_v47, 4  ;;  %v1276_v33 = vrot.slane %v1274_v11, 4 }
 0x135   : > { %2736 = vmatmul.bf16.gmra.mxu0 %v3226_v3  ;;  %v2446_v61 = vadd.f32 %v2445_v62, %v2397_v44  ;;  %v3289_v44 = vld [vmem:[#allocation3 + $0x180] sm:$0xf]  ;;  %v3723_v26 = vld [vmem:[#allocation3 + $0x1cc] sm:$0xf]  ;;  %v3722_v0 = vld [vmem:[#allocation3 + $0x1c4] sm:$0xf] }
 0x136   : > { %2692 = vmatmul.bf16.gmra.mxu3 %v3258_v1  ;;  %v3290_v6 = vor.u32 %v3718_v52, %v3289_v44  ;;  %v1244_v53 = vor.u32 %v1243_v7, %v1239_v37  ;;  %v3325_v52 = vld [vmem:[#allocation3 + $0x1c8] sm:$0xf] }
 0x137   : > { %v2495_v8 = vadd.f32 %v2494_v51, %v2446_v61  ;;  %v3319_v47 = vld [vmem:[#allocation3 + $0x1e4] sm:$0xf0] }
 0x138   : > { %v2399_v14 = vpop.f32.mrf.mxu1 }
 0x139   : > { %2643 = vmatmul.bf16.gmra.mxu2 %v3254_v23  ;;  %v2497_v22 = vpop.f32.mrf.mxu3  ;;  %v2400_v58 = vadd.f32 %v2399_v14, %v4681_v41  ;;  %v764_v41 = vld [vmem:[#allocation2 + $0x6c] sm:$0xf]  ;;  %v3286_v14 = vor.u32 %v3713_v4, %v3283_v5 }
 0x13a   : > { %v2543_v27 = vpop.f32.mrf.mxu0  ;;  %1225 = vst [vmem:[#allocation3 + $0x210] sm:$0xf] %v764_v41  ;;  %v1228_v49 = vshrl.u32 %v764_v41, 16  ;;  %v1231_v1 = vshll.u32 %v764_v41, 16 }
 0x13b   : > { %2594 = vmatmul.bf16.gmra.mxu1 %v3250_v9  ;;  %v4757_v54 = vadd.f32 %v2543_v27, %v2495_v8  ;;  %v766_v8 = vld [vmem:[#allocation2 + $0x74] sm:$0x1]  ;;  %v3082_v27 = vrot.slane %v764_v41, 9  ;;  %v3719_v41 = vld [vmem:[#allocation3 + $0x1a8] sm:$0xf0] }
 0x13c   : > { %v2448_v36 = vpop.f32.mrf.mxu2  ;;  %v1230_v18 = vrot.slane %v1228_v49, 4  ;;  %v1233_v61 = vrot.slane %v1231_v1, 5  ;;  %v1247_v16 = vshll.u32 %v766_v8, 16  ;;  %v1277_v34 = vrot.slane %v766_v8, 5 }
 0x13d   : > { %v2449_v40 = vadd.f32 %v2448_v36, %v2400_v58  ;;  %v1245_v58 = vrot.slane %v1244_v53, 4 }
 0x13e   : > { %v1234_v9 = vor.u32 %v1233_v61, %v1230_v18  ;;  %v1249_v10 = vrot.slane %v1247_v16, 5  ;;  %v1278_v15 = vsel %vm4394_vm13, %v1276_v33, %v1277_v34  ;;  %v3322_v18 = vor.u32 %v3722_v0, %v3319_v47  ;;  %v3736_v34 = vld [vmem:[#allocation3 + $0x230] sm:$0xf0] }
 0x13f   : > { %v2498_v59 = vadd.f32 %v2497_v22, %v2449_v40  ;;  %v1275_v40 = vsel %vm4394_vm13, %v3082_v27, %v1274_v11  ;;  %1296 = vst [vmem:[#allocation3 + $0x23c] sm:$0xf] %v1278_v15  ;;  %v3728_v11 = vld [vmem:[#allocation3 + $0x1f0] sm:$0xf0] }
 0x140   : > { %v2401_v46 = vpop.f32.mrf.mxu1  ;;  %v1235_v22 = vrot.slane %v1234_v9, 4  ;;  %v1250_v45 = vsel %vm4378_vm11, %v1245_v58, %v1249_v10  ;;  %1295 = vst [vmem:[#allocation3 + $0x218] sm:$0xf] %v1275_v40  ;;  %v3333_v9 = vld [vmem:[#allocation3 + $0x1d0] sm:$0xf] }
 0x141   : > { %v2499_v3 = vpop.f32.mrf.mxu3  ;;  %v2402_v25 = vadd.f32 %v2401_v46, %v4704_v35  ;;  %1268 = vst [vmem:[#allocation3 + $0x238] sm:$0xf] %v1250_v45  ;;  %v3361_v33 = vld [vmem:[#allocation3 + $0x210] sm:$0xf] }
 0x142   : > { %v2546_v51 = vpop.f32.mrf.mxu0  ;;  %v1240_v42 = vsel %vm4378_vm11, %v1235_v22, %v1239_v37  ;;  %v3362_v40 = vor.u32 %v3736_v34, %v3361_v33 }
 0x143   : > { %v4762_v62 = vadd.f32 %v2546_v51, %v2498_v59  ;;  %1267 = vst [vmem:[#allocation3 + $0x214] sm:$0xf] %v1240_v42 }
 0x144   : > { %v2450_v2 = vpop.f32.mrf.mxu2 }
 0x145   : > { %2741 = vmatmul.bf16.gmra.mxu0 %v3262_v29  ;;  %v2451_v23 = vadd.f32 %v2450_v2, %v2402_v25  ;;  %v3327_v29 = vld [vmem:[#allocation3 + $0x1ec] sm:$0xf0] }
 0x146   : > { %2697 = vmatmul.bf16.gmra.mxu3 %v3294_v24  ;;  %v3727_v24 = vld [vmem:[#allocation3 + $0x1e8] sm:$0xf0]  ;;  %v3330_v50 = vor.u32 %v3723_v26, %v3327_v29 }
 0x147   : > { %v2500_v35 = vadd.f32 %v2499_v3, %v2451_v23  ;;  %v3326_v4 = vor.u32 %v3727_v24, %v3325_v52  ;;  %v3369_v29 = vld [vmem:[#allocation3 + $0x218] sm:$0xf] }
 0x148   : > { %v2404_v19 = vpop.f32.mrf.mxu1  ;;  %v3363_v53 = vld [vmem:[#allocation3 + $0x234] sm:$0xf0] }
 0x149   : > { %2648 = vmatmul.bf16.gmra.mxu2 %v3290_v6  ;;  %v2502_v32 = vpop.f32.mrf.mxu3  ;;  %v2405_v28 = vadd.f32 %v2404_v19, %v4713_v57  ;;  %v3297_v57 = vld [vmem:[#allocation3 + $0x188] sm:$0xf]  ;;  %v3334_v19 = vor.u32 %v3728_v11, %v3333_v9 }
 0x14a   : > { %v2548_v36 = vpop.f32.mrf.mxu0  ;;  %v3298_v44 = vor.u32 %v3719_v41, %v3297_v57 }
 0x14b   : > { %2599 = vmatmul.bf16.gmra.mxu1 %v3286_v14  ;;  %v4773_v39 = vadd.f32 %v2548_v36, %v2500_v35  ;;  %v3732_v14 = vld [vmem:[#allocation3 + $0x214] sm:$0xf]  ;;  %v3731_v36 = vld [vmem:[#allocation3 + $0x20c] sm:$0xf] }
 0x14c   : > { %v2453_v59 = vpop.f32.mrf.mxu2 }
 0x14d   : > { %v2454_v20 = vadd.f32 %v2453_v59, %v2405_v28  ;;  %v3355_v28 = vld [vmem:[#allocation3 + $0x22c] sm:$0xf0] }
 0x14e   : > { %v3358_v15 = vor.u32 %v3731_v36, %v3355_v28 }
 0x14f   : > { %v2503_v46 = vadd.f32 %v2502_v32, %v2454_v20  ;;  %v3366_v32 = vor.u32 %v3732_v14, %v3363_v53 }
 0x150   : > { %v2406_v3 = vpop.f32.mrf.mxu1 }
 0x151   : > { %v2504_v63 = vpop.f32.mrf.mxu3  ;;  %v2407_v49 = vadd.f32 %v2406_v3, %v4719_v56  ;;  %v3737_v3 = vld [vmem:[#allocation3 + $0x238] sm:$0xf0] }
 0x152   : > { %v2551_v51 = vpop.f32.mrf.mxu0 }
 0x153   : > { %v4776_v1 = vadd.f32 %v2551_v51, %v2503_v46  ;;  %v3370_v51 = vor.u32 %v3737_v3, %v3369_v29 }
 0x154   : > { %v2455_v25 = vpop.f32.mrf.mxu2 }
 0x155   : > { %2746 = vmatmul.bf16.gmra.mxu0 %v3298_v44  ;;  %v2456_v2 = vadd.f32 %v2455_v25, %v2407_v49 }
 0x156   : > { %2702 = vmatmul.bf16.gmra.mxu3 %v3330_v50 }
 0x157   : > { %v2505_v5 = vadd.f32 %v2504_v63, %v2456_v2 }
 0x158   : > { %v2409_v61 = vpop.f32.mrf.mxu1 }
 0x159   : > { %2653 = vmatmul.bf16.gmra.mxu2 %v3326_v4  ;;  %v2507_v23 = vpop.f32.mrf.mxu3  ;;  %v2410_v37 = vadd.f32 %v2409_v61, %v4674_v60 }
 0x15a   : > { %v2553_v6 = vpop.f32.mrf.mxu0 }
 0x15b   : > { %2604 = vmatmul.bf16.gmra.mxu1 %v3322_v18  ;;  %v4779_v7 = vadd.f32 %v2553_v6, %v2505_v5 }
 0x15c   : > { %v2458_v56 = vpop.f32.mrf.mxu2 }
 0x15d   : > { %v2459_v8 = vadd.f32 %v2458_v56, %v2410_v37 }
 0x15f   : > { %v2508_v35 = vadd.f32 %v2507_v23, %v2459_v8 }
 0x160   : > { %v2411_v16 = vpop.f32.mrf.mxu1 }
 0x161   : > { %v2509_v22 = vpop.f32.mrf.mxu3  ;;  %v2412_v58 = vadd.f32 %v2411_v16, %v4700_v17 }
 0x162   : > { %v2556_v27 = vpop.f32.mrf.mxu0 }
 0x163   : > { %v4782_v60 = vadd.f32 %v2556_v27, %v2508_v35 }
 0x164   : > { %v2460_v10 = vpop.f32.mrf.mxu2 }
 0x165   : > { %2751 = vmatmul.bf16.gmra.mxu0 %v3334_v19  ;;  %v2461_v42 = vadd.f32 %v2460_v10, %v2412_v58 }
 0x166   : > { %2707 = vmatmul.bf16.gmra.mxu3 %v3366_v32 }
 0x167   : > { %v2510_v45 = vadd.f32 %v2509_v22, %v2461_v42 }
 0x168   : > { %v2414_v59 = vpop.f32.mrf.mxu1 }
 0x169   : > { %2658 = vmatmul.bf16.gmra.mxu2 %v3362_v40  ;;  %v2512_v20 = vpop.f32.mrf.mxu3  ;;  %v2415_v41 = vadd.f32 %v2414_v59, %v4711_v48 }
 0x16a   : > { %v2558_v57 = vpop.f32.mrf.mxu0 }
 0x16b   : > { %2609 = vmatmul.bf16.gmra.mxu1 %v3358_v15  ;;  %v4785_v46 = vadd.f32 %v2558_v57, %v2510_v45 }
 0x16c   : > { %v2463_v17 = vpop.f32.mrf.mxu2 }
 0x16d   : > { %v2464_v26 = vadd.f32 %v2463_v17, %v2415_v41 }
 0x16f   : > { %v2513_v44 = vadd.f32 %v2512_v20, %v2464_v26 }
 0x170   : > { %v2416_v63 = vpop.f32.mrf.mxu1 }
 0x171   : > { %v2514_v52 = vpop.f32.mrf.mxu3  ;;  %v2417_v50 = vadd.f32 %v2416_v63, %v4717_v55 }
 0x172   : > { %v2561_v24 = vpop.f32.mrf.mxu0 }
 0x173   : > { %v4788_v49 = vadd.f32 %v2561_v24, %v2513_v44 }
 0x174   : > { %v2465_v25 = vpop.f32.mrf.mxu2 }
 0x175   : > { %2756 = vmatmul.bf16.gmra.mxu0 %v3370_v51  ;;  %v2466_v48 = vadd.f32 %v2465_v25, %v2417_v50 }
 0x177   : > { %v2515_v0 = vadd.f32 %v2514_v52, %v2466_v48 }
 0x178   : > { %v2575_v47 = vpop.f32.mrf.mxu1 }
 0x179   : > { %v2673_v2 = vpop.f32.mrf.mxu3  ;;  %v2576_v61 = vadd.f32 %v2575_v47, %v4721_v30 }
 0x17a   : > { %v2563_v4 = vpop.f32.mrf.mxu0 }
 0x17b   : > { %v4791_v5 = vadd.f32 %v2563_v4, %v2515_v0 }
 0x17c   : > { %v2624_v18 = vpop.f32.mrf.mxu2 }
 0x17d   : > { %v2625_v23 = vadd.f32 %v2624_v18, %v2576_v61 }
 0x17f   : > { %v2674_v8 = vadd.f32 %v2673_v2, %v2625_v23 }
 0x180   : > { %v2577_v6 = vpop.f32.mrf.mxu1 }
 0x181   : > { %v2675_v55 = vpop.f32.mrf.mxu3  ;;  %v2578_v56 = vadd.f32 %v2577_v6, %v4723_v31 }
 0x182   : > { %v2722_v37 = vpop.f32.mrf.mxu0 }
 0x183   : > { %v2723_v14 = vadd.f32 %v2722_v37, %v2674_v8 }
 0x184   : > { %v2626_v9 = vpop.f32.mrf.mxu2 }
 0x185   : > { %v2627_v11 = vadd.f32 %v2626_v9, %v2578_v56  ;;  %v2816_v27 = vmul.f32 %v2723_v14, %v2723_v14 }
 0x187   : > { %v2676_v35 = vadd.f32 %v2675_v55, %v2627_v11 }
 0x188   : > { %v2580_v53 = vpop.f32.mrf.mxu1 }
 0x189   : > { %v2678_v16 = vpop.f32.mrf.mxu3  ;;  %v2581_v22 = vadd.f32 %v2580_v53, %v4725_v12 }
 0x18a   : > { %v2724_v19 = vpop.f32.mrf.mxu0 }
 0x18b   : > { %v2725_v30 = vadd.f32 %v2724_v19, %v2676_v35 }
 0x18c   : > { %v2629_v31 = vpop.f32.mrf.mxu2 }
 0x18d   : > { %v3813_v33 = vpack.c.bf16 %v2725_v30, %v2723_v14  ;;  %v2794_v34 = vadd.f32 %v2725_v30, %v2723_v14  ;;  %v2817_v32 = vmul.f32 %v2725_v30, %v2725_v30  ;;  %v2630_v58 = vadd.f32 %v2629_v31, %v2581_v22 }
 0x18f   : > { %3814 = vst [vmem:[%s4801_s12] sm:$0xff] %v3813_v33   ;;  %v2832_v10 = vadd.f32 %v2817_v32, %v2816_v27  ;;  %v2679_v36 = vadd.f32 %v2678_v16, %v2630_v58 }
 0x190   : > { %v2582_v28 = vpop.f32.mrf.mxu1 }
 0x191   : > { %v2680_v42 = vpop.f32.mrf.mxu3  ;;  %v2583_v12 = vadd.f32 %v2582_v28, %v4729_v38 }
 0x192   : > { %v2727_v40 = vpop.f32.mrf.mxu0 }
 0x193   : > { %v2728_v45 = vadd.f32 %v2727_v40, %v2679_v36 }
 0x194   : > { %v2631_v15 = vpop.f32.mrf.mxu2 }
 0x195   : > { %v2795_v59 = vadd.f32 %v2794_v34, %v2728_v45  ;;  %v2818_v20 = vmul.f32 %v2728_v45, %v2728_v45  ;;  %v2632_v57 = vadd.f32 %v2631_v15, %v2583_v12 }
 0x197   : > { %v2833_v41 = vadd.f32 %v2832_v10, %v2818_v20  ;;  %v2681_v17 = vadd.f32 %v2680_v42, %v2632_v57 }
 0x198   : > { %v2585_v26 = vpop.f32.mrf.mxu1 }
 0x199   : > { %v2683_v29 = vpop.f32.mrf.mxu3  ;;  %v2586_v63 = vadd.f32 %v2585_v26, %v4733_v21 }
 0x19a   : > { %v2729_v3 = vpop.f32.mrf.mxu0 }
 0x19b   : > { %v2730_v44 = vadd.f32 %v2729_v3, %v2681_v17 }
 0x19c   : > { %v2634_v51 = vpop.f32.mrf.mxu2 }
 0x19d   : > { %v3818_v52 = vpack.c.bf16 %v2730_v44, %v2728_v45  ;;  %v2796_v24 = vadd.f32 %v2795_v59, %v2730_v44  ;;  %v2819_v50 = vmul.f32 %v2730_v44, %v2730_v44  ;;  %v2635_v25 = vadd.f32 %v2634_v51, %v2586_v63 }
 0x19f   : > { %3850 = vst [vmem:[%s4801_s12 + $0x8] sm:$0xff] %v3818_v52   ;;  %v2834_v38 = vadd.f32 %v2833_v41, %v2819_v50  ;;  %v2684_v48 = vadd.f32 %v2683_v29, %v2635_v25 }
 0x1a0   : > { %v2587_v0 = vpop.f32.mrf.mxu1 }
 0x1a1   : > { %v2685_v47 = vpop.f32.mrf.mxu3  ;;  %v2588_v18 = vadd.f32 %v2587_v0, %v4736_v13 }
 0x1a2   : > { %v2732_v2 = vpop.f32.mrf.mxu0 }
 0x1a3   : > { %v2733_v4 = vadd.f32 %v2732_v2, %v2684_v48 }
 0x1a4   : > { %v2636_v61 = vpop.f32.mrf.mxu2 }
 0x1a5   : > { %v2797_v23 = vadd.f32 %v2796_v24, %v2733_v4  ;;  %v2820_v6 = vmul.f32 %v2733_v4, %v2733_v4  ;;  %v2637_v55 = vadd.f32 %v2636_v61, %v2588_v18 }
 0x1a7   : > { %v2835_v21 = vadd.f32 %v2834_v38, %v2820_v6  ;;  %v2686_v37 = vadd.f32 %v2685_v47, %v2637_v55 }
 0x1a8   : > { %v2590_v56 = vpop.f32.mrf.mxu1 }
 0x1a9   : > { %v2688_v8 = vpop.f32.mrf.mxu3  ;;  %v2591_v35 = vadd.f32 %v2590_v56, %v4743_v43 }
 0x1aa   : > { %v2734_v9 = vpop.f32.mrf.mxu0 }
 0x1ab   : > { %v2735_v11 = vadd.f32 %v2734_v9, %v2686_v37 }
 0x1ac   : > { %v2639_v14 = vpop.f32.mrf.mxu2 }
 0x1ad   : > { %v3823_v53 = vpack.c.bf16 %v2735_v11, %v2733_v4  ;;  %v2798_v16 = vadd.f32 %v2797_v23, %v2735_v11  ;;  %v2821_v19 = vmul.f32 %v2735_v11, %v2735_v11  ;;  %v2640_v30 = vadd.f32 %v2639_v14, %v2591_v35 }
 0x1af   : > { %3851 = vst [vmem:[%s4801_s12 + $0x10] sm:$0xff] %v3823_v53   ;;  %v2836_v13 = vadd.f32 %v2835_v21, %v2821_v19  ;;  %v2689_v22 = vadd.f32 %v2688_v8, %v2640_v30 }
 0x1b0   : > { %v2592_v27 = vpop.f32.mrf.mxu1 }
 0x1b1   : > { %v2690_v31 = vpop.f32.mrf.mxu3  ;;  %v2593_v32 = vadd.f32 %v2592_v27, %v4757_v54 }
 0x1b2   : > { %v2737_v33 = vpop.f32.mrf.mxu0 }
 0x1b3   : > { %v2738_v34 = vadd.f32 %v2737_v33, %v2689_v22 }
 0x1b4   : > { %v2641_v58 = vpop.f32.mrf.mxu2 }
 0x1b5   : > { %v2799_v10 = vadd.f32 %v2798_v16, %v2738_v34  ;;  %v2822_v36 = vmul.f32 %v2738_v34, %v2738_v34  ;;  %v2642_v28 = vadd.f32 %v2641_v58, %v2593_v32 }
 0x1b7   : > { %v2837_v43 = vadd.f32 %v2836_v13, %v2822_v36  ;;  %v2691_v42 = vadd.f32 %v2690_v31, %v2642_v28 }
 0x1b8   : > { %v2595_v40 = vpop.f32.mrf.mxu1 }
 0x1b9   : > { %v2693_v45 = vpop.f32.mrf.mxu3  ;;  %v2596_v59 = vadd.f32 %v2595_v40, %v4762_v62 }
 0x1ba   : > { %v2739_v12 = vpop.f32.mrf.mxu0 }
 0x1bb   : > { %v2740_v15 = vadd.f32 %v2739_v12, %v2691_v42 }
 0x1bc   : > { %v2644_v20 = vpop.f32.mrf.mxu2 }
 0x1bd   : > { %v3828_v57 = vpack.c.bf16 %v2740_v15, %v2738_v34  ;;  %v2800_v41 = vadd.f32 %v2799_v10, %v2740_v15  ;;  %v2823_v17 = vmul.f32 %v2740_v15, %v2740_v15  ;;  %v2645_v26 = vadd.f32 %v2644_v20, %v2596_v59 }
 0x1bf   : > { %3852 = vst [vmem:[%s4801_s12 + $0x18] sm:$0xff] %v3828_v57   ;;  %v2838_v54 = vadd.f32 %v2837_v43, %v2823_v17  ;;  %v2694_v29 = vadd.f32 %v2693_v45, %v2645_v26 }
 0x1c0   : > { %v2597_v3 = vpop.f32.mrf.mxu1 }
 0x1c1   : > { %v2695_v44 = vpop.f32.mrf.mxu3  ;;  %v2598_v52 = vadd.f32 %v2597_v3, %v4773_v39 }
 0x1c2   : > { %v2742_v63 = vpop.f32.mrf.mxu0 }
 0x1c3   : > { %v2743_v51 = vadd.f32 %v2742_v63, %v2694_v29 }
 0x1c4   : > { %v2646_v24 = vpop.f32.mrf.mxu2 }
 0x1c5   : > { %v2801_v50 = vadd.f32 %v2800_v41, %v2743_v51  ;;  %v2824_v25 = vmul.f32 %v2743_v51, %v2743_v51  ;;  %v2647_v38 = vadd.f32 %v2646_v24, %v2598_v52 }
 0x1c7   : > { %v2839_v62 = vadd.f32 %v2838_v54, %v2824_v25  ;;  %v2696_v48 = vadd.f32 %v2695_v44, %v2647_v38 }
 0x1c8   : > { %v2600_v0 = vpop.f32.mrf.mxu1 }
 0x1c9   : > { %v2698_v47 = vpop.f32.mrf.mxu3  ;;  %v2601_v18 = vadd.f32 %v2600_v0, %v4776_v1 }
 0x1ca   : > { %v2744_v2 = vpop.f32.mrf.mxu0 }
 0x1cb   : > { %v2745_v4 = vadd.f32 %v2744_v2, %v2696_v48 }
 0x1cc   : > { %v2649_v61 = vpop.f32.mrf.mxu2 }
 0x1cd   : > { %v3833_v23 = vpack.c.bf16 %v2745_v4, %v2743_v51  ;;  %v2802_v6 = vadd.f32 %v2801_v50, %v2745_v4  ;;  %v2825_v55 = vmul.f32 %v2745_v4, %v2745_v4  ;;  %v2650_v21 = vadd.f32 %v2649_v61, %v2601_v18 }
 0x1cf   : > { %3853 = vst [vmem:[%s4801_s12 + $0x20] sm:$0xff] %v3833_v23   ;;  %v2840_v39 = vadd.f32 %v2839_v62, %v2825_v55  ;;  %v2699_v37 = vadd.f32 %v2698_v47, %v2650_v21 }
 0x1d0   : > { %v2602_v56 = vpop.f32.mrf.mxu1 }
 0x1d1   : > { %v2700_v8 = vpop.f32.mrf.mxu3  ;;  %v2603_v35 = vadd.f32 %v2602_v56, %v4779_v7 }
 0x1d2   : > { %v2747_v9 = vpop.f32.mrf.mxu0 }
 0x1d3   : > { %v2748_v11 = vadd.f32 %v2747_v9, %v2699_v37 }
 0x1d4   : > { %v2651_v14 = vpop.f32.mrf.mxu2 }
 0x1d5   : > { %v2803_v53 = vadd.f32 %v2802_v6, %v2748_v11  ;;  %v2826_v16 = vmul.f32 %v2748_v11, %v2748_v11  ;;  %v2652_v19 = vadd.f32 %v2651_v14, %v2603_v35 }
 0x1d7   : > { %v2841_v1 = vadd.f32 %v2840_v39, %v2826_v16  ;;  %v2701_v30 = vadd.f32 %v2700_v8, %v2652_v19 }
 0x1d8   : > { %v2605_v13 = vpop.f32.mrf.mxu1 }
 0x1d9   : > { %v2703_v22 = vpop.f32.mrf.mxu3  ;;  %v2606_v33 = vadd.f32 %v2605_v13, %v4782_v60 }
 0x1da   : > { %v2749_v27 = vpop.f32.mrf.mxu0 }
 0x1db   : > { %v2750_v31 = vadd.f32 %v2749_v27, %v2701_v30 }
 0x1dc   : > { %v2654_v34 = vpop.f32.mrf.mxu2 }
 0x1dd   : > { %v3838_v32 = vpack.c.bf16 %v2750_v31, %v2748_v11  ;;  %v2804_v58 = vadd.f32 %v2803_v53, %v2750_v31  ;;  %v2827_v10 = vmul.f32 %v2750_v31, %v2750_v31  ;;  %v2655_v36 = vadd.f32 %v2654_v34, %v2606_v33 }
 0x1df   : > { %3854 = vst [vmem:[%s4801_s12 + $0x28] sm:$0xff] %v3838_v32   ;;  %v2842_v7 = vadd.f32 %v2841_v1, %v2827_v10  ;;  %v2704_v28 = vadd.f32 %v2703_v22, %v2655_v36 }
 0x1e0   : > { %v2607_v43 = vpop.f32.mrf.mxu1 }
 0x1e1   : > { %v2705_v40 = vpop.f32.mrf.mxu3  ;;  %v2608_v12 = vadd.f32 %v2607_v43, %v4785_v46 }
 0x1e2   : > { %v2752_v42 = vpop.f32.mrf.mxu0 }
 0x1e3   : > { %v2753_v45 = vadd.f32 %v2752_v42, %v2704_v28 }
 0x1e4   : > { %v2656_v15 = vpop.f32.mrf.mxu2 }
 0x1e5   : > { %v2805_v59 = vadd.f32 %v2804_v58, %v2753_v45  ;;  %v2828_v20 = vmul.f32 %v2753_v45, %v2753_v45  ;;  %v2657_v57 = vadd.f32 %v2656_v15, %v2608_v12 }
 0x1e7   : > { %v2843_v60 = vadd.f32 %v2842_v7, %v2828_v20  ;;  %v2706_v41 = vadd.f32 %v2705_v40, %v2657_v57 }
 0x1e8   : > { %v2610_v17 = vpop.f32.mrf.mxu1 }
 0x1e9   : > { %v2611_v29 = vadd.f32 %v2610_v17, %v4788_v49  ;;  %v2708_v44 = vpop.f32.mrf.mxu3 }
 0x1ea   : > { %v2754_v26 = vpop.f32.mrf.mxu0 }
 0x1eb   : > { %v2755_v54 = vadd.f32 %v2754_v26, %v2706_v41 }
 0x1ec   : > { %v2659_v3 = vpop.f32.mrf.mxu2 }
 0x1ed   : > { %v3843_v63 = vpack.c.bf16 %v2755_v54, %v2753_v45  ;;  %v2806_v51 = vadd.f32 %v2805_v59, %v2755_v54  ;;  %v2829_v52 = vmul.f32 %v2755_v54, %v2755_v54  ;;  %v2660_v24 = vadd.f32 %v2659_v3, %v2611_v29 }
 0x1ef   : > { %3855 = vst [vmem:[%s4801_s12 + $0x30] sm:$0xff] %v3843_v63   ;;  %v2844_v46 = vadd.f32 %v2843_v60, %v2829_v52  ;;  %v2709_v50 = vadd.f32 %v2708_v44, %v2660_v24 }
 0x1f0   : > { %v2612_v25 = vpop.f32.mrf.mxu1 }
 0x1f1   : > { %v2613_v48 = vadd.f32 %v2612_v25, %v4791_v5  ;;  %v2710_v4 = vpop.f32.mrf.mxu3 }
 0x1f2   : > { %v2757_v38 = vpop.f32.mrf.mxu0 }
 0x1f3   : > { %v2758_v62 = vadd.f32 %v2757_v38, %v2709_v50 }
 0x1f4   : > { %v2661_v0 = vpop.f32.mrf.mxu2 }
 0x1f5   : > { %v2807_v47 = vadd.f32 %v2806_v51, %v2758_v62  ;;  %v2830_v49 = vmul.f32 %v2758_v62, %v2758_v62  ;;  %v2662_v2 = vadd.f32 %v2661_v0, %v2613_v48 }
 0x1f7   : > { %v2845_v18 = vadd.f32 %v2844_v46, %v2830_v49  ;;  %v2711_v61 = vadd.f32 %v2710_v4, %v2662_v2 }
 0x1fa   : > { %v2759_v23 = vpop.f32.mrf.mxu0 }
 0x1fb   : > { %v2760_v6 = vadd.f32 %v2759_v23, %v2711_v61 }
 0x1fd   : > { %v3848_v55 = vpack.c.bf16 %v2760_v6, %v2758_v62  ;;  %v2808_v21 = vadd.f32 %v2807_v47, %v2760_v6  ;;  %v2831_v39 = vmul.f32 %v2760_v6, %v2760_v6 }
 0x1ff   : > { %3856 = vst [vmem:[%s4801_s12 + $0x38] sm:$0xff] %v3848_v55   ;;  %v2809_v37 = vrot.slane %v2808_v21, 4  ;;  %v2846_v56 = vadd.f32 %v2845_v18, %v2831_v39 }
 0x201   : > { %v2810_v5 = vadd.f32 %v2809_v37, %v2808_v21  ;;  %v2847_v8 = vrot.slane %v2846_v56, 4 }
 0x203   : > { %v2811_v9 = vrot.slane %v2810_v5, 2  ;;  %v2848_v11 = vadd.f32 %v2847_v8, %v2846_v56 }
 0x205   : > { %v2812_v35 = vadd.f32 %v2811_v9, %v2810_v5  ;;  %v2849_v14 = vrot.slane %v2848_v11, 2 }
 0x207   : > { %v2813_v53 = vrot.slane %v2812_v35, 1  ;;  %v2850_v16 = vadd.f32 %v2849_v14, %v2848_v11 }
 0x209   : > { %v2814_v19 = vadd.f32 %v2813_v53, %v2812_v35  ;;  %v2851_v1 = vrot.slane %v2850_v16, 1 }
 0x20b   : > { %2815 = vst [vmem:[%s252_s8] sm:$0x1] %v2814_v19  ;;  %v2852_v30 = vadd.f32 %v2851_v1, %v2850_v16 }
 0x20d   : > { %2853 = vst [vmem:[%s259_s25] sm:$0x1] %v2852_v30 }
 0x20e PF: > { %s15_s19 = sadd.s32 1, %s3959_s19   ;;  %s4865_s15 = smov %s3951_s17 }
 0x20f   : > { %p12_p10 = scmp.ge.s32.totalorder %s15_s19, 6   ;;  %s4866_s16 = smov %s3955_s18 }
 0x210   : > { %s4867_s17 = smov %s4870_s20  ;;  %s4868_s18 = smov %s4874_s21 }
 0x211   :  { %14 = sbr.rel (!%p12_p10) target bundleno = 3 (0x3), region = 87 }

// kernel: resblock_forward.4
= control target key start
LH: loop header
LB: loop body
LE: loop exit
PB: predicated region body
PF: predicated region fallthrough
CT: control target
= control target key end

     0   :  { %s4238_s21 = smov 0   ;;  %s4240_s22 = smov 0   ;;  %s5177_s0 = inlined_call_operand.vmem [shape: bf16[2,16,16,128], index: 0, kind: input, shape index: {}]   ;;  %s5178_s1 = inlined_call_operand.vmem [shape: bf16[1152,128], index: 1, kind: input, shape index: {}]   ;;  %s5179_s2 = inlined_call_operand.vmem [shape: f32[1,1,128], index: 2, kind: input, shape index: {}]   ;;  %s5180_s3 = inlined_call_operand.vmem [shape: f32[1,1,128], index: 3, kind: input, shape index: {}]   ;;  %s5181_s4 = inlined_call_operand.vmem [shape: bf16[2,16,16,128], index: 4, kind: output, shape index: {0}]   ;;  %s5182_s5 = inlined_call_operand.vmem [shape: f32[2,2,1,128], index: 5, kind: output, shape index: {1}]   ;;  %s5183_s6 = inlined_call_operand.vmem [shape: f32[2,2,1,128], index: 6, kind: output, shape index: {2}]  }
   0x1   :  { %s4242_s23 = smov 0   ;;  %s4244_s24 = smov 0  }
   0x2   :  { %s4246_s25 = smov 0  }
   0x3 LB: > { %s26_s26 = sadd.s32 1, %s4193_s23  ;;  %s29_s27 = sadd.s32 1, %s4197_s24  ;;  %s4201_s25 = sphi %s4246_s25, %s17_s25   ;;  %s4197_s24 = sphi %s4244_s24, %s5199_s24   ;;  %s4193_s23 = sphi %s4242_s23, %s5198_s23   ;;  %s4189_s22 = sphi %s4240_s22, %s5197_s22   ;;  %s4185_s21 = sphi %s4238_s21, %s5196_s21  }
   0x4   : > { %p27_p0 = scmp.ge.s32.totalorder %s26_s26, 2  ;;  %p3248_p1 = scmp.ge.s32.totalorder %s4201_s25, 1 }
   0x5   : > { %p235_p2 = scmp.lt.s32.totalorder %s4201_s25, 5 }
   0x6   : > { %s5201_s26 = smov (%p27_p0, %s26_s26), 0  ;;  %s5203_s27 = smov (!%p27_p0, %s29_s27), %s4197_s24 }
   0x7   : > { %p236_p3 = pnand %p3248_p1, %p235_p2  ;;  %p31_p4 = scmp.ge.s32.totalorder %s5203_s27, 2 }
   0x8   : > { %p284_p5 = scmp.lt.s32.totalorder (!%p236_p3), %s4189_s22, 1  ;;  %s3876_s8 = sshll.u32 (!%p236_p3), %s4185_s21, 6 }
   0x9   : > { %s5205_s27 = smov (%p31_p4, %s5203_s27), 0  ;;  %239 = sbr.rel (%p236_p3) target bundleno = 537 (0x219), region = 36 }
   0xa   : > { %s4280_s9 = sshll.u32 (!%p236_p3), %s4185_s21, 3  ;;  %p302_p9 = scmp.lt.s32.totalorder (!%p236_p3), %s4185_s21, 1 }
   0xb   : > { %p315_p6 = scmp.eq.s32.totalorder (!%p236_p3), %s4280_s9, 0  ;;  %s3258_s17 = sadd.s32 (!%p236_p3), 4294967295, %s4280_s9 }
   0xc   : > { %s318_s7 = sadd.s32 (!%p236_p3), 8, %s4280_s9  ;;  %p292_p8 = scmp.lt.s32.totalorder (!%p236_p3), %s4280_s9, 15 }
   0xd   : > { %p319_p7 = scmp.ge.s32.totalorder (!%p236_p3), %s318_s7, 16 }
   0xe   : > { %v3957_v0 = vld [vmem:[%s5178_s1 + $0x38] sm:$0xff]  ;;  %v3956_v1 = vld [vmem:[%s5178_s1 + $0x30] sm:$0xff]  ;;  %s5207_s22 = smov (!%p284_p5, %s4189_s22), 1  ;;  %v3955_v2 = vld [vmem:[%s5178_s1 + $0x28] sm:$0xff]  ;;  %vm326_vm0 = vsmask.f32 256 }
   0xf   : > { %4093 = vmatpush.bf16.msra.mxu1 %v3957_v0  ;;  %4094 = vmatpush.bf16.msra.mxu2 %v3957_v0  ;;  %s3873_s10 = sshll.u32 %s5207_s22, 7  ;;  %vm327_vm1 = vsmask.f32 4368  ;;  %vm349_vm2 = vcmask 1043456   ;;  %vm350_vm3 = vsmask.f32 7938 }
  0x10   : > { %4095 = vmatpush.bf16.msra.mxu3 %v3957_v0  ;;  %2533 = vmatpush.bf16.msra.mxu0 %v3957_v0  ;;  %s4289_s15 = scalar_lea.vmem %s5177_s0, %s3873_s10  ;;  %v3954_v6 = vld [vmem:[%s5178_s1 + $0x20] sm:$0xff]  ;;  %v548_v12 = vld [vmem:[#allocation2 + $0x18] sm:$0xf]  ;;  %vm4306_vm4 = vmor %vm326_vm0, %vm327_vm1  ;;  %vm356_vm6 = vcmask 1040384   ;;  %s5209_s17 = smov (%p315_p6, %s3258_s17), 1  ;;  %vm1246_vm11 = vcmask 1042432  }
  0x11   : > { %s4293_s16 = scalar_lea.vmem %s4289_s15, %s3876_s8  ;;  %vm4315_vm5 = vmand %vm349_vm2, %vm350_vm3  ;;  %v562_v32 = vld [vmem:[#allocation2 + $0x30] sm:$0xf]  ;;  %v576_v34 = vld [vmem:[#allocation2 + $0x48] sm:$0xf]  ;;  %s3874_s20 = sshll.u32 %s5209_s17, 3  ;;  %vm1247_vm12 = vcmask 1046532  }
  0x12   : > { %v366_v3 = vld [vmem:[%s4293_s16 + $0x8] sm:$0xf]  ;;  %v367_v4 = vld [vmem:[%s4293_s16 + $0xc] sm:$0xf]  ;;  %v370_v5 = vld [vmem:[%s4293_s16 + $0x18] sm:$0xf]  ;;  %s323_s30 = scalar_lea.vmem %s4289_s15, %s3874_s20 }
  0x13   : > { %4096 = vmatpush.bf16.msra.mxu1 %v3956_v1  ;;  %4097 = vmatpush.bf16.msra.mxu2 %v3956_v1  ;;  %v398_v7 = vshrl.u32 %v366_v3, 16  ;;  %v401_v8 = vshll.u32 %v366_v3, 16  ;;  %v406_v9 = vshrl.u32 %v367_v4, 16  ;;  %v409_v10 = vshll.u32 %v367_v4, 16  ;;  %v371_v11 = vld [vmem:[%s4293_s16 + $0x1c] sm:$0xf]  ;;  %vm4367_vm7 = vmand %vm356_vm6, %vm326_vm0 }
  0x14   : > { %4098 = vmatpush.bf16.msra.mxu3 %v3956_v1  ;;  %2534 = vmatpush.bf16.msra.mxu0 %v3956_v1  ;;  %v432_v13 = vshrl.u32 %v370_v5, 16  ;;  %v435_v14 = vshll.u32 %v370_v5, 16  ;;  %v440_v15 = vshrl.u32 %v371_v11, 16  ;;  %v443_v16 = vshll.u32 %v371_v11, 16  ;;  %v374_v17 = vld [vmem:[%s4293_s16 + $0x28] sm:$0xf]  ;;  %vm4624_vm10 = vmand %vm356_vm6, %vm350_vm3 }
  0x15   : > { %v400_v19 = vrot.slane %v398_v7, 7  ;;  %v4310_v20 = vrot.slane %v406_v9, 7  ;;  %v375_v21 = vld [vmem:[%s4293_s16 + $0x2c] sm:$0xf]  ;;  %v466_v22 = vshrl.u32 %v374_v17, 16  ;;  %v469_v23 = vshll.u32 %v374_v17, 16  ;;  %vm4644_vm14 = vmor %vm1246_vm11, %vm1247_vm12 }
  0x16   : > { %v434_v25 = vrot.slane %v432_v13, 7  ;;  %v4319_v26 = vrot.slane %v440_v15, 7  ;;  %v474_v27 = vshrl.u32 %v375_v21, 16  ;;  %v477_v28 = vshll.u32 %v375_v21, 16  ;;  %v368_v39 = vld [vmem:[%s4293_s16 + $0x10] sm:$0xf] }
  0x17   : > { %4099 = vmatpush.bf16.msra.mxu1 %v3955_v2  ;;  %4100 = vmatpush.bf16.msra.mxu2 %v3955_v2  ;;  %v403_v29 = vor.u32 %v401_v8, %v400_v19  ;;  %v404_v30 = vrot.slane %v400_v19, 4  ;;  %v411_v31 = vor.u32 %v409_v10, %v4310_v20  ;;  %v468_v33 = vrot.slane %v466_v22, 7  ;;  %v3953_v40 = vld [vmem:[%s5178_s1 + $0x18] sm:$0xff]  ;;  %v372_v45 = vld [vmem:[%s4293_s16 + $0x20] sm:$0xf]  ;;  %v3952_v56 = vld [vmem:[%s5178_s1 + $0x10] sm:$0xff] }
  0x18   : > { %4101 = vmatpush.bf16.msra.mxu3 %v3955_v2  ;;  %2535 = vmatpush.bf16.msra.mxu0 %v3955_v2  ;;  %v437_v35 = vor.u32 %v435_v14, %v434_v25  ;;  %v438_v36 = vrot.slane %v434_v25, 4  ;;  %v445_v37 = vor.u32 %v443_v16, %v4319_v26  ;;  %v4327_v38 = vrot.slane %v474_v27, 7  ;;  %v4340_v46 = vld [vmem:[%s4293_s16 + $0x30] sm:$0xf]  ;;  %v324_v50 = vld [vmem:[%s323_s30] sm:$0xf] }
  0x19   : > { %v412_v41 = vsel %vm4306_vm4, %v404_v30, %v411_v31  ;;  %v549_v42 = vsel %vm4315_vm5, %v403_v29, %v548_v12  ;;  %v471_v43 = vor.u32 %v469_v23, %v468_v33  ;;  %v472_v44 = vrot.slane %v468_v33, 4  ;;  %v325_v51 = vld [vmem:[%s323_s30 + $0x4] sm:$0xf]  ;;  %v352_v59 = vld [vmem:[#allocation2] sm:$0xf]  ;;  %v3951_v11 = vld [vmem:[%s5178_s1 + $0x8] sm:$0xff] }
  0x1a   : > { %550 = vst [vmem:[#allocation2 + $0x18] sm:$0xf] %v549_v42  ;;  %v446_v47 = vsel %vm4306_vm4, %v438_v36, %v445_v37  ;;  %v563_v48 = vsel %vm4315_vm5, %v437_v35, %v562_v32  ;;  %v479_v49 = vor.u32 %v477_v28, %v4327_v38  ;;  %v330_v53 = vshrl.u32 %v324_v50, 16  ;;  %v555_v0 = vld [vmem:[#allocation2 + $0x24] sm:$0xf]  ;;  %s5211_s7 = smov (%p319_p7, %s318_s7), 14 }
  0x1b   : > { %4102 = vmatpush.bf16.msra.mxu1 %v3954_v6  ;;  %4103 = vmatpush.bf16.msra.mxu2 %v3954_v6  ;;  %551 = vst [vmem:[#allocation2 + $0x1c] sm:$0xf] %v412_v41  ;;  %v577_v52 = vsel %vm4315_vm5, %v471_v43, %v576_v34  ;;  %v333_v54 = vshll.u32 %v324_v50, 16  ;;  %v338_v55 = vshrl.u32 %v325_v51, 16  ;;  %v341_v58 = vshll.u32 %v325_v51, 16  ;;  %v3950_v31 = vld [vmem:[%s5178_s1] sm:$0xff] }
  0x1c   : > { %4104 = vmatpush.bf16.msra.mxu3 %v3954_v6  ;;  %2536 = vmatpush.bf16.msra.mxu0 %v3954_v6  ;;  %564 = vst [vmem:[#allocation2 + $0x30] sm:$0xf] %v563_v48  ;;  %v480_v57 = vsel %vm4306_vm4, %v472_v44, %v479_v49  ;;  %v415_v60 = vshrl.u32 %v368_v39, 16  ;;  %v418_v61 = vshll.u32 %v368_v39, 16  ;;  %v332_v62 = vrot.slane %v330_v53, 7  ;;  %s3877_s8 = sshll.u32 %s5211_s7, 3 }
  0x1d   : > { %565 = vst [vmem:[#allocation2 + $0x34] sm:$0xf] %v446_v47  ;;  %v4354_v63 = vrot.slane %v338_v55, 7  ;;  %v449_v1 = vshrl.u32 %v372_v45, 16  ;;  %v452_v2 = vshll.u32 %v372_v45, 16  ;;  %v483_v5 = vshrl.u32 %v4340_v46, 16  ;;  %s599_s10 = scalar_lea.vmem %s4289_s15, %s3877_s8 }
  0x1e   : > { %578 = vst [vmem:[#allocation2 + $0x48] sm:$0xf] %v577_v52  ;;  %v369_v3 = vld [vmem:[%s4293_s16 + $0x14] sm:$0xf]  ;;  %v417_v4 = vrot.slane %v415_v60, 7  ;;  %v335_v6 = vor.u32 %v333_v54, %v332_v62  ;;  %v336_v7 = vrot.slane %v332_v62, 4 }
  0x1f   : > { %4105 = vmatpush.bf16.msra.mxu1 %v3953_v40  ;;  %4106 = vmatpush.bf16.msra.mxu2 %v3953_v40  ;;  %579 = vst [vmem:[#allocation2 + $0x4c] sm:$0xf] %v480_v57  ;;  %v343_v8 = vor.u32 %v341_v58, %v4354_v63  ;;  %v423_v9 = vshrl.u32 %v369_v3, 16  ;;  %v373_v10 = vld [vmem:[%s4293_s16 + $0x24] sm:$0xf]  ;;  %v4363_v13 = vrot.slane %v449_v1, 7 }
  0x20   : > { %4107 = vmatpush.bf16.msra.mxu3 %v3953_v40  ;;  %2537 = vmatpush.bf16.msra.mxu0 %v3953_v40  ;;  %v420_v12 = vor.u32 %v418_v61, %v417_v4  ;;  %v457_v14 = vshrl.u32 %v373_v10, 16  ;;  %v353_v21 = vsel %vm4315_vm5, %v335_v6, %v352_v59  ;;  %v4377_v23 = vrot.slane %v483_v5, 7  ;;  %v569_v30 = vld [vmem:[#allocation2 + $0x3c] sm:$0xf]  ;;  %v377_v39 = vld [vmem:[%s4293_s16 + $0x34] sm:$0xf] }
  0x21   : > { %v632_v16 = vld [vmem:[#allocation2 + $0x18] sm:$0x2]  ;;  %v686_v17 = vld [vmem:[#allocation2 + $0x18] sm:$0x1]  ;;  %v344_v19 = vsel %vm4306_vm4, %v336_v7, %v343_v8  ;;  %v4375_v22 = vrot.slane %v423_v9, 7  ;;  %v426_v27 = vshll.u32 %v369_v3, 16  ;;  %v454_v29 = vor.u32 %v452_v2, %v4363_v13 }
  0x22   : > { %v3267_v25 = vrot.slane %v632_v16, 9  ;;  %354 = vst [vmem:[#allocation2] sm:$0xf] %v353_v21  ;;  %v556_v28 = vsel %vm4315_vm5, %v420_v12, %v555_v0  ;;  %v421_v36 = vrot.slane %v417_v4, 4  ;;  %v455_v47 = vrot.slane %v4363_v13, 4  ;;  %v3973_v13 = vld [vmem:[%s5178_s1 + $0xb8] sm:$0xff] }
  0x23   : > { %4108 = vmatpush.bf16.msra.mxu1 %v3952_v56  ;;  %4109 = vmatpush.bf16.msra.mxu2 %v3952_v56  ;;  %v634_v32 = vld [vmem:[#allocation2 + $0x30] sm:$0x2]  ;;  %v692_v33 = vld [vmem:[#allocation2 + $0x30] sm:$0x1]  ;;  %355 = vst [vmem:[#allocation2 + $0x4] sm:$0xf] %v344_v19  ;;  %v428_v37 = vor.u32 %v426_v27, %v4375_v22  ;;  %v570_v42 = vsel %vm4315_vm5, %v454_v29, %v569_v30 }
  0x24   : > { %4110 = vmatpush.bf16.msra.mxu3 %v3952_v56  ;;  %2538 = vmatpush.bf16.msra.mxu0 %v3952_v56  ;;  %v687_v34 = vsel %vm4367_vm7, %v3267_v25, %v686_v17  ;;  %v3269_v35 = vrot.slane %v634_v32, 9  ;;  %557 = vst [vmem:[#allocation2 + $0x24] sm:$0xf] %v556_v28  ;;  %v4396_v48 = vrot.slane %v457_v14, 7  ;;  %v460_v49 = vshll.u32 %v373_v10, 16  ;;  %v3965_v14 = vld [vmem:[%s5178_s1 + $0x78] sm:$0xff] }
  0x25   : > { %688 = vst [vmem:[#allocation2 + $0x18] sm:$0x1] %v687_v34  ;;  %v636_v40 = vld [vmem:[#allocation2 + $0x48] sm:$0x2]  ;;  %v698_v41 = vld [vmem:[#allocation2 + $0x48] sm:$0x1]  ;;  %v429_v45 = vsel %vm4306_vm4, %v421_v36, %v428_v37 }
  0x26   : > { %v693_v43 = vsel %vm4367_vm7, %v3269_v35, %v692_v33  ;;  %v3271_v44 = vrot.slane %v636_v40, 9  ;;  %571 = vst [vmem:[#allocation2 + $0x3c] sm:$0xf] %v570_v42  ;;  %v486_v50 = vshll.u32 %v4340_v46, 16  ;;  %v489_v51 = vrot.slane %v4377_v23, 4  ;;  %v3981_v16 = vld [vmem:[%s5178_s1 + $0xf8] sm:$0xff] }
  0x27   : > { %4111 = vmatpush.bf16.msra.mxu1 %v3951_v11  ;;  %4112 = vmatpush.bf16.msra.mxu2 %v3951_v11  ;;  %694 = vst [vmem:[#allocation2 + $0x30] sm:$0x1] %v693_v43  ;;  %v491_v53 = vshrl.u32 %v377_v39, 16  ;;  %v494_v54 = vshll.u32 %v377_v39, 16  ;;  %v364_v55 = vld [vmem:[%s4293_s16] sm:$0xf]  ;;  %v462_v46 = vor.u32 %v460_v49, %v4396_v48 }
  0x28   : > { %4113 = vmatpush.bf16.msra.mxu3 %v3951_v11  ;;  %2539 = vmatpush.bf16.msra.mxu0 %v3951_v11  ;;  %v699_v52 = vsel %vm4367_vm7, %v3271_v44, %v698_v41  ;;  %558 = vst [vmem:[#allocation2 + $0x28] sm:$0xf] %v429_v45  ;;  %v4406_v56 = vld [vmem:[%s5179_s2] ss:$0 sm:$0xff]  ;;  %v488_v59 = vor.u32 %v486_v50, %v4377_v23  ;;  %v583_v62 = vld [vmem:[#allocation2 + $0x54] sm:$0xf] }
  0x29   : > { %700 = vst [vmem:[#allocation2 + $0x48] sm:$0x1] %v699_v52  ;;  %v630_v57 = vld [vmem:[#allocation2] sm:$0x2]  ;;  %v680_v58 = vld [vmem:[#allocation2] sm:$0x1]  ;;  %v463_v5 = vsel %vm4306_vm4, %v455_v47, %v462_v46 }
  0x2a   : > { %v3265_v60 = vrot.slane %v630_v57, 9  ;;  %v4410_v61 = vrot.slane %v491_v53, 7  ;;  %v381_v0 = vshrl.u32 %v364_v55, 16  ;;  %v384_v1 = vshll.u32 %v364_v55, 16  ;;  %v4415_v2 = vld [vmem:[%s5180_s3] ss:$0 sm:$0xff] }
  0x2b   : > { %4114 = vmatpush.bf16.msra.mxu1 %v3950_v31  ;;  %4115 = vmatpush.bf16.msra.mxu2 %v3950_v31  ;;  %v633_v3 = vld [vmem:[#allocation2 + $0x24] sm:$0x2]  ;;  %v689_v4 = vld [vmem:[#allocation2 + $0x24] sm:$0x1]  ;;  %572 = vst [vmem:[#allocation2 + $0x40] sm:$0xf] %v463_v5  ;;  %v584_v17 = vsel %vm4315_vm5, %v488_v59, %v583_v62 }
  0x2c   : > { %4116 = vmatpush.bf16.msra.mxu3 %v3950_v31  ;;  %2540 = vmatpush.bf16.msra.mxu0 %v3950_v31  ;;  %v4082_v6 = vld [vmem:[#allocation2 + $0x18] sm:$0xff]   ;;  %v681_v7 = vsel %vm4367_vm7, %v3265_v60, %v680_v58  ;;  %v3268_v8 = vrot.slane %v633_v3, 9  ;;  %v496_v9 = vor.u32 %v494_v54, %v4410_v61  ;;  %v4422_v10 = vrot.slane %v381_v0, 7  ;;  %v541_v33 = vld [vmem:[#allocation2 + $0xc] sm:$0xf]  ;;  %v3972_v55 = vld [vmem:[%s5178_s1 + $0xb0] sm:$0xff] }
  0x2d   : > { %v4028_v11 = vunpack.c.l.bf16 %v4082_v6  ;;  %v4029_v12 = vunpack.c.h.bf16 %v4082_v6  ;;  %682 = vst [vmem:[#allocation2] sm:$0x1] %v681_v7  ;;  %v635_v23 = vld [vmem:[#allocation2 + $0x3c] sm:$0x2]  ;;  %v695_v32 = vld [vmem:[#allocation2 + $0x3c] sm:$0x1] }
  0x2e   : > { %v4083_v19 = vld [vmem:[#allocation2 + $0x30] sm:$0xff]   ;;  %v690_v21 = vsel %vm4367_vm7, %v3268_v8, %v689_v4  ;;  %v497_v25 = vsel %vm4306_vm4, %v489_v51, %v496_v9  ;;  %v386_v27 = vor.u32 %v384_v1, %v4422_v10  ;;  %v3270_v35 = vrot.slane %v635_v23, 9  ;;  %585 = vst [vmem:[#allocation2 + $0x54] sm:$0xf] %v584_v17  ;;  %v3989_v51 = vld [vmem:[%s5178_s1 + $0x138] sm:$0xff]  ;;  %v3971_v5 = vld [vmem:[%s5178_s1 + $0xa8] sm:$0xff] }
  0x2f   : > { %v861_v28 = vmul.f32 %v4406_v56, %v4028_v11  ;;  %v862_v29 = vmul.f32 %v4406_v56, %v4029_v12  ;;  %v4032_v30 = vunpack.c.l.bf16 %v4083_v19  ;;  %v4033_v31 = vunpack.c.h.bf16 %v4083_v19  ;;  %2631 = vmatpush.bf16.msrb.mxu2 %v3973_v13  ;;  %2582 = vmatpush.bf16.msrb.mxu1 %v3965_v14  ;;  %691 = vst [vmem:[#allocation2 + $0x24] sm:$0x1] %v690_v21  ;;  %v3964_v57 = vld [vmem:[%s5178_s1 + $0x70] sm:$0xff]  ;;  %v3963_v6 = vld [vmem:[%s5178_s1 + $0x68] sm:$0xff]  ;;  %s5213_s9 = smov (!%p292_p8, %s4280_s9), 15  ;;  %s3253_s14 = sshll.u32 %s5207_s22, 5 }
  0x30   : > { %v4084_v34 = vld [vmem:[#allocation2 + $0x48] sm:$0xff]   ;;  %2680 = vmatpush.bf16.msrb.mxu3 %v3981_v16  ;;  %v542_v36 = vsel %vm4315_vm5, %v386_v27, %v541_v33  ;;  %586 = vst [vmem:[#allocation2 + $0x58] sm:$0xf] %v497_v25  ;;  %v696_v44 = vsel %vm4367_vm7, %v3270_v35, %v695_v32  ;;  %2729 = vmatpush.bf16.msrb.mxu0 %v3989_v51  ;;  %v3980_v60 = vld [vmem:[%s5178_s1 + $0xf0] sm:$0xff]  ;;  %v3970_v25 = vld [vmem:[%s5178_s1 + $0xa0] sm:$0xff]  ;;  %s3252_s13 = sshll.u32 %s5213_s9, 1 }
  0x31   : > { %v895_v37 = vadd.f32 %v4415_v2, %v861_v28  ;;  %v896_v39 = vadd.f32 %v4415_v2, %v862_v29  ;;  %v867_v40 = vmul.f32 %v4406_v56, %v4032_v30  ;;  %v868_v41 = vmul.f32 %v4406_v56, %v4033_v31  ;;  %543 = vst [vmem:[#allocation2 + $0xc] sm:$0xf] %v542_v36  ;;  %v3988_v62 = vld [vmem:[%s5178_s1 + $0x130] sm:$0xff]  ;;  %v3979_v8 = vld [vmem:[%s5178_s1 + $0xe8] sm:$0xff]  ;;  %v3962_v27 = vld [vmem:[%s5178_s1 + $0x60] sm:$0xff]  ;;  %s296_s17 = sadd.s32 %s3253_s14, %s3252_s13  ;;  %s5215_s21 = smov (!%p302_p9, %s4185_s21), 1 }
  0x32   : > { %v4036_v42 = vunpack.c.l.bf16 %v4084_v34  ;;  %v4037_v43 = vunpack.c.h.bf16 %v4084_v34  ;;  %697 = vst [vmem:[#allocation2 + $0x3c] sm:$0x1] %v696_v44  ;;  %v3987_v13 = vld [vmem:[%s5178_s1 + $0x128] sm:$0xff]  ;;  %v3978_v30 = vld [vmem:[%s5178_s1 + $0xe0] sm:$0xff]  ;;  %vm995_vm8 = vsmask.f32 3328 }
  0x33   : > { %v925_v45 = vmax.f32 %v895_v37, 0.0  ;;  %v926_v47 = vmax.f32 %v896_v39, 0.0  ;;  %v901_v49 = vadd.f32 %v4415_v2, %v867_v40  ;;  %v902_v50 = vadd.f32 %v4415_v2, %v868_v41  ;;  %2632 = vmatpush.bf16.msrb.mxu2 %v3972_v55  ;;  %2583 = vmatpush.bf16.msrb.mxu1 %v3964_v57  ;;  %v3986_v33 = vld [vmem:[%s5178_s1 + $0x120] sm:$0xff]  ;;  %s3254_s18 = sshll.u32 %s296_s17, 2  ;;  %s3255_s9 = sshll.u32 %s5207_s22, 1 }
  0x34   : > { %v873_v52 = vmul.f32 %v4406_v56, %v4036_v42  ;;  %v874_v53 = vmul.f32 %v4406_v56, %v4037_v43  ;;  %v4023_v54 = vld [vmem:[#allocation2] sm:$0xff]   ;;  %2681 = vmatpush.bf16.msrb.mxu3 %v3980_v60  ;;  %2730 = vmatpush.bf16.msrb.mxu0 %v3988_v62  ;;  %vm996_vm9 = vsmask.f32 7440  ;;  %s5127_s28 = scalar_lea.vmem %s5181_s4, %s3254_s18  ;;  %s305_s29 = sadd.s32 %s3255_s9, %s5215_s21 }
  0x35   : > { %v4463_v58 = vpack.c.bf16 %v925_v45, %v925_v45  ;;  %v4465_v46 = vpack.c.bf16 %v926_v47, %v926_v47  ;;  %v931_v59 = vmax.f32 %v901_v49, 0.0  ;;  %v932_v0 = vmax.f32 %v902_v50, 0.0  ;;  %vm4635_vm13 = vmor %vm995_vm8, %vm996_vm9  ;;  %s306_s8 = scalar_lea.vmem %s5182_s5, %s305_s29  ;;  %s313_s11 = scalar_lea.vmem %s5183_s6, %s305_s29 }
  0x36   : > { %v4024_v1 = vunpack.c.l.bf16 %v4023_v54  ;;  %v4025_v3 = vunpack.c.h.bf16 %v4023_v54  ;;  %v907_v4 = vadd.f32 %v4415_v2, %v873_v52  ;;  %v908_v7 = vadd.f32 %v4415_v2, %v874_v53  ;;  %v800_v9 = vld [vmem:[#allocation2 + $0x24] sm:$0xff]  }
  0x37   : > { %983 = vst [vmem:[#allocation3 + $0x90] sm:$0xf] %v4463_v58  ;;  %v4487_v11 = vpack.c.bf16 %v931_v59, %v931_v59  ;;  %v830_v14 = vunpack.c.l.bf16 %v800_v9  ;;  %v831_v16 = vunpack.c.h.bf16 %v800_v9  ;;  %v4494_v17 = vpack.c.bf16 %v932_v0, %v932_v0  ;;  %2633 = vmatpush.bf16.msrb.mxu2 %v3971_v5  ;;  %2584 = vmatpush.bf16.msrb.mxu1 %v3963_v6  ;;  %v365_v0 = vld [vmem:[%s4293_s16 + $0x4] sm:$0xf] }
  0x38   : > { %984 = vst [vmem:[#allocation3 + $0xb4] sm:$0xf] %v4465_v46  ;;  %v855_v12 = vmul.f32 %v4406_v56, %v4024_v1  ;;  %v856_v19 = vmul.f32 %v4406_v56, %v4025_v3  ;;  %v937_v23 = vmax.f32 %v907_v4, 0.0  ;;  %v938_v29 = vmax.f32 %v908_v7, 0.0  ;;  %2682 = vmatpush.bf16.msrb.mxu3 %v3979_v8  ;;  %2731 = vmatpush.bf16.msrb.mxu0 %v3987_v13  ;;  %v637_v13 = vld [vmem:[#allocation2 + $0x54] sm:$0x2] }
  0x39   : > { %1339 = vst [vmem:[#allocation3 + $0x54] sm:$0xf] %v4463_v58  ;;  %v806_v21 = vld [vmem:[#allocation2 + $0x3c] sm:$0xff]   ;;  %v864_v28 = vmul.f32 %v4406_v56, %v830_v14  ;;  %v865_v31 = vmul.f32 %v4406_v56, %v831_v16  ;;  %v389_v5 = vshrl.u32 %v365_v0, 16  ;;  %v392_v16 = vshll.u32 %v365_v0, 16 }
  0x3a   : > { %1340 = vst [vmem:[#allocation3 + $0x78] sm:$0xf] %v4465_v46  ;;  %v889_v32 = vadd.f32 %v4415_v2, %v855_v12  ;;  %v836_v34 = vunpack.c.l.bf16 %v806_v21  ;;  %v890_v36 = vadd.f32 %v4415_v2, %v856_v19  ;;  %v837_v37 = vunpack.c.h.bf16 %v806_v21  ;;  %v701_v21 = vld [vmem:[#allocation2 + $0x54] sm:$0x1]  ;;  %v552_v0 = vld [vmem:[#allocation2 + $0x20] sm:$0x1] }
  0x3b   : > { %1423 = vst [vmem:[#allocation3 + $0x18] sm:$0xf] %v4463_v58  ;;  %v4518_v40 = vpack.c.bf16 %v937_v23, %v937_v23  ;;  %2634 = vmatpush.bf16.msrb.mxu2 %v3970_v25  ;;  %2585 = vmatpush.bf16.msrb.mxu1 %v3962_v27  ;;  %v898_v41 = vadd.f32 %v4415_v2, %v864_v28  ;;  %v4553_v14 = vrot.slane %v389_v5, 7  ;;  %v631_v23 = vld [vmem:[#allocation2 + $0xc] sm:$0x2]  ;;  %v3272_v27 = vrot.slane %v637_v13, 9 }
  0x3c   : > { %1424 = vst [vmem:[#allocation3 + $0x3c] sm:$0xf] %v4465_v46  ;;  %v4522_v43 = vpack.c.bf16 %v938_v29, %v938_v29  ;;  %2683 = vmatpush.bf16.msrb.mxu3 %v3978_v30  ;;  %v899_v44 = vadd.f32 %v4415_v2, %v865_v31  ;;  %v919_v45 = vmax.f32 %v889_v32, 0.0  ;;  %2732 = vmatpush.bf16.msrb.mxu0 %v3986_v33  ;;  %v920_v49 = vmax.f32 %v890_v36, 0.0  ;;  %v683_v31 = vld [vmem:[#allocation2 + $0xc] sm:$0x1] }
  0x3d   : > { %987 = vst [vmem:[#allocation3 + $0x120] sm:$0xf] %v4487_v11  ;;  %v870_v47 = vmul.f32 %v4406_v56, %v836_v34  ;;  %v871_v50 = vmul.f32 %v4406_v56, %v837_v37  ;;  %v928_v51 = vmax.f32 %v898_v41, 0.0  ;;  %v387_v28 = vrot.slane %v4422_v10, 4  ;;  %v358_v32 = vld [vmem:[#allocation2 + $0x8] sm:$0x1] }
  0x3e   : > { %v3369_v35 = vld [vmem:[#allocation3 + $0x90] sm:$0xf]  ;;  %988 = vst [vmem:[#allocation3 + $0x144] sm:$0xf] %v4494_v17  ;;  %v929_v53 = vmax.f32 %v899_v44, 0.0  ;;  %v4532_v55 = vpack.c.bf16 %v919_v45, %v919_v45  ;;  %v4536_v60 = vpack.c.bf16 %v920_v49, %v920_v49  ;;  %v394_v30 = vor.u32 %v392_v16, %v4553_v14  ;;  %v3969_v10 = vld [vmem:[%s5178_s1 + $0x98] sm:$0xff] }
  0x3f   : > { %v3900_v39 = vld [vmem:[#allocation3 + $0xb0] sm:$0xf0]  ;;  %1343 = vst [vmem:[#allocation3 + $0xe4] sm:$0xf] %v4487_v11  ;;  %v904_v57 = vadd.f32 %v4415_v2, %v870_v47  ;;  %v905_v62 = vadd.f32 %v4415_v2, %v871_v50  ;;  %v4541_v1 = vpack.c.bf16 %v928_v51, %v928_v51  ;;  %v345_v33 = vrot.slane %v4354_v63, 4  ;;  %2635 = vmatpush.bf16.msrb.mxu2 %v3969_v10  ;;  %v3985_v5 = vld [vmem:[%s5178_s1 + $0x118] sm:$0xff] }
  0x40   : > { %v3370_v42 = vor.u32 %v3900_v39, %v3369_v35  ;;  %1344 = vst [vmem:[#allocation3 + $0x108] sm:$0xf] %v4494_v17  ;;  %v4544_v3 = vpack.c.bf16 %v929_v53, %v929_v53  ;;  %v3266_v36 = vrot.slane %v631_v23, 9  ;;  %v3961_v39 = vld [vmem:[%s5178_s1 + $0x58] sm:$0xff]  ;;  %v702_v63 = vsel %vm4367_vm7, %v3272_v27, %v701_v21  ;;  %v545_v51 = vld [vmem:[#allocation2 + $0x14] sm:$0x1]  ;;  %2733 = vmatpush.bf16.msrb.mxu0 %v3985_v5 }
  0x41   : > { %1427 = vst [vmem:[#allocation3 + $0xa8] sm:$0xf] %v4487_v11  ;;  %v934_v4 = vmax.f32 %v904_v57, 0.0  ;;  %v935_v7 = vmax.f32 %v905_v62, 0.0  ;;  %2586 = vmatpush.bf16.msrb.mxu1 %v3961_v39  ;;  %v395_v44 = vsel %vm4306_vm4, %v387_v28, %v394_v30  ;;  %v999_v45 = vshrl.u32 %v4532_v55, 16  ;;  %v3976_v13 = vld [vmem:[%s5178_s1 + $0xd0] sm:$0xff] }
  0x42   : > { %2551 = vmatmul.bf16.vlgmr.msra.gmra.mxu1 %v3370_v42  ;;  %1428 = vst [vmem:[#allocation3 + $0xcc] sm:$0xf] %v4494_v17  ;;  %v3977_v42 = vld [vmem:[%s5178_s1 + $0xd8] sm:$0xff]  ;;  %v1002_v47 = vshll.u32 %v4532_v55, 16  ;;  %v684_v49 = vsel %vm4367_vm7, %v3266_v36, %v683_v31  ;;  %v359_v50 = vsel %vm4367_vm7, %v345_v33, %v358_v32  ;;  %v396_v57 = vrot.slane %v4553_v14, 4  ;;  %v3984_v14 = vld [vmem:[%s5178_s1 + $0x110] sm:$0xff] }
  0x43   : > { %991 = vst [vmem:[#allocation3 + $0x1b0] sm:$0xf] %v4518_v40  ;;  %v4551_v12 = vpack.c.bf16 %v934_v4, %v934_v4  ;;  %v4556_v19 = vpack.c.bf16 %v935_v7, %v935_v7  ;;  %2684 = vmatpush.bf16.msrb.mxu3 %v3977_v42  ;;  %v1001_v53 = vrot.slane %v999_v45, 4  ;;  %v1008_v7 = vshll.u32 %v4536_v60, 16  ;;  %v3959_v23 = vld [vmem:[%s5178_s1 + $0x48] sm:$0xff] }
  0x44   : > { %v3441_v52 = vld [vmem:[#allocation3 + $0x120] sm:$0xf]  ;;  %992 = vst [vmem:[#allocation3 + $0x1d4] sm:$0xf] %v4522_v43  ;;  %v546_v21 = vsel %vm4367_vm7, %v396_v57, %v545_v51  ;;  %v3967_v28 = vld [vmem:[%s5178_s1 + $0x88] sm:$0xff]  ;;  %v3285_v32 = vrot.slane %v4532_v55, 9  ;;  %2734 = vmatpush.bf16.msrb.mxu0 %v3984_v14 }
  0x45   : > { %v3918_v54 = vld [vmem:[#allocation3 + $0x140] sm:$0xf0]  ;;  %1347 = vst [vmem:[#allocation3 + $0x174] sm:$0xf] %v4518_v40  ;;  %v4628_v31 = vrot.slane %v1008_v7, 5  ;;  %v1251_v36 = vrot.slane %v4536_v60, 5 }
  0x46   : > { %v3442_v59 = vor.u32 %v3918_v54, %v3441_v52  ;;  %1348 = vst [vmem:[#allocation3 + $0x198] sm:$0xf] %v4522_v43  ;;  %v4588_v52 = vld [vmem:[#allocation2 + $0x4] sm:$0x8]  ;;  %v1004_v54 = vrot.slane %v1002_v47, 5  ;;  %v4005_v14 = vld [vmem:[%s5178_s1 + $0x1b8] sm:$0xff] }
  0x47   : > { %1431 = vst [vmem:[#allocation3 + $0x138] sm:$0xf] %v4518_v40  ;;  %2685 = vmatpush.bf16.msrb.mxu3 %v3976_v13  ;;  %v559_v42 = vld [vmem:[#allocation2 + $0x2c] sm:$0x1]  ;;  %v1252_v45 = vsel %vm4644_vm14, %v3285_v32, %v1251_v36  ;;  %v3982_v7 = vld [vmem:[%s5178_s1 + $0x100] sm:$0xff]  ;;  %v1047_v32 = vshrl.u32 %v4463_v58, 16 }
  0x48   : > { %2561 = vmatmul.bf16.vlgmr.msra.gmra.mxu2 %v3442_v59  ;;  %1432 = vst [vmem:[#allocation3 + $0x15c] sm:$0xf] %v4522_v43  ;;  %v413_v59 = vrot.slane %v4310_v20, 4  ;;  %v3960_v20 = vld [vmem:[%s5178_s1 + $0x50] sm:$0xff] }
  0x49   : > { %979 = vst [vmem:[#allocation3] sm:$0xf] %v4532_v55  ;;  %2587 = vmatpush.bf16.msrb.mxu1 %v3960_v20 }
  0x4a   : > { %v3513_v6 = vld [vmem:[#allocation3 + $0x1b0] sm:$0xf]  ;;  %980 = vst [vmem:[#allocation3 + $0x24] sm:$0xf] %v4536_v60  ;;  %v553_v27 = vsel %vm4367_vm7, %v413_v59, %v552_v0 }
  0x4b   : > { %v3936_v8 = vld [vmem:[#allocation3 + $0x1d0] sm:$0xf0]  ;;  %985 = vst [vmem:[#allocation3 + $0xd8] sm:$0xf] %v4541_v1 }
  0x4c   : > { %v3514_v9 = vor.u32 %v3936_v8, %v3513_v6  ;;  %986 = vst [vmem:[#allocation3 + $0xfc] sm:$0xf] %v4544_v3  ;;  %v1005_v6 = vor.u32 %v1004_v54, %v1001_v53  ;;  %v3966_v53 = vld [vmem:[%s5178_s1 + $0x80] sm:$0xff] }
  0x4d   : > { %1341 = vst [vmem:[#allocation3 + $0x9c] sm:$0xf] %v4541_v1  ;;  %2588 = vmatpush.bf16.msrb.mxu1 %v3959_v23  ;;  %v3974_v54 = vld [vmem:[%s5178_s1 + $0xc0] sm:$0xff] }
  0x4e   : > { %2571 = vmatmul.bf16.vlgmr.msra.gmra.mxu3 %v3514_v9  ;;  %1342 = vst [vmem:[#allocation3 + $0xc0] sm:$0xf] %v4544_v3  ;;  %v3968_v9 = vld [vmem:[%s5178_s1 + $0x90] sm:$0xff]  ;;  %v1006_v16 = vrot.slane %v1005_v6, 4 }
  0x4f   : > { %1425 = vst [vmem:[#allocation3 + $0x60] sm:$0xf] %v4541_v1  ;;  %2636 = vmatpush.bf16.msrb.mxu2 %v3968_v9 }
  0x50   : > { %v3297_v25 = vld [vmem:[#allocation3] sm:$0xf]  ;;  %1426 = vst [vmem:[#allocation3 + $0x84] sm:$0xf] %v4544_v3  ;;  %v1011_v55 = vsel %vm4635_vm13, %v1006_v16, %v4628_v31 }
  0x51   : > { %v3882_v29 = vld [vmem:[#allocation3 + $0x20] sm:$0xf0]  ;;  %989 = vst [vmem:[#allocation3 + $0x168] sm:$0xf] %v4551_v12 }
  0x52   : > { %v3298_v34 = vor.u32 %v3882_v29, %v3297_v25  ;;  %v3405_v35 = vld [vmem:[#allocation3 + $0xd8] sm:$0xf]  ;;  %990 = vst [vmem:[#allocation3 + $0x18c] sm:$0xf] %v4556_v19  ;;  %v3275_v25 = vrot.slane %v4588_v52, 11  ;;  %v3975_v29 = vld [vmem:[%s5178_s1 + $0xc8] sm:$0xff] }
  0x53   : > { %v3909_v37 = vld [vmem:[#allocation3 + $0xf8] sm:$0xf0]  ;;  %1345 = vst [vmem:[#allocation3 + $0x12c] sm:$0xf] %v4551_v12  ;;  %2637 = vmatpush.bf16.msrb.mxu2 %v3967_v28  ;;  %2686 = vmatpush.bf16.msrb.mxu3 %v3975_v29 }
  0x54   : > { %2541 = vmatmul.bf16.vlgmr.msra.gmra.mxu0 %v3298_v34  ;;  %v3406_v41 = vor.u32 %v3909_v37, %v3405_v35  ;;  %1346 = vst [vmem:[#allocation3 + $0x150] sm:$0xf] %v4556_v19  ;;  %v3983_v34 = vld [vmem:[%s5178_s1 + $0x108] sm:$0xff]  ;;  %v430_v37 = vrot.slane %v4375_v22, 4  ;;  %v3958_v22 = vld [vmem:[%s5178_s1 + $0x40] sm:$0xff] }
  0x55   : > { %1429 = vst [vmem:[#allocation3 + $0xf0] sm:$0xf] %v4551_v12  ;;  %2735 = vmatpush.bf16.msrb.mxu0 %v3983_v34  ;;  %2589 = vmatpush.bf16.msrb.mxu1 %v3958_v22  ;;  %v712_v34 = vld [vmem:[#allocation2 + $0x1c] sm:$0x8] }
  0x56   : > { %2556 = vmatmul.bf16.gmra.mxu1 %v3406_v41  ;;  %1430 = vst [vmem:[#allocation3 + $0x114] sm:$0xf] %v4556_v19  ;;  %v560_v47 = vsel %vm4367_vm7, %v430_v37, %v559_v42  ;;  %v1050_v37 = vshll.u32 %v4463_v58, 16  ;;  %v4021_v42 = vld [vmem:[%s5178_s1 + $0x238] sm:$0xff] }
  0x57   : > { %703 = vst [vmem:[#allocation2 + $0x54] sm:$0x1] %v702_v63  ;;  %2638 = vmatpush.bf16.msrb.mxu2 %v3966_v53  ;;  %2687 = vmatpush.bf16.msrb.mxu3 %v3974_v54 }
  0x58   : > { %v3477_v62 = vld [vmem:[#allocation3 + $0x168] sm:$0xf]  ;;  %544 = vst [vmem:[#allocation2 + $0x10] sm:$0xf] %v395_v44 }
  0x59   : > { %v3927_v4 = vld [vmem:[#allocation3 + $0x188] sm:$0xf0]  ;;  %685 = vst [vmem:[#allocation2 + $0xc] sm:$0x1] %v684_v49  ;;  %2736 = vmatpush.bf16.msrb.mxu0 %v3982_v7 }
  0x5a   : > { %v3478_v8 = vor.u32 %v3927_v4, %v3477_v62  ;;  %360 = vst [vmem:[#allocation2 + $0x8] sm:$0x1] %v359_v50 }
  0x5b   : > { %547 = vst [vmem:[#allocation2 + $0x14] sm:$0x1] %v546_v21  ;;  %v1012_v21 = vshrl.u32 %v4536_v60, 16  ;;  %2827 = vmatpush.bf16.msra.mxu2 %v4005_v14 }
  0x5c   : > { %2566 = vmatmul.bf16.gmra.mxu2 %v3478_v8  ;;  %554 = vst [vmem:[#allocation2 + $0x20] sm:$0x1] %v553_v27 }
  0x5d   : > { %1206 = vst [vmem:[#allocation3 + $0x4] sm:$0xf] %v1011_v55  ;;  %v4013_v55 = vld [vmem:[%s5178_s1 + $0x1f8] sm:$0xff]  ;;  %2925 = vmatpush.bf16.msra.mxu0 %v4021_v42 }
  0x5e   : > { %v812_v33 = vld [vmem:[#allocation2 + $0x54] sm:$0xff]   ;;  %1321 = vst [vmem:[#allocation3 + $0x8] sm:$0xf] %v1252_v45  ;;  %2876 = vmatpush.bf16.msra.mxu3 %v4013_v55 }
  0x5f   : > { %v842_v10 = vunpack.c.l.bf16 %v812_v33  ;;  %v843_v39 = vunpack.c.h.bf16 %v812_v33  ;;  %v711_v63 = vld [vmem:[#allocation2 + $0x10] sm:$0x8]  ;;  %561 = vst [vmem:[#allocation2 + $0x2c] sm:$0x1] %v560_v47 }
  0x60   : > { %v794_v44 = vld [vmem:[#allocation2 + $0xc] sm:$0xff]   ;;  %v3276_v62 = vrot.slane %v711_v63, 11  ;;  %v3997_v63 = vld [vmem:[%s5178_s1 + $0x178] sm:$0xff] }
  0x61   : > { %v876_v49 = vmul.f32 %v4406_v56, %v842_v10  ;;  %v877_v50 = vmul.f32 %v4406_v56, %v843_v39  ;;  %v824_v51 = vunpack.c.l.bf16 %v794_v44  ;;  %v825_v52 = vunpack.c.h.bf16 %v794_v44  ;;  %v761_v57 = vld [vmem:[#allocation2 + $0x8] sm:$0x1]  ;;  %2778 = vmatpush.bf16.msra.mxu1 %v3997_v63 }
  0x62   : > { %v762_v59 = vsel %vm4624_vm10, %v3275_v25, %v761_v57  ;;  %v764_v16 = vld [vmem:[#allocation2 + $0x14] sm:$0x1]  ;;  %v1014_v39 = vrot.slane %v1012_v21, 4  ;;  %v1052_v57 = vrot.slane %v1050_v37, 5 }
  0x63   : > { %v910_v0 = vadd.f32 %v4415_v2, %v876_v49  ;;  %v911_v4 = vadd.f32 %v4415_v2, %v877_v50  ;;  %v858_v5 = vmul.f32 %v4406_v56, %v824_v51  ;;  %v859_v6 = vmul.f32 %v4406_v56, %v825_v52  ;;  %763 = vst [vmem:[#allocation2 + $0x8] sm:$0x1] %v762_v59 }
  0x64   : > { %v765_v23 = vsel %vm4624_vm10, %v3276_v62, %v764_v16  ;;  %v1049_v51 = vrot.slane %v1047_v32, 4 }
  0x65   : > { %v940_v8 = vmax.f32 %v910_v0, 0.0  ;;  %v941_v9 = vmax.f32 %v911_v4, 0.0  ;;  %v892_v20 = vadd.f32 %v4415_v2, %v858_v5  ;;  %v893_v13 = vadd.f32 %v4415_v2, %v859_v6  ;;  %766 = vst [vmem:[#allocation2 + $0x14] sm:$0x1] %v765_v23 }
  0x66   : > { %v3277_v4 = vrot.slane %v712_v34, 11  ;;  %v1015_v5 = vor.u32 %v1014_v39, %v4628_v31  ;;  %v1053_v21 = vor.u32 %v1052_v57, %v1049_v51 }
  0x67   : > { %v4682_v25 = vpack.c.bf16 %v940_v8, %v940_v8  ;;  %v4684_v27 = vpack.c.bf16 %v941_v9, %v941_v9  ;;  %v922_v28 = vmax.f32 %v892_v20, 0.0  ;;  %v923_v29 = vmax.f32 %v893_v13, 0.0  ;;  %v767_v8 = vld [vmem:[#allocation2 + $0x20] sm:$0x1] }
  0x68   : > { %v1056_v9 = vshll.u32 %v4465_v46, 16  ;;  %v1054_v37 = vrot.slane %v1053_v21, 4  ;;  %v3305_v21 = vld [vmem:[#allocation3 + $0x8] sm:$0xf] }
  0x69   : > { %993 = vst [vmem:[#allocation3 + $0x1f8] sm:$0xf] %v4682_v25  ;;  %v952_v33 = vpack.c.bf16 %v922_v28, %v922_v28  ;;  %v4690_v10 = vpack.c.bf16 %v923_v29, %v923_v29 }
  0x6a   : > { %994 = vst [vmem:[#allocation3 + $0x21c] sm:$0xf] %v4684_v27  ;;  %v793_v44 = vld [vmem:[#allocation2 + $0x8] sm:$0x1]  ;;  %v4720_v63 = vrot.slane %v1056_v9, 5 }
  0x6b   : > { %1349 = vst [vmem:[#allocation3 + $0x1bc] sm:$0xf] %v4682_v25  ;;  %v1023_v22 = vshrl.u32 %v952_v33, 16  ;;  %v1026_v45 = vshll.u32 %v952_v33, 16  ;;  %v823_v47 = vunpack.c.l.bf16 %v793_v44  ;;  %v1032_v49 = vshll.u32 %v4690_v10, 16 }
  0x6c   : > { %1350 = vst [vmem:[#allocation3 + $0x1e0] sm:$0xf] %v4684_v27  ;;  %v3286_v50 = vrot.slane %v952_v33, 9  ;;  %v1036_v54 = vshrl.u32 %v4690_v10, 16  ;;  %v796_v62 = vld [vmem:[#allocation2 + $0x14] sm:$0x1] }
  0x6d   : > { %1433 = vst [vmem:[#allocation3 + $0x180] sm:$0xf] %v4682_v25  ;;  %v1025_v52 = vrot.slane %v1023_v22, 4  ;;  %v1028_v53 = vrot.slane %v1026_v45, 5  ;;  %v857_v59 = vmul.f32 %v4406_v56, %v823_v47  ;;  %v1258_v0 = vrot.slane %v4690_v10, 5  ;;  %v4004_v47 = vld [vmem:[%s5178_s1 + $0x1b0] sm:$0xff] }
  0x6e   : > { %1434 = vst [vmem:[#allocation3 + $0x1a4] sm:$0xf] %v4684_v27  ;;  %v826_v6 = vunpack.c.l.bf16 %v796_v62  ;;  %v1034_v14 = vrot.slane %v1032_v49, 5  ;;  %v1038_v29 = vrot.slane %v1036_v54, 4  ;;  %v1253_v44 = vrot.slane %v1251_v36, 4  ;;  %2828 = vmatpush.bf16.msra.mxu2 %v4004_v47 }
  0x6f   : > { %981 = vst [vmem:[#allocation3 + $0x48] sm:$0xf] %v952_v33  ;;  %v1029_v7 = vor.u32 %v1028_v53, %v1025_v52  ;;  %v891_v13 = vadd.f32 %v4415_v2, %v857_v59  ;;  %v1259_v16 = vsel %vm4644_vm14, %v3286_v50, %v1258_v0  ;;  %v1059_v49 = vsel %vm4635_vm13, %v1054_v37, %v4720_v63  ;;  %v713_v50 = vld [vmem:[#allocation2 + $0x28] sm:$0x8] }
  0x70   : > { %v3549_v20 = vld [vmem:[#allocation3 + $0x1f8] sm:$0xf]  ;;  %982 = vst [vmem:[#allocation3 + $0x6c] sm:$0xf] %v4690_v10  ;;  %v860_v28 = vmul.f32 %v4406_v56, %v826_v6  ;;  %v1039_v45 = vor.u32 %v1038_v29, %v1034_v14  ;;  %v1260_v54 = vrot.slane %v1258_v0, 4  ;;  %v3278_v9 = vrot.slane %v713_v50, 11 }
  0x71   : > { %v3945_v23 = vld [vmem:[#allocation3 + $0x218] sm:$0xf0]  ;;  %1337 = vst [vmem:[#allocation3 + $0xc] sm:$0xf] %v952_v33  ;;  %v1030_v31 = vrot.slane %v1029_v7, 4  ;;  %v921_v34 = vmax.f32 %v891_v13, 0.0 }
  0x72   : > { %v3550_v32 = vor.u32 %v3945_v23, %v3549_v20  ;;  %1338 = vst [vmem:[#allocation3 + $0x30] sm:$0xf] %v4690_v10  ;;  %v894_v39 = vadd.f32 %v4415_v2, %v860_v28  ;;  %v1016_v33 = vrot.slane %v1015_v5, 4  ;;  %v768_v10 = vsel %vm4624_vm10, %v3277_v4, %v767_v8  ;;  %v4012_v0 = vld [vmem:[%s5178_s1 + $0x1f0] sm:$0xff] }
  0x73   : > { %v1035_v55 = vsel %vm4635_vm13, %v1030_v31, %v1034_v14  ;;  %1323 = vst [vmem:[#allocation3 + $0x50] sm:$0xf] %v1259_v16  ;;  %v951_v42 = vpack.c.bf16 %v921_v34, %v921_v34  ;;  %v1040_v4 = vrot.slane %v1039_v45, 4  ;;  %v1060_v8 = vshrl.u32 %v4465_v46, 16  ;;  %2877 = vmatpush.bf16.msra.mxu3 %v4012_v0  ;;  %v4020_v28 = vld [vmem:[%s5178_s1 + $0x230] sm:$0xff] }
  0x74   : > { %2576 = vmatmul.bf16.gmra.mxu3 %v3550_v32  ;;  %1379 = vst [vmem:[#allocation3 + $0x10] sm:$0xf] %v1035_v55  ;;  %v924_v22 = vmax.f32 %v894_v39, 0.0  ;;  %v3287_v31 = vrot.slane %v4463_v58, 9  ;;  %v1265_v32 = vrot.slane %v4465_v46, 5  ;;  %v1071_v34 = vshrl.u32 %v4541_v1, 16  ;;  %2926 = vmatpush.bf16.msra.mxu0 %v4020_v28 }
  0x75   : > { %1208 = vst [vmem:[#allocation3 + $0x4c] sm:$0xf] %v1035_v55  ;;  %v1018_v52 = vshll.u32 %v951_v42, 16  ;;  %v1254_v60 = vrot.slane %v951_v42, 5  ;;  %v1074_v37 = vshll.u32 %v4541_v1, 16  ;;  %v1080_v47 = vshll.u32 %v4544_v3, 16 }
  0x76   : > { %v3333_v51 = vld [vmem:[#allocation3 + $0x48] sm:$0xf]  ;;  %1407 = vst [vmem:[#allocation3 + $0x14] sm:$0xf] %v1259_v16  ;;  %v954_v53 = vpack.c.bf16 %v924_v22, %v924_v22  ;;  %v3996_v16 = vld [vmem:[%s5178_s1 + $0x170] sm:$0xff]  ;;  %v1266_v58 = vsel %vm4644_vm14, %v3287_v31, %v1265_v32  ;;  %v1084_v28 = vshrl.u32 %v4544_v3, 16 }
  0x77   : > { %v3891_v36 = vld [vmem:[#allocation3 + $0x68] sm:$0xf0]  ;;  %769 = vst [vmem:[#allocation2 + $0x20] sm:$0x1] %v768_v10  ;;  %v1020_v59 = vrot.slane %v1018_v52, 5  ;;  %v1255_v62 = vsel %vm4644_vm14, %v1253_v44, %v1254_v60  ;;  %2779 = vmatpush.bf16.msra.mxu1 %v3996_v16  ;;  %v1062_v44 = vrot.slane %v1060_v8, 4 }
  0x78   : > { %v3334_v57 = vor.u32 %v3891_v36, %v3333_v51  ;;  %1381 = vst [vmem:[#allocation3 + $0x58] sm:$0xf] %v1059_v49  ;;  %v1042_v5 = vshll.u32 %v954_v53, 16  ;;  %v1261_v6 = vrot.slane %v954_v53, 5  ;;  %v3879_v20 = vld [vmem:[#allocation3 + $0xc] sm:$0xf] }
  0x79   : > { %1322 = vst [vmem:[#allocation3 + $0x2c] sm:$0xf] %v1255_v62  ;;  %v1021_v7 = vsel %vm4635_vm13, %v1016_v33, %v1020_v59  ;;  %v3307_v23 = vld [vmem:[#allocation3 + $0x2c] sm:$0xf0]  ;;  %v770_v55 = vld [vmem:[#allocation2 + $0x2c] sm:$0x1]  ;;  %v1063_v59 = vor.u32 %v1062_v44, %v4720_v63 }
  0x7a   : > { %2546 = vmatmul.bf16.gmra.mxu0 %v3334_v57  ;;  %1465 = vst [vmem:[#allocation3 + $0x1c] sm:$0xf] %v1059_v49  ;;  %v1044_v13 = vrot.slane %v1042_v5, 5  ;;  %v1262_v14 = vsel %vm4644_vm14, %v1260_v54, %v1261_v6  ;;  %v3878_v42 = vld [vmem:[#allocation3 + $0x4] sm:$0xf]  ;;  %v1073_v10 = vrot.slane %v1071_v34, 4  ;;  %v3310_v45 = vor.u32 %v3879_v20, %v3307_v23 }
  0x7b   : > { %1207 = vst [vmem:[#allocation3 + $0x28] sm:$0xf] %v1021_v7  ;;  %v1076_v46 = vrot.slane %v1074_v37, 5  ;;  %v771_v52 = vsel %vm4624_vm10, %v3278_v9, %v770_v55  ;;  %v3313_v54 = vld [vmem:[#allocation3 + $0x10] sm:$0xf]  ;;  %v1267_v20 = vrot.slane %v1265_v32, 4 }
  0x7c   : > { %1324 = vst [vmem:[#allocation3 + $0x74] sm:$0xf] %v1262_v14  ;;  %v1045_v29 = vsel %vm4635_vm13, %v1040_v4, %v1044_v13  ;;  %v4763_v4 = vrot.slane %v1080_v47, 5  ;;  %v566_v5 = vld [vmem:[#allocation2 + $0x38] sm:$0x1]  ;;  %v4003_v8 = vld [vmem:[%s5178_s1 + $0x1a8] sm:$0xff] }
  0x7d   : > { %1408 = vst [vmem:[#allocation3 + $0x38] sm:$0xf] %v1262_v14  ;;  %v1077_v36 = vor.u32 %v1076_v46, %v1073_v10  ;;  %2829 = vmatpush.bf16.msra.mxu2 %v4003_v8  ;;  %v1095_v13 = vshrl.u32 %v4487_v11, 16  ;;  %v1064_v14 = vrot.slane %v1063_v59, 4  ;;  %v1098_v16 = vshll.u32 %v4487_v11, 16  ;;  %v4011_v32 = vld [vmem:[%s5178_s1 + $0x1e8] sm:$0xff] }
  0x7e   : > { %1380 = vst [vmem:[#allocation3 + $0x34] sm:$0xf] %v1045_v29  ;;  %v799_v39 = vld [vmem:[#allocation2 + $0x20] sm:$0x1]  ;;  %v3995_v34 = vld [vmem:[%s5178_s1 + $0x168] sm:$0xff]  ;;  %v1272_v10 = vrot.slane %v4544_v3, 5  ;;  %2878 = vmatpush.bf16.msra.mxu3 %v4011_v32 }
  0x7f   : > { %1209 = vst [vmem:[#allocation3 + $0x70] sm:$0xf] %v1045_v29  ;;  %v829_v33 = vunpack.c.l.bf16 %v799_v39  ;;  %v1078_v62 = vrot.slane %v1077_v36, 4  ;;  %v1097_v31 = vrot.slane %v1095_v13, 4  ;;  %v3341_v29 = vld [vmem:[#allocation3 + $0x50] sm:$0xf]  ;;  %2780 = vmatpush.bf16.msra.mxu1 %v3995_v34 }
  0x80   : > { %v3883_v22 = vld [vmem:[#allocation3 + $0x28] sm:$0xf0]  ;;  %1210 = vst [vmem:[#allocation3 + $0x94] sm:$0xf] %v1059_v49  ;;  %v447_v49 = vrot.slane %v4319_v26, 4  ;;  %v4019_v37 = vld [vmem:[%s5178_s1 + $0x228] sm:$0xff] }
  0x81   : > { %v3306_v50 = vor.u32 %v3883_v22, %v3305_v21  ;;  %v863_v51 = vmul.f32 %v4406_v56, %v829_v33  ;;  %1325 = vst [vmem:[#allocation3 + $0x98] sm:$0xf] %v1266_v58  ;;  %v1083_v26 = vsel %vm4635_vm13, %v1078_v62, %v4763_v4  ;;  %v1100_v39 = vrot.slane %v1098_v16, 5  ;;  %v3888_v55 = vld [vmem:[#allocation3 + $0x54] sm:$0xf]  ;;  %2927 = vmatpush.bf16.msra.mxu0 %v4019_v37  ;;  %v4010_v32 = vld [vmem:[%s5178_s1 + $0x1e0] sm:$0xff] }
  0x82   : > { %v3299_v60 = vld [vmem:[#allocation3 + $0x24] sm:$0xf0]  ;;  %1493 = vst [vmem:[#allocation3 + $0x20] sm:$0xf] %v1266_v58  ;;  %v567_v63 = vsel %vm4367_vm7, %v447_v49, %v566_v5  ;;  %v714_v46 = vld [vmem:[#allocation2 + $0x34] sm:$0x8]  ;;  %2879 = vmatpush.bf16.msra.mxu3 %v4010_v32 }
  0x83   : > { %v3302_v53 = vor.u32 %v3878_v42, %v3299_v60  ;;  %2639 = vmatmul.bf16.vlgmr.msrb.gmra.mxu2 %v3306_v50  ;;  %v897_v57 = vadd.f32 %v4415_v2, %v863_v51  ;;  %1409 = vst [vmem:[#allocation3 + $0x5c] sm:$0xf] %v1266_v58  ;;  %v3288_v58 = vrot.slane %v4541_v1, 9  ;;  %v3892_v22 = vld [vmem:[#allocation3 + $0x70] sm:$0xf0]  ;;  %v1101_v47 = vor.u32 %v1100_v39, %v1097_v31  ;;  %v3994_v34 = vld [vmem:[%s5178_s1 + $0x160] sm:$0xff] }
  0x84   : > { %2688 = vmatmul.bf16.vlgmr.msrb.gmra.mxu3 %v3310_v45  ;;  %772 = vst [vmem:[#allocation2 + $0x2c] sm:$0x1] %v771_v52  ;;  %v3887_v50 = vld [vmem:[#allocation3 + $0x4c] sm:$0xf]  ;;  %v3343_v51 = vld [vmem:[#allocation3 + $0x74] sm:$0xf0]  ;;  %2781 = vmatpush.bf16.msra.mxu1 %v3994_v34 }
  0x85   : > { %2590 = vmatmul.bf16.vlgmr.msrb.gmra.mxu1 %v3302_v53  ;;  %v3884_v6 = vld [vmem:[#allocation3 + $0x30] sm:$0xf0]  ;;  %v927_v7 = vmax.f32 %v897_v57, 0.0  ;;  %1383 = vst [vmem:[#allocation3 + $0xa0] sm:$0xf] %v1083_v26  ;;  %v1273_v60 = vsel %vm4644_vm14, %v3288_v58, %v1272_v10  ;;  %v1086_v36 = vrot.slane %v1084_v28, 4  ;;  %v3346_v49 = vor.u32 %v3888_v55, %v3343_v51 }
  0x86   : > { %v3314_v0 = vor.u32 %v3884_v6, %v3313_v54  ;;  %1212 = vst [vmem:[#allocation3 + $0xdc] sm:$0xf] %v1083_v26  ;;  %v3335_v1 = vld [vmem:[#allocation3 + $0x6c] sm:$0xf0]  ;;  %v1104_v53 = vshll.u32 %v4494_v17, 16  ;;  %v3342_v54 = vor.u32 %v3892_v22, %v3341_v29  ;;  %v3279_v57 = vrot.slane %v714_v46, 11 }
  0x87   : > { %v957_v9 = vpack.c.bf16 %v927_v7, %v927_v7  ;;  %1467 = vst [vmem:[#allocation3 + $0x64] sm:$0xf] %v1083_v26  ;;  %v1102_v62 = vrot.slane %v1101_v47, 4  ;;  %v3338_v5 = vor.u32 %v3887_v50, %v3335_v1  ;;  %v1087_v8 = vor.u32 %v1086_v36, %v4763_v4  ;;  %v4018_v37 = vld [vmem:[%s5178_s1 + $0x220] sm:$0xff]  ;;  %v3896_v55 = vld [vmem:[#allocation3 + $0x94] sm:$0xf] }
  0x88   : > { %568 = vst [vmem:[#allocation2 + $0x38] sm:$0x1] %v567_v63  ;;  %v3377_v31 = vld [vmem:[#allocation3 + $0x98] sm:$0xf]  ;;  %v573_v39 = vld [vmem:[#allocation2 + $0x44] sm:$0x1]  ;;  %2928 = vmatpush.bf16.msra.mxu0 %v4018_v37 }
  0x89   : > { %v1066_v21 = vshll.u32 %v957_v9, 16  ;;  %v1268_v23 = vrot.slane %v957_v9, 5  ;;  %1327 = vst [vmem:[#allocation3 + $0xe0] sm:$0xf] %v1273_v60  ;;  %v1088_v13 = vrot.slane %v1087_v8, 4  ;;  %v3289_v58 = vrot.slane %v4487_v11, 9 }
  0x8a   : > { %2737 = vmatmul.bf16.vlgmr.msrb.gmra.mxu0 %v3314_v0  ;;  %v4797_v0 = vrot.slane %v1104_v53, 5  ;;  %1411 = vst [vmem:[#allocation3 + $0xa4] sm:$0xf] %v1273_v60  ;;  %v464_v22 = vrot.slane %v4396_v48, 4  ;;  %v481_v51 = vrot.slane %v4327_v38, 4  ;;  %v1122_v1 = vshll.u32 %v4551_v12, 16 }
  0x8b   : > { %v1068_v42 = vrot.slane %v1066_v21, 5  ;;  %v1269_v33 = vsel %vm4644_vm14, %v1267_v20, %v1268_v23  ;;  %v802_v44 = vld [vmem:[#allocation2 + $0x2c] sm:$0x1]  ;;  %v1274_v20 = vrot.slane %v1272_v10, 4  ;;  %1495 = vst [vmem:[#allocation3 + $0x68] sm:$0xf] %v1273_v60 }
  0x8c   : > { %1326 = vst [vmem:[#allocation3 + $0xbc] sm:$0xf] %v1269_v33  ;;  %v832_v45 = vunpack.c.l.bf16 %v802_v44  ;;  %v4002_v21 = vld [vmem:[%s5178_s1 + $0x1a0] sm:$0xff]  ;;  %v1108_v44 = vshrl.u32 %v4494_v17, 16  ;;  %v1279_v10 = vrot.slane %v4494_v17, 5  ;;  %v574_v48 = vsel %vm4367_vm7, %v464_v22, %v573_v39 }
  0x8d   : > { %v1069_v52 = vsel %vm4635_vm13, %v1064_v14, %v1068_v42  ;;  %1494 = vst [vmem:[#allocation3 + $0x44] sm:$0xf] %v1269_v33  ;;  %2830 = vmatpush.bf16.msra.mxu2 %v4002_v21  ;;  %v3897_v42 = vld [vmem:[#allocation3 + $0x9c] sm:$0xf]  ;;  %v580_v11 = vld [vmem:[#allocation2 + $0x50] sm:$0x1] }
  0x8e   : > { %1382 = vst [vmem:[#allocation3 + $0x7c] sm:$0xf] %v1069_v52  ;;  %v866_v3 = vmul.f32 %v4406_v56, %v832_v45  ;;  %v3349_v56 = vld [vmem:[#allocation3 + $0x58] sm:$0xf]  ;;  %v1280_v50 = vsel %vm4644_vm14, %v3289_v58, %v1279_v10  ;;  %v1119_v17 = vshrl.u32 %v4551_v12, 16 }
  0x8f   : > { %1466 = vst [vmem:[#allocation3 + $0x40] sm:$0xf] %v1069_v52  ;;  %v773_v6 = vld [vmem:[#allocation2 + $0x38] sm:$0x1]  ;;  %v4834_v53 = vld [vmem:[%s5179_s2] ss:$0 sm:$0xff] }
  0x90   : > { %1211 = vst [vmem:[#allocation3 + $0xb8] sm:$0xf] %v1069_v52  ;;  %v900_v59 = vadd.f32 %v4415_v2, %v866_v3  ;;  %v774_v26 = vsel %vm4624_vm10, %v3279_v57, %v773_v6  ;;  %v1107_v2 = vsel %vm4635_vm13, %v1102_v62, %v4797_v0  ;;  %v1121_v57 = vrot.slane %v1119_v17, 4  ;;  %v3413_v32 = vld [vmem:[#allocation3 + $0xe0] sm:$0xf] }
  0x91   : > { %1410 = vst [vmem:[#allocation3 + $0x80] sm:$0xf] %v1269_v33  ;;  %v3379_v33 = vld [vmem:[#allocation3 + $0xbc] sm:$0xf0]  ;;  %v581_v62 = vsel %vm4367_vm7, %v481_v51, %v580_v11  ;;  %v3415_v58 = vld [vmem:[#allocation3 + $0x104] sm:$0xf0] }
  0x92   : > { %v930_v7 = vmax.f32 %v900_v59, 0.0  ;;  %775 = vst [vmem:[#allocation2 + $0x38] sm:$0x1] %v774_v26  ;;  %v3382_v36 = vor.u32 %v3897_v42, %v3379_v33  ;;  %v1128_v59 = vshll.u32 %v4556_v19, 16  ;;  %v3905_v42 = vld [vmem:[#allocation3 + $0xdc] sm:$0xf] }
  0x93   : > { %2644 = vmatmul.bf16.gmra.mxu2 %v3342_v54  ;;  %1385 = vst [vmem:[#allocation3 + $0xe8] sm:$0xf] %v1107_v2  ;;  %v3901_v46 = vld [vmem:[#allocation3 + $0xb8] sm:$0xf0]  ;;  %v1110_v54 = vrot.slane %v1108_v44, 4  ;;  %v1146_v17 = vshll.u32 %v4518_v40, 16 }
  0x94   : > { %2693 = vmatmul.bf16.gmra.mxu3 %v3346_v49  ;;  %v960_v9 = vpack.c.bf16 %v930_v7, %v930_v7  ;;  %1214 = vst [vmem:[#allocation3 + $0x124] sm:$0xf] %v1107_v2  ;;  %v3378_v60 = vor.u32 %v3901_v46, %v3377_v31  ;;  %v1124_v49 = vrot.slane %v1122_v1, 5  ;;  %v3385_v7 = vld [vmem:[#allocation3 + $0xa0] sm:$0xf] }
  0x95   : > { %2595 = vmatmul.bf16.gmra.mxu1 %v3338_v5  ;;  %v3893_v63 = vld [vmem:[#allocation3 + $0x78] sm:$0xf0]  ;;  %1469 = vst [vmem:[#allocation3 + $0xac] sm:$0xf] %v1107_v2  ;;  %v4843_v5 = vld [vmem:[%s5180_s3] ss:$0 sm:$0xff] }
  0x96   : > { %v3350_v4 = vor.u32 %v3893_v63, %v3349_v56  ;;  %v1090_v14 = vshll.u32 %v960_v9, 16  ;;  %v1275_v16 = vrot.slane %v960_v9, 5  ;;  %1329 = vst [vmem:[#allocation3 + $0x128] sm:$0xf] %v1280_v50  ;;  %v1125_v56 = vor.u32 %v1124_v49, %v1121_v57  ;;  %v3906_v44 = vld [vmem:[#allocation3 + $0xe4] sm:$0xf] }
  0x97   : > { %v3371_v45 = vld [vmem:[#allocation3 + $0xb4] sm:$0xf0]  ;;  %1413 = vst [vmem:[#allocation3 + $0xec] sm:$0xf] %v1280_v50  ;;  %v1111_v9 = vor.u32 %v1110_v54, %v4797_v0  ;;  %v4850_v63 = vrot.slane %v1128_v59, 5  ;;  %v1148_v57 = vrot.slane %v1146_v17, 5 }
  0x98   : > { %v1092_v23 = vrot.slane %v1090_v14, 5  ;;  %v1276_v28 = vsel %vm4644_vm14, %v1274_v20, %v1275_v16  ;;  %v3374_v3 = vor.u32 %v3896_v55, %v3371_v45  ;;  %1497 = vst [vmem:[#allocation3 + $0xb0] sm:$0xf] %v1280_v50  ;;  %v4001_v20 = vld [vmem:[%s5178_s1 + $0x198] sm:$0xff]  ;;  %v1126_v2 = vrot.slane %v1125_v56, 4 }
  0x99   : > { %1328 = vst [vmem:[#allocation3 + $0x104] sm:$0xf] %v1276_v28  ;;  %v805_v47 = vld [vmem:[#allocation2 + $0x38] sm:$0x1]  ;;  %v1281_v14 = vrot.slane %v1279_v10, 4  ;;  %2831 = vmatpush.bf16.msra.mxu2 %v4001_v20  ;;  %v1112_v0 = vrot.slane %v1111_v9, 4 }
  0x9a   : > { %2742 = vmatmul.bf16.gmra.mxu0 %v3350_v4  ;;  %v1093_v29 = vsel %vm4635_vm13, %v1088_v13, %v1092_v23  ;;  %1412 = vst [vmem:[#allocation3 + $0xc8] sm:$0xf] %v1276_v28  ;;  %v835_v52 = vunpack.c.l.bf16 %v805_v47  ;;  %v715_v16 = vld [vmem:[#allocation2 + $0x40] sm:$0x8]  ;;  %v1131_v21 = vsel %vm4635_vm13, %v1126_v2, %v4850_v63  ;;  %v716_v23 = vld [vmem:[#allocation2 + $0x4c] sm:$0x8] }
  0x9b   : > { %1384 = vst [vmem:[#allocation3 + $0xc4] sm:$0xf] %v1093_v29  ;;  %v3281_v55 = vrot.slane %v716_v23, 11  ;;  %v378_v22 = vld [vmem:[%s4293_s16 + $0x38] sm:$0xf]  ;;  %v498_v47 = vrot.slane %v4410_v61, 4 }
  0x9c   : > { %1213 = vst [vmem:[#allocation3 + $0x100] sm:$0xf] %v1093_v29  ;;  %v869_v38 = vmul.f32 %v4834_v53, %v835_v52  ;;  %v587_v50 = vld [vmem:[#allocation2 + $0x5c] sm:$0x1]  ;;  %v500_v51 = vshrl.u32 %v378_v22, 16  ;;  %v1152_v49 = vshll.u32 %v4522_v43, 16 }
  0x9d   : > { %1468 = vst [vmem:[#allocation3 + $0x88] sm:$0xf] %v1093_v29  ;;  %v3280_v29 = vrot.slane %v715_v16, 11  ;;  %v588_v61 = vsel %vm4367_vm7, %v498_v47, %v587_v50  ;;  %v3290_v56 = vrot.slane %v4551_v12, 9  ;;  %v717_v12 = vld [vmem:[#allocation2 + $0x58] sm:$0x8] }
  0x9e   : > { %1496 = vst [vmem:[#allocation3 + $0x8c] sm:$0xf] %v1276_v28  ;;  %v903_v6 = vadd.f32 %v4843_v5, %v869_v38  ;;  %v503_v38 = vshll.u32 %v378_v22, 16  ;;  %v502_v59 = vrot.slane %v500_v51, 7  ;;  %v3449_v47 = vld [vmem:[#allocation3 + $0x128] sm:$0xf] }
  0x9f   : > { %575 = vst [vmem:[#allocation2 + $0x44] sm:$0x1] %v574_v48  ;;  %v1143_v48 = vshrl.u32 %v4518_v40, 16  ;;  %v3501_v30 = vld [vmem:[#allocation3 + $0x180] sm:$0xf] }
  0xa0   : > { %v933_v26 = vmax.f32 %v903_v6, 0.0  ;;  %582 = vst [vmem:[#allocation2 + $0x50] sm:$0x1] %v581_v62  ;;  %v3910_v34 = vld [vmem:[#allocation3 + $0x100] sm:$0xf0]  ;;  %v505_v16 = vor.u32 %v503_v38, %v502_v59 }
  0xa1   : > { %1387 = vst [vmem:[#allocation3 + $0x130] sm:$0xf] %v1131_v21  ;;  %v3414_v11 = vor.u32 %v3910_v34, %v3413_v32  ;;  %v1145_v54 = vrot.slane %v1143_v48, 4  ;;  %v4009_v62 = vld [vmem:[%s5178_s1 + $0x1d8] sm:$0xff] }
  0xa2   : > { %v3902_v8 = vld [vmem:[#allocation3 + $0xc0] sm:$0xf0]  ;;  %v963_v13 = vpack.c.bf16 %v933_v26, %v933_v26  ;;  %1216 = vst [vmem:[#allocation3 + $0x16c] sm:$0xf] %v1131_v21  ;;  %v1286_v26 = vrot.slane %v4556_v19, 5  ;;  %2880 = vmatpush.bf16.msra.mxu3 %v4009_v62 }
  0xa3   : > { %2649 = vmatmul.bf16.gmra.mxu2 %v3378_v60  ;;  %v3386_v4 = vor.u32 %v3902_v8, %v3385_v7  ;;  %1471 = vst [vmem:[#allocation3 + $0xf4] sm:$0xf] %v1131_v21  ;;  %v3407_v33 = vld [vmem:[#allocation3 + $0xfc] sm:$0xf0]  ;;  %v3421_v7 = vld [vmem:[#allocation3 + $0xe8] sm:$0xf]  ;;  %v1149_v9 = vor.u32 %v1148_v57, %v1145_v54 }
  0xa4   : > { %2698 = vmatmul.bf16.gmra.mxu3 %v3382_v36  ;;  %v1114_v28 = vshll.u32 %v963_v13, 16  ;;  %v1282_v31 = vrot.slane %v963_v13, 5  ;;  %v3410_v1 = vor.u32 %v3905_v42, %v3407_v33  ;;  %v379_v36 = vld [vmem:[%s4293_s16 + $0x3c] sm:$0xf]  ;;  %589 = vst [vmem:[#allocation2 + $0x5c] sm:$0x1] %v588_v61  ;;  %v1287_v13 = vsel %vm4644_vm14, %v3290_v56, %v1286_v26 }
  0xa5   : > { %2600 = vmatmul.bf16.gmra.mxu1 %v3374_v3  ;;  %v3418_v3 = vor.u32 %v3906_v44, %v3415_v58  ;;  %v3993_v6 = vld [vmem:[%s5178_s1 + $0x158] sm:$0xff]  ;;  %v508_v20 = vshrl.u32 %v379_v36, 16  ;;  %v511_v21 = vshll.u32 %v379_v36, 16  ;;  %1331 = vst [vmem:[#allocation3 + $0x170] sm:$0xf] %v1287_v13 }
  0xa6   : > { %v1116_v37 = vrot.slane %v1114_v28, 5  ;;  %v1283_v39 = vsel %vm4644_vm14, %v1281_v14, %v1282_v31  ;;  %v776_v10 = vld [vmem:[#allocation2 + $0x44] sm:$0x1]  ;;  %v4017_v8 = vld [vmem:[%s5178_s1 + $0x218] sm:$0xff]  ;;  %2782 = vmatpush.bf16.msra.mxu1 %v3993_v6  ;;  %v4887_v14 = vrot.slane %v1152_v49, 5  ;;  %v1150_v28 = vrot.slane %v1149_v9, 4 }
  0xa7   : > { %1330 = vst [vmem:[#allocation3 + $0x14c] sm:$0xf] %v1283_v39  ;;  %v779_v46 = vld [vmem:[#allocation2 + $0x50] sm:$0x1]  ;;  %v777_v52 = vsel %vm4624_vm10, %v3280_v29, %v776_v10  ;;  %2929 = vmatpush.bf16.msra.mxu0 %v4017_v8  ;;  %v590_v31 = vld [vmem:[#allocation2 + $0x60] sm:$0xf] }
  0xa8   : > { %v1117_v45 = vsel %vm4635_vm13, %v1112_v0, %v1116_v37  ;;  %1414 = vst [vmem:[#allocation3 + $0x110] sm:$0xf] %v1283_v39  ;;  %v780_v60 = vsel %vm4624_vm10, %v3281_v55, %v779_v46  ;;  %v4000_v0 = vld [vmem:[%s5178_s1 + $0x190] sm:$0xff]  ;;  %v506_v29 = vrot.slane %v502_v59, 4  ;;  %v510_v32 = vrot.slane %v508_v20, 7 }
  0xa9   : > { %1386 = vst [vmem:[#allocation3 + $0x10c] sm:$0xf] %v1117_v45  ;;  %2832 = vmatpush.bf16.msra.mxu2 %v4000_v0  ;;  %v1155_v37 = vsel %vm4635_vm13, %v1150_v28, %v4887_v14  ;;  %v3282_v55 = vrot.slane %v717_v12, 11  ;;  %v591_v58 = vsel %vm4315_vm5, %v505_v16, %v590_v31  ;;  %v594_v46 = vld [vmem:[#allocation2 + $0x68] sm:$0x1]  ;;  %v1288_v20 = vrot.slane %v1286_v26, 4 }
  0xaa   : > { %2747 = vmatmul.bf16.gmra.mxu0 %v3386_v4  ;;  %1215 = vst [vmem:[#allocation3 + $0x148] sm:$0xf] %v1117_v45  ;;  %v1132_v4 = vshrl.u32 %v4556_v19, 16  ;;  %v513_v44 = vor.u32 %v511_v21, %v510_v32  ;;  %v515_v10 = vrot.slane %v510_v32, 4  ;;  %v3451_v61 = vld [vmem:[#allocation3 + $0x14c] sm:$0xf0] }
  0xab   : > { %1470 = vst [vmem:[#allocation3 + $0xd0] sm:$0xf] %v1117_v45  ;;  %v782_v51 = vld [vmem:[#allocation2 + $0x5c] sm:$0x1]  ;;  %v4016_v12 = vld [vmem:[%s5178_s1 + $0x210] sm:$0xff]  ;;  %v1170_v16 = vshll.u32 %v4682_v25, 16 }
  0xac   : > { %1498 = vst [vmem:[#allocation3 + $0xd4] sm:$0xf] %v1283_v39  ;;  %v1156_v39 = vshrl.u32 %v4522_v43, 16  ;;  %v1134_v22 = vrot.slane %v1132_v4, 4  ;;  %v783_v17 = vsel %vm4624_vm10, %v3282_v55, %v782_v51  ;;  %v3914_v38 = vld [vmem:[#allocation3 + $0x124] sm:$0xf]  ;;  %2930 = vmatpush.bf16.msra.mxu0 %v4016_v12 }
  0xad   : > { %778 = vst [vmem:[#allocation2 + $0x44] sm:$0x1] %v777_v52  ;;  %v514_v52 = vsel %vm4306_vm4, %v506_v29, %v513_v44  ;;  %v1176_v21 = vshll.u32 %v4684_v27, 16  ;;  %v3292_v12 = vrot.slane %v4682_v25, 9 }
  0xae   : > { %781 = vst [vmem:[#allocation2 + $0x50] sm:$0x1] %v780_v60  ;;  %v1158_v48 = vrot.slane %v1156_v39, 4  ;;  %v1135_v57 = vor.u32 %v1134_v22, %v4850_v63  ;;  %v4008_v63 = vld [vmem:[%s5178_s1 + $0x1d0] sm:$0xff] }
  0xaf   : > { %1415 = vst [vmem:[#allocation3 + $0x134] sm:$0xf] %v1287_v13  ;;  %2881 = vmatpush.bf16.msra.mxu3 %v4008_v63  ;;  %v3991_v63 = vld [vmem:[%s5178_s1 + $0x148] sm:$0xff] }
  0xb0   : > { %v3911_v2 = vld [vmem:[#allocation3 + $0x108] sm:$0xf0]  ;;  %1499 = vst [vmem:[#allocation3 + $0xf8] sm:$0xf] %v1287_v13  ;;  %v1159_v8 = vor.u32 %v1158_v48, %v4887_v14  ;;  %v3992_v13 = vld [vmem:[%s5178_s1 + $0x150] sm:$0xff]  ;;  %v1167_v14 = vshrl.u32 %v4682_v25, 16 }
  0xb1   : > { %v3422_v23 = vor.u32 %v3911_v2, %v3421_v7  ;;  %1389 = vst [vmem:[#allocation3 + $0x178] sm:$0xf] %v1155_v37  ;;  %v3443_v54 = vld [vmem:[#allocation3 + $0x144] sm:$0xf0]  ;;  %v1136_v2 = vrot.slane %v1135_v57, 4  ;;  %2783 = vmatpush.bf16.msra.mxu1 %v3992_v13  ;;  %v4015_v13 = vld [vmem:[%s5178_s1 + $0x208] sm:$0xff] }
  0xb2   : > { %1218 = vst [vmem:[#allocation3 + $0x1b4] sm:$0xf] %v1155_v37  ;;  %v3446_v56 = vor.u32 %v3914_v38, %v3443_v54  ;;  %v1160_v0 = vrot.slane %v1159_v8, 4  ;;  %v3485_v48 = vld [vmem:[#allocation3 + $0x170] sm:$0xf]  ;;  %2931 = vmatpush.bf16.msra.mxu0 %v4015_v13 }
  0xb3   : > { %2654 = vmatmul.bf16.gmra.mxu2 %v3414_v11  ;;  %1473 = vst [vmem:[#allocation3 + $0x13c] sm:$0xf] %v1155_v37  ;;  %v3919_v11 = vld [vmem:[#allocation3 + $0x148] sm:$0xf0]  ;;  %v3999_v37 = vld [vmem:[%s5178_s1 + $0x188] sm:$0xff] }
  0xb4   : > { %2703 = vmatmul.bf16.gmra.mxu3 %v3418_v3  ;;  %v808_v34 = vld [vmem:[#allocation2 + $0x44] sm:$0x1]  ;;  %592 = vst [vmem:[#allocation2 + $0x60] sm:$0xf] %v591_v58  ;;  %v3450_v59 = vor.u32 %v3919_v11, %v3449_v47  ;;  %2833 = vmatpush.bf16.msra.mxu2 %v3999_v37 }
  0xb5   : > { %2605 = vmatmul.bf16.gmra.mxu1 %v3410_v1  ;;  %v838_v42 = vunpack.c.l.bf16 %v808_v34  ;;  %v811_v33 = vld [vmem:[#allocation2 + $0x50] sm:$0x1]  ;;  %v595_v1 = vsel %vm4367_vm7, %v515_v10, %v594_v46  ;;  %v3915_v3 = vld [vmem:[#allocation3 + $0x12c] sm:$0xf]  ;;  %784 = vst [vmem:[#allocation2 + $0x5c] sm:$0x1] %v783_v17 }
  0xb6   : > { %v841_v45 = vunpack.c.l.bf16 %v811_v33  ;;  %593 = vst [vmem:[#allocation2 + $0x64] sm:$0xf] %v514_v52  ;;  %v3454_v6 = vor.u32 %v3915_v3, %v3451_v61  ;;  %v1293_v34 = vrot.slane %v4522_v43, 5  ;;  %v1172_v33 = vrot.slane %v1170_v16, 5  ;;  %v3457_v52 = vld [vmem:[#allocation3 + $0x130] sm:$0xf]  ;;  %2784 = vmatpush.bf16.msra.mxu1 %v3991_v63 }
  0xb7   : > { %v872_v50 = vmul.f32 %v4834_v53, %v838_v42  ;;  %596 = vst [vmem:[#allocation2 + $0x68] sm:$0x1] %v595_v1  ;;  %v1169_v42 = vrot.slane %v1167_v14, 4  ;;  %v1178_v10 = vrot.slane %v1176_v21, 5  ;;  %v3291_v43 = vrot.slane %v4518_v40, 9 }
  0xb8   : > { %v875_v60 = vmul.f32 %v4834_v53, %v841_v45  ;;  %v1295_v46 = vrot.slane %v1293_v34, 4  ;;  %v3924_v17 = vld [vmem:[#allocation3 + $0x174] sm:$0xf]  ;;  %v3487_v3 = vld [vmem:[#allocation3 + $0x194] sm:$0xf0] }
  0xb9   : > { %v906_v36 = vadd.f32 %v4843_v5, %v872_v50  ;;  %v1173_v51 = vor.u32 %v1172_v33, %v1169_v42  ;;  %v1294_v40 = vsel %vm4644_vm14, %v3291_v43, %v1293_v34  ;;  %v3923_v38 = vld [vmem:[#allocation3 + $0x16c] sm:$0xf]  ;;  %v3490_v8 = vor.u32 %v3924_v17, %v3487_v3  ;;  %v3932_v37 = vld [vmem:[#allocation3 + $0x1b4] sm:$0xf]  ;;  %v3933_v42 = vld [vmem:[#allocation3 + $0x1bc] sm:$0xf] }
  0xba   : > { %2752 = vmatmul.bf16.gmra.mxu0 %v3422_v23  ;;  %v909_v49 = vadd.f32 %v4843_v5, %v875_v60  ;;  %v1180_v23 = vshrl.u32 %v4684_v27, 16  ;;  %1333 = vst [vmem:[#allocation3 + $0x1b8] sm:$0xf] %v1294_v40  ;;  %v3523_v33 = vld [vmem:[#allocation3 + $0x1dc] sm:$0xf0]  ;;  %v3998_v43 = vld [vmem:[%s5178_s1 + $0x180] sm:$0xff] }
  0xbb   : > { %v936_v62 = vmax.f32 %v906_v36, 0.0  ;;  %v1174_v54 = vrot.slane %v1173_v51, 4  ;;  %1417 = vst [vmem:[#allocation3 + $0x17c] sm:$0xf] %v1294_v40  ;;  %2834 = vmatpush.bf16.msra.mxu2 %v3998_v43  ;;  %v4014_v17 = vld [vmem:[%s5178_s1 + $0x200] sm:$0xff] }
  0xbc   : > { %v939_v7 = vmax.f32 %v909_v49, 0.0  ;;  %v814_v31 = vld [vmem:[#allocation2 + $0x5c] sm:$0x1]  ;;  %v1182_v22 = vrot.slane %v1180_v23, 4  ;;  %1501 = vst [vmem:[#allocation3 + $0x140] sm:$0xf] %v1294_v40  ;;  %2932 = vmatpush.bf16.msra.mxu0 %v4014_v17 }
  0xbd   : > { %v966_v9 = vpack.c.bf16 %v936_v62, %v936_v62  ;;  %v844_v39 = vunpack.c.l.bf16 %v814_v31  ;;  %v3493_v23 = vld [vmem:[#allocation3 + $0x178] sm:$0xf]  ;;  %v704_v31 = vld [vmem:[#allocation2 + $0x60] sm:$0x1] }
  0xbe   : > { %v969_v4 = vpack.c.bf16 %v939_v7, %v939_v7  ;;  %v1183_v60 = vor.u32 %v1182_v22, %v1178_v10  ;;  %v785_v34 = vld [vmem:[#allocation2 + $0x68] sm:$0x1] }
  0xbf   : > { %v1138_v19 = vshll.u32 %v966_v9, 16  ;;  %v1289_v26 = vrot.slane %v966_v9, 5  ;;  %v878_v58 = vmul.f32 %v4834_v53, %v844_v39  ;;  %v4961_v25 = vpop.f32.mrf.mxu1 }
  0xc0   : > { %v1162_v28 = vshll.u32 %v969_v4, 16  ;;  %v1296_v47 = vrot.slane %v969_v4, 5  ;;  %v4007_v4 = vld [vmem:[%s5178_s1 + $0x1c8] sm:$0xff] }
  0xc1   : > { %v1140_v29 = vrot.slane %v1138_v19, 5  ;;  %v1290_v32 = vsel %vm4644_vm14, %v1288_v20, %v1289_v26  ;;  %v912_v50 = vadd.f32 %v4843_v5, %v878_v58  ;;  %v1300_v20 = vrot.slane %v4684_v27, 5  ;;  %2882 = vmatpush.bf16.msra.mxu3 %v4007_v4  ;;  %v638_v19 = vld [vmem:[#allocation2 + $0x60] sm:$0x2]  ;;  %v718_v26 = vld [vmem:[#allocation2 + $0x64] sm:$0x8] }
  0xc2   : > { %1332 = vst [vmem:[#allocation3 + $0x194] sm:$0xf] %v1290_v32  ;;  %v1164_v55 = vrot.slane %v1162_v28, 5  ;;  %v1297_v61 = vsel %vm4644_vm14, %v1295_v46, %v1296_v47  ;;  %v3273_v28 = vrot.slane %v638_v19, 9  ;;  %v3521_v39 = vld [vmem:[#allocation3 + $0x1b8] sm:$0xf]  ;;  %v3526_v47 = vor.u32 %v3933_v42, %v3523_v33 }
  0xc3   : > { %2659 = vmatmul.bf16.gmra.mxu2 %v3450_v59  ;;  %v1141_v44 = vsel %vm4635_vm13, %v1136_v2, %v1140_v29  ;;  %1416 = vst [vmem:[#allocation3 + $0x158] sm:$0xf] %v1290_v32  ;;  %v942_v11 = vmax.f32 %v912_v50, 0.0  ;;  %v1184_v59 = vrot.slane %v1183_v60, 4  ;;  %v1179_v2 = vsel %vm4635_vm13, %v1174_v54, %v1178_v10  ;;  %v4006_v60 = vld [vmem:[%s5178_s1 + $0x1c0] sm:$0xff] }
  0xc4   : > { %2708 = vmatmul.bf16.gmra.mxu3 %v3454_v6  ;;  %1388 = vst [vmem:[#allocation3 + $0x154] sm:$0xf] %v1141_v44  ;;  %v1165_v45 = vsel %vm4635_vm13, %v1160_v0, %v1164_v55  ;;  %v1302_v14 = vrot.slane %v1300_v20, 4  ;;  %v1301_v21 = vsel %vm4644_vm14, %v3292_v12, %v1300_v20  ;;  %v3283_v29 = vrot.slane %v718_v26, 11 }
  0xc5   : > { %2610 = vmatmul.bf16.gmra.mxu1 %v3446_v56  ;;  %1217 = vst [vmem:[#allocation3 + $0x190] sm:$0xf] %v1141_v44  ;;  %v972_v36 = vpack.c.bf16 %v942_v11, %v942_v11  ;;  %v705_v22 = vsel %vm4367_vm7, %v3273_v28, %v704_v31  ;;  %2883 = vmatpush.bf16.msra.mxu3 %v4006_v60 }
  0xc6   : > { %1472 = vst [vmem:[#allocation3 + $0x118] sm:$0xf] %v1141_v44  ;;  %v786_v46 = vsel %vm4624_vm10, %v3283_v29, %v785_v34 }
  0xc7   : > { %1500 = vst [vmem:[#allocation3 + $0x11c] sm:$0xf] %v1290_v32  ;;  %v1186_v62 = vshll.u32 %v972_v36, 16  ;;  %v1303_v16 = vrot.slane %v972_v36, 5  ;;  %v4976_v11 = vpop.f32.mrf.mxu1 }
  0xc8   : > { %1390 = vst [vmem:[#allocation3 + $0x19c] sm:$0xf] %v1165_v45 }
  0xc9   : > { %v3928_v1 = vld [vmem:[#allocation3 + $0x190] sm:$0xf0]  ;;  %1219 = vst [vmem:[#allocation3 + $0x1d8] sm:$0xf] %v1165_v45  ;;  %v1188_v9 = vrot.slane %v1186_v62, 5  ;;  %v1304_v0 = vsel %vm4644_vm14, %v1302_v14, %v1303_v16 }
  0xca   : > { %1474 = vst [vmem:[#allocation3 + $0x160] sm:$0xf] %v1165_v45  ;;  %v3486_v49 = vor.u32 %v3928_v1, %v3485_v48  ;;  %v3990_v48 = vld [vmem:[%s5178_s1 + $0x140] sm:$0xff] }
  0xcb   : > { %v3920_v57 = vld [vmem:[#allocation3 + $0x150] sm:$0xf0]  ;;  %1334 = vst [vmem:[#allocation3 + $0x1dc] sm:$0xf] %v1297_v61  ;;  %v1189_v27 = vsel %vm4635_vm13, %v1184_v59, %v1188_v9  ;;  %v4963_v10 = vpop.f32.mrf.mxu2  ;;  %2785 = vmatpush.bf16.msra.mxu1 %v3990_v48 }
  0xcc   : > { %v3458_v6 = vor.u32 %v3920_v57, %v3457_v52  ;;  %v3479_v7 = vld [vmem:[#allocation3 + $0x18c] sm:$0xf0]  ;;  %1418 = vst [vmem:[#allocation3 + $0x1a0] sm:$0xf] %v1297_v61 }
  0xcd   : > { %v3482_v56 = vor.u32 %v3923_v38, %v3479_v7  ;;  %1502 = vst [vmem:[#allocation3 + $0x164] sm:$0xf] %v1297_v61 }
  0xce   : > { %2757 = vmatmul.bf16.gmra.mxu0 %v3458_v6  ;;  %1391 = vst [vmem:[#allocation3 + $0x1c0] sm:$0xf] %v1179_v2 }
  0xcf   : > { %1392 = vst [vmem:[#allocation3 + $0x1e4] sm:$0xf] %v1189_v27  ;;  %v3929_v32 = vld [vmem:[#allocation3 + $0x198] sm:$0xf0] }
  0xd0   : > { %1220 = vst [vmem:[#allocation3 + $0x1fc] sm:$0xf] %v1179_v2  ;;  %v3494_v44 = vor.u32 %v3929_v32, %v3493_v23  ;;  %v3515_v58 = vld [vmem:[#allocation3 + $0x1d4] sm:$0xf0] }
  0xd1   : > { %1221 = vst [vmem:[#allocation3 + $0x220] sm:$0xf] %v1189_v27  ;;  %v3518_v50 = vor.u32 %v3932_v37, %v3515_v58  ;;  %v4972_v51 = vpop.f32.mrf.mxu0  ;;  %v4974_v52 = vpop.f32.mrf.mxu3 }
  0xd2   : > { %1475 = vst [vmem:[#allocation3 + $0x184] sm:$0xf] %v1179_v2  ;;  %v3937_v55 = vld [vmem:[#allocation3 + $0x1d8] sm:$0xf0] }
  0xd3   : > { %2664 = vmatmul.bf16.gmra.mxu2 %v3486_v49  ;;  %1476 = vst [vmem:[#allocation3 + $0x1a8] sm:$0xf] %v1189_v27  ;;  %v3522_v45 = vor.u32 %v3937_v55, %v3521_v39  ;;  %v4987_v40 = vpop.f32.mrf.mxu2  ;;  %v4998_v4 = vpop.f32.mrf.mxu1 }
  0xd4   : > { %2713 = vmatmul.bf16.gmra.mxu3 %v3490_v8  ;;  %1335 = vst [vmem:[#allocation3 + $0x200] sm:$0xf] %v1301_v21 }
  0xd5   : > { %2615 = vmatmul.bf16.gmra.mxu1 %v3482_v56  ;;  %1336 = vst [vmem:[#allocation3 + $0x224] sm:$0xf] %v1304_v0  ;;  %v3529_v54 = vld [vmem:[#allocation3 + $0x1c0] sm:$0xf] }
  0xd6   : > { %1419 = vst [vmem:[#allocation3 + $0x1c4] sm:$0xf] %v1301_v21  ;;  %v3938_v57 = vld [vmem:[#allocation3 + $0x1e0] sm:$0xf0] }
  0xd7   : > { %1420 = vst [vmem:[#allocation3 + $0x1e8] sm:$0xf] %v1304_v0  ;;  %v3530_v2 = vor.u32 %v3938_v57, %v3529_v54  ;;  %v3941_v63 = vld [vmem:[#allocation3 + $0x1fc] sm:$0xf] }
  0xd8   : > { %1503 = vst [vmem:[#allocation3 + $0x188] sm:$0xf] %v1301_v21  ;;  %v3551_v13 = vld [vmem:[#allocation3 + $0x21c] sm:$0xf0] }
  0xd9   : > { %1504 = vst [vmem:[#allocation3 + $0x1ac] sm:$0xf] %v1304_v0  ;;  %v4992_v8 = vpop.f32.mrf.mxu0  ;;  %v4994_v56 = vpop.f32.mrf.mxu3 }
  0xda   : > { %706 = vst [vmem:[#allocation2 + $0x60] sm:$0x1] %v705_v22 }
  0xdb   : > { %787 = vst [vmem:[#allocation2 + $0x68] sm:$0x1] %v786_v46  ;;  %v3557_v62 = vld [vmem:[#allocation3 + $0x200] sm:$0xf]  ;;  %v5020_v43 = vpop.f32.mrf.mxu1 }
  0xdc   : > { %v3946_v6 = vld [vmem:[#allocation3 + $0x220] sm:$0xf0] }
  0xdd   : > { %v3558_v12 = vor.u32 %v3946_v6, %v3557_v62 }
  0xde   : > { %2762 = vmatmul.bf16.gmra.mxu0 %v3494_v44 }
  0xdf   : > { %v5007_v0 = vpop.f32.mrf.mxu2 }
  0xe0   : > { %v3931_v41 = vld [vmem:[#allocation3 + $0x1a8] sm:$0xf0] }
  0xe1   : > { %v4085_v1 = vld [vmem:[#allocation2 + $0x60] sm:$0xff]  }
  0xe2   : > { %v4040_v3 = vunpack.c.l.bf16 %v4085_v1  ;;  %v4041_v61 = vunpack.c.h.bf16 %v4085_v1  ;;  %v817_v36 = vld [vmem:[#allocation2 + $0x68] sm:$0x1] }
  0xe3   : > { %2669 = vmatmul.bf16.gmra.mxu2 %v3522_v45  ;;  %v847_v38 = vunpack.c.l.bf16 %v817_v36  ;;  %v3880_v36 = vld [vmem:[#allocation3 + $0x14] sm:$0xf] }
  0xe4   : > { %2718 = vmatmul.bf16.gmra.mxu3 %v3526_v47  ;;  %v879_v49 = vmul.f32 %v4834_v53, %v4040_v3  ;;  %v880_v59 = vmul.f32 %v4834_v53, %v4041_v61  ;;  %v3321_v3 = vld [vmem:[#allocation3 + $0x18] sm:$0xf]  ;;  %v3885_v61 = vld [vmem:[#allocation3 + $0x38] sm:$0xf0] }
  0xe5   : > { %2620 = vmatmul.bf16.gmra.mxu1 %v3518_v50  ;;  %v881_v7 = vmul.f32 %v4834_v53, %v847_v38  ;;  %v3554_v53 = vor.u32 %v3941_v63, %v3551_v13  ;;  %v3315_v38 = vld [vmem:[#allocation3 + $0x34] sm:$0xf0]  ;;  %v3881_v13 = vld [vmem:[#allocation3 + $0x1c] sm:$0xf] }
  0xe6   : > { %v913_v9 = vadd.f32 %v4843_v5, %v879_v49  ;;  %v914_v20 = vadd.f32 %v4843_v5, %v880_v59  ;;  %v3322_v49 = vor.u32 %v3885_v61, %v3321_v3  ;;  %v3318_v59 = vor.u32 %v3880_v36, %v3315_v38  ;;  %v3359_v3 = vld [vmem:[#allocation3 + $0x84] sm:$0xf0] }
  0xe7   : > { %v915_v27 = vadd.f32 %v4843_v5, %v881_v7  ;;  %v5026_v1 = vpop.f32.mrf.mxu2 }
  0xe8   : > { %v943_v14 = vmax.f32 %v913_v9, 0.0  ;;  %v944_v16 = vmax.f32 %v914_v20, 0.0 }
  0xe9   : > { %v945_v19 = vmax.f32 %v915_v27, 0.0  ;;  %v3323_v27 = vld [vmem:[#allocation3 + $0x3c] sm:$0xf0] }
  0xea   : > { %v5001_v26 = vpack.c.bf16 %v943_v14, %v943_v14  ;;  %v5003_v21 = vpack.c.bf16 %v944_v16, %v944_v16 }
  0xeb   : > { %v5005_v23 = vpack.c.bf16 %v945_v19, %v945_v19  ;;  %v3326_v19 = vor.u32 %v3881_v13, %v3323_v27 }
  0xec   : > { %1351 = vst [vmem:[#allocation3 + $0x204] sm:$0xf] %v5001_v26  ;;  %v1354_v28 = vshrl.u32 %v5001_v26, 16  ;;  %v1357_v5 = vshll.u32 %v5001_v26, 16  ;;  %v1363_v31 = vshll.u32 %v5003_v21, 16  ;;  %v1367_v29 = vshrl.u32 %v5003_v21, 16 }
  0xed   : > { %1352 = vst [vmem:[#allocation3 + $0x228] sm:$0xf] %v5003_v21  ;;  %v1373_v32 = vshll.u32 %v5005_v23, 16  ;;  %v1400_v15 = vrot.slane %v5003_v21, 5 }
  0xee   : > { %2767 = vmatmul.bf16.gmra.mxu0 %v3530_v2  ;;  %1435 = vst [vmem:[#allocation3 + $0x1c8] sm:$0xf] %v5001_v26  ;;  %v1356_v34 = vrot.slane %v1354_v28, 4  ;;  %v1359_v37 = vrot.slane %v1357_v5, 5  ;;  %v1365_v39 = vrot.slane %v1363_v31, 5  ;;  %v1369_v55 = vrot.slane %v1367_v29, 4 }
  0xef   : > { %1436 = vst [vmem:[#allocation3 + $0x1ec] sm:$0xf] %v5003_v21  ;;  %v1375_v58 = vrot.slane %v1373_v32, 5  ;;  %v3357_v31 = vld [vmem:[#allocation3 + $0x60] sm:$0xf] }
  0xf0   : > { %v1360_v33 = vor.u32 %v1359_v37, %v1356_v34  ;;  %v1370_v44 = vor.u32 %v1369_v55, %v1365_v39  ;;  %v3889_v32 = vld [vmem:[#allocation3 + $0x5c] sm:$0xf]  ;;  %v3351_v34 = vld [vmem:[#allocation3 + $0x7c] sm:$0xf0] }
  0xf2   : > { %v1361_v45 = vrot.slane %v1360_v33, 4  ;;  %v1371_v46 = vrot.slane %v1370_v44, 4  ;;  %v3329_v44 = vld [vmem:[#allocation3 + $0x20] sm:$0xf] }
  0xf3   : > { %2674 = vmatmul.bf16.gmra.mxu2 %v3558_v12  ;;  %v3942_v47 = vld [vmem:[#allocation3 + $0x204] sm:$0xf] }
  0xf4   : > { %v3559_v50 = vld [vmem:[#allocation3 + $0x224] sm:$0xf0]  ;;  %v1366_v60 = vsel %vm4635_vm13, %v1361_v45, %v1365_v39  ;;  %v1376_v48 = vsel %vm4635_vm13, %v1371_v46, %v1375_v58  ;;  %v3886_v58 = vld [vmem:[#allocation3 + $0x40] sm:$0xf0]  ;;  %v3354_v46 = vor.u32 %v3889_v32, %v3351_v34  ;;  %v3899_v32 = vld [vmem:[#allocation3 + $0xac] sm:$0xf] }
  0xf5   : > { %2625 = vmatmul.bf16.gmra.mxu1 %v3554_v53  ;;  %v3562_v17 = vor.u32 %v3942_v47, %v3559_v50  ;;  %1393 = vst [vmem:[#allocation3 + $0x208] sm:$0xf] %v1366_v60  ;;  %v3395_v34 = vld [vmem:[#allocation3 + $0xcc] sm:$0xf0] }
  0xf6   : > { %1394 = vst [vmem:[#allocation3 + $0x22c] sm:$0xf] %v1376_v48 }
  0xf7   : > { %v2547_v42 = vpop.f32.mrf.mxu0  ;;  %v5018_v22 = vpop.f32.mrf.mxu3  ;;  %2723 = vmatmul.bf16.gmra.mxu3 %v3562_v17  ;;  %1477 = vst [vmem:[#allocation3 + $0x1cc] sm:$0xf] %v1366_v60  ;;  %v3890_v17 = vld [vmem:[#allocation3 + $0x64] sm:$0xf] }
  0xf8   : > { %1478 = vst [vmem:[#allocation3 + $0x1f0] sm:$0xf] %v1376_v48 }
  0xfc   : > { %v3565_v6 = vld [vmem:[#allocation3 + $0x208] sm:$0xf] }
  0xfd   : > { %v3947_v9 = vld [vmem:[#allocation3 + $0x228] sm:$0xf0] }
  0xfe   : > { %v3566_v20 = vor.u32 %v3947_v9, %v3565_v6  ;;  %v3903_v9 = vld [vmem:[#allocation3 + $0xc8] sm:$0xf0] }
  0xff   : > { %v2549_v54 = vpop.f32.mrf.mxu0  ;;  %v5028_v57 = vpop.f32.mrf.mxu3  ;;  %v3539_v35 = vld [vmem:[#allocation3 + $0x1ec] sm:$0xf0] }
 0x100   : > { %2772 = vmatmul.bf16.gmra.mxu0 %v3566_v20  ;;  %v3898_v20 = vld [vmem:[#allocation3 + $0xa4] sm:$0xf] }
 0x102   : > { %v2591_v62 = vpop.f32.mrf.mxu1 }
 0x103   : > { %v2592_v7 = vadd.f32 %v2591_v62, %v4972_v51  ;;  %2835 = vmatmul.bf16.vlgmr.msra.gmra.mxu2 %v3322_v49  ;;  %v3894_v51 = vld [vmem:[#allocation3 + $0x80] sm:$0xf0]  ;;  %v3362_v49 = vor.u32 %v3890_v17, %v3359_v3  ;;  %v3423_v17 = vld [vmem:[#allocation3 + $0x10c] sm:$0xf0] }
 0x104   : > { %v3358_v33 = vor.u32 %v3894_v51, %v3357_v31 }
 0x105   : > { %2786 = vmatmul.bf16.vlgmr.msra.gmra.mxu1 %v3318_v59 }
 0x106   : > { %v2640_v2 = vpop.f32.mrf.mxu2 }
 0x107   : > { %v2738_v63 = vpop.f32.mrf.mxu0  ;;  %v2641_v12 = vadd.f32 %v2640_v2, %v2592_v7  ;;  %v2689_v14 = vpop.f32.mrf.mxu3  ;;  %2884 = vmatmul.bf16.vlgmr.msra.gmra.mxu3 %v3326_v19  ;;  %v3393_v7 = vld [vmem:[#allocation3 + $0xa8] sm:$0xf] }
 0x108   : > { %v3387_v2 = vld [vmem:[#allocation3 + $0xc4] sm:$0xf0] }
 0x109   : > { %v2690_v16 = vadd.f32 %v2689_v14, %v2641_v12  ;;  %v3394_v12 = vor.u32 %v3903_v9, %v3393_v7  ;;  %v3365_v14 = vld [vmem:[#allocation3 + $0x68] sm:$0xf] }
 0x10a   : > { %v2593_v53 = vpop.f32.mrf.mxu1 }
 0x10b   : > { %v2594_v28 = vadd.f32 %v2593_v53, %v4992_v8  ;;  %v5032_v5 = vadd.f32 %v2738_v63, %v2690_v16  ;;  %v3330_v8 = vor.u32 %v3886_v58, %v3329_v44  ;;  %v3895_v16 = vld [vmem:[#allocation3 + $0x88] sm:$0xf0]  ;;  %v3398_v44 = vor.u32 %v3899_v32, %v3395_v34  ;;  %v3908_v32 = vld [vmem:[#allocation3 + $0xf4] sm:$0xf]  ;;  %v3431_v34 = vld [vmem:[#allocation3 + $0x114] sm:$0xf0] }
 0x10e   : > { %v2642_v29 = vpop.f32.mrf.mxu2 }
 0x10f   : > { %v5034_v37 = vpop.f32.mrf.mxu0  ;;  %v2643_v39 = vadd.f32 %v2642_v29, %v2594_v28  ;;  %v2691_v55 = vpop.f32.mrf.mxu3  ;;  %v3366_v28 = vor.u32 %v3895_v16, %v3365_v14 }
 0x110   : > { %2933 = vmatmul.bf16.vlgmr.msra.gmra.mxu0 %v3330_v8  ;;  %v3912_v8 = vld [vmem:[#allocation3 + $0x110] sm:$0xf0] }
 0x111   : > { %v5036_v45 = vadd.f32 %v2691_v55, %v2643_v39 }
 0x112   : > { %v2596_v47 = vpop.f32.mrf.mxu1 }
 0x113   : > { %v2597_v50 = vadd.f32 %v2596_v47, %v2547_v42  ;;  %2840 = vmatmul.bf16.gmra.mxu2 %v3358_v33  ;;  %v3429_v47 = vld [vmem:[#allocation3 + $0xf0] sm:$0xf] }
 0x115   : > { %2791 = vmatmul.bf16.gmra.mxu1 %v3354_v46 }
 0x116   : > { %v2645_v60 = vpop.f32.mrf.mxu2 }
 0x117   : > { %v2743_v48 = vpop.f32.mrf.mxu0  ;;  %v2646_v61 = vadd.f32 %v2645_v60, %v2597_v50  ;;  %v2694_v36 = vpop.f32.mrf.mxu3  ;;  %2889 = vmatmul.bf16.gmra.mxu3 %v3362_v49  ;;  %v3401_v49 = vld [vmem:[#allocation3 + $0xb0] sm:$0xf] }
 0x119   : > { %v2695_v38 = vadd.f32 %v2694_v36, %v2646_v61 }
 0x11a   : > { %v2598_v59 = vpop.f32.mrf.mxu1 }
 0x11b   : > { %v2599_v62 = vadd.f32 %v2598_v59, %v2549_v54  ;;  %v5038_v6 = vadd.f32 %v2743_v48, %v2695_v38  ;;  %v3390_v54 = vor.u32 %v3898_v20, %v3387_v2  ;;  %v3907_v48 = vld [vmem:[#allocation3 + $0xec] sm:$0xf]  ;;  %v3430_v38 = vor.u32 %v3912_v8, %v3429_v47  ;;  %v3904_v59 = vld [vmem:[#allocation3 + $0xd0] sm:$0xf0] }
 0x11c   : > { %v3426_v9 = vor.u32 %v3907_v48, %v3423_v17  ;;  %v3434_v8 = vor.u32 %v3908_v32, %v3431_v34  ;;  %v3465_v48 = vld [vmem:[#allocation3 + $0x138] sm:$0xf]  ;;  %v3921_v17 = vld [vmem:[#allocation3 + $0x158] sm:$0xf0]  ;;  %v3467_v32 = vld [vmem:[#allocation3 + $0x15c] sm:$0xf0] }
 0x11e   : > { %v2647_v42 = vpop.f32.mrf.mxu2 }
 0x11f   : > { %v5041_v63 = vpop.f32.mrf.mxu0  ;;  %v2648_v13 = vadd.f32 %v2647_v42, %v2599_v62  ;;  %v2696_v27 = vpop.f32.mrf.mxu3  ;;  %v601_v42 = vld [vmem:[%s599_s10 + $0x4] sm:$0xf] }
 0x120   : > { %2938 = vmatmul.bf16.gmra.mxu0 %v3366_v28 }
 0x121   : > { %v5043_v19 = vadd.f32 %v2696_v27, %v2648_v13  ;;  %v611_v13 = vshrl.u32 %v601_v42, 16  ;;  %v3402_v27 = vor.u32 %v3904_v59, %v3401_v49  ;;  %v3466_v59 = vor.u32 %v3921_v17, %v3465_v48 }
 0x122   : > { %v2601_v53 = vpop.f32.mrf.mxu1 }
 0x123   : > { %2845 = vmatmul.bf16.gmra.mxu2 %v3394_v12  ;;  %v2602_v31 = vadd.f32 %v2601_v53, %v4961_v25  ;;  %v600_v25 = vld [vmem:[%s599_s10] sm:$0xf]  ;;  %v623_v12 = vld [vmem:[#allocation2 + $0x6c] sm:$0xf]  ;;  %v613_v16 = vrot.slane %v611_v13, 7 }
 0x124   : > { %v603_v3 = vshrl.u32 %v600_v25, 16 }
 0x125   : > { %2796 = vmatmul.bf16.gmra.mxu1 %v3390_v54  ;;  %v614_v54 = vshll.u32 %v601_v42, 16  ;;  %v3913_v42 = vld [vmem:[#allocation3 + $0x118] sm:$0xf0] }
 0x126   : > { %v2650_v51 = vpop.f32.mrf.mxu2  ;;  %v605_v2 = vrot.slane %v603_v3, 7  ;;  %v3916_v3 = vld [vmem:[#allocation3 + $0x134] sm:$0xf] }
 0x127   : > { %v2748_v29 = vpop.f32.mrf.mxu0  ;;  %v2651_v39 = vadd.f32 %v2650_v51, %v2602_v31  ;;  %v2699_v55 = vpop.f32.mrf.mxu3  ;;  %2894 = vmatmul.bf16.gmra.mxu3 %v3398_v44  ;;  %v616_v51 = vor.u32 %v614_v54, %v613_v16  ;;  %v618_v44 = vrot.slane %v613_v16, 4 }
 0x128   : > { %v609_v31 = vrot.slane %v605_v2, 4 }
 0x129   : > { %v2700_v33 = vadd.f32 %v2699_v55, %v2651_v39 }
 0x12a   : > { %v2603_v58 = vpop.f32.mrf.mxu1 }
 0x12b   : > { %v5047_v46 = vadd.f32 %v2748_v29, %v2700_v33  ;;  %v2604_v50 = vadd.f32 %v2603_v58, %v4976_v11  ;;  %v606_v11 = vshll.u32 %v600_v25, 16  ;;  %v617_v33 = vsel %vm4306_vm4, %v609_v31, %v616_v51 }
 0x12c   : > { %626 = vst [vmem:[#allocation2 + $0x70] sm:$0xf] %v617_v33 }
 0x12d   : > { %v608_v14 = vor.u32 %v606_v11, %v605_v2 }
 0x12e   : > { %v2652_v60 = vpop.f32.mrf.mxu2 }
 0x12f   : > { %v2653_v61 = vadd.f32 %v2652_v60, %v2604_v50  ;;  %v2701_v36 = vpop.f32.mrf.mxu3  ;;  %v5050_v62 = vpop.f32.mrf.mxu0  ;;  %v624_v29 = vsel %vm4315_vm5, %v608_v14, %v623_v12 }
 0x130   : > { %2943 = vmatmul.bf16.gmra.mxu0 %v3402_v27  ;;  %625 = vst [vmem:[#allocation2 + $0x6c] sm:$0xf] %v624_v29  ;;  %v3917_v29 = vld [vmem:[#allocation3 + $0x13c] sm:$0xf] }
 0x131   : > { %v5052_v7 = vadd.f32 %v2701_v36, %v2653_v61  ;;  %v3459_v61 = vld [vmem:[#allocation3 + $0x154] sm:$0xf0]  ;;  %v3470_v33 = vor.u32 %v3917_v29, %v3467_v32 }
 0x132   : > { %v2606_v20 = vpop.f32.mrf.mxu1  ;;  %v3462_v11 = vor.u32 %v3916_v3, %v3459_v61  ;;  %v3495_v3 = vld [vmem:[#allocation3 + $0x19c] sm:$0xf0] }
 0x133   : > { %2850 = vmatmul.bf16.gmra.mxu2 %v3430_v38  ;;  %v2607_v53 = vadd.f32 %v2606_v20, %v4998_v4  ;;  %v627_v4 = vld [vmem:[#allocation2 + $0x74] sm:$0x1]  ;;  %v719_v27 = vld [vmem:[#allocation2 + $0x70] sm:$0x8] }
 0x134   : > { %v628_v24 = vsel %vm4367_vm7, %v618_v44, %v627_v4  ;;  %v3284_v54 = vrot.slane %v719_v27, 11  ;;  %v1402_v4 = vrot.slane %v1400_v15, 4 }
 0x135   : > { %2801 = vmatmul.bf16.gmra.mxu1 %v3426_v9  ;;  %629 = vst [vmem:[#allocation2 + $0x74] sm:$0x1] %v628_v24  ;;  %v3437_v9 = vld [vmem:[#allocation3 + $0xf8] sm:$0xf] }
 0x136   : > { %v2655_v28 = vpop.f32.mrf.mxu2  ;;  %v3438_v14 = vor.u32 %v3913_v42, %v3437_v9 }
 0x137   : > { %v2656_v39 = vadd.f32 %v2655_v28, %v2607_v53  ;;  %v2704_v55 = vpop.f32.mrf.mxu3  ;;  %v2753_v47 = vpop.f32.mrf.mxu0  ;;  %2899 = vmatmul.bf16.gmra.mxu3 %v3434_v8  ;;  %v639_v36 = vld [vmem:[#allocation2 + $0x6c] sm:$0x2]  ;;  %v707_v20 = vld [vmem:[#allocation2 + $0x6c] sm:$0x1]  ;;  %v3930_v8 = vld [vmem:[#allocation3 + $0x1a0] sm:$0xf0] }
 0x138   : > { %v3502_v42 = vor.u32 %v3930_v8, %v3501_v30 }
 0x139   : > { %v2705_v58 = vadd.f32 %v2704_v55, %v2656_v39 }
 0x13a   : > { %v2608_v50 = vpop.f32.mrf.mxu1 }
 0x13b   : > { %v2609_v25 = vadd.f32 %v2608_v50, %v5020_v43  ;;  %v5062_v60 = vadd.f32 %v2753_v47, %v2705_v58  ;;  %v3274_v43 = vrot.slane %v639_v36, 9  ;;  %v3293_v58 = vrot.slane %v5001_v26, 9 }
 0x13c   : > { %v788_v12 = vld [vmem:[#allocation2 + $0x74] sm:$0x1] }
 0x13d   : > { %v708_v16 = vsel %vm4367_vm7, %v3274_v43, %v707_v20  ;;  %v789_v31 = vsel %vm4624_vm10, %v3284_v54, %v788_v12  ;;  %v1401_v50 = vsel %vm4644_vm14, %v3293_v58, %v1400_v15  ;;  %v3473_v20 = vld [vmem:[#allocation3 + $0x140] sm:$0xf] }
 0x13e   : > { %v2657_v18 = vpop.f32.mrf.mxu2  ;;  %709 = vst [vmem:[#allocation2 + $0x6c] sm:$0x1] %v708_v16 }
 0x13f   : > { %v2658_v38 = vadd.f32 %v2657_v18, %v2609_v25  ;;  %v2706_v49 = vpop.f32.mrf.mxu3  ;;  %v5068_v53 = vpop.f32.mrf.mxu0  ;;  %790 = vst [vmem:[#allocation2 + $0x74] sm:$0x1] %v789_v31  ;;  %v3925_v18 = vld [vmem:[#allocation3 + $0x17c] sm:$0xf] }
 0x140   : > { %2948 = vmatmul.bf16.gmra.mxu0 %v3438_v14  ;;  %1505 = vst [vmem:[#allocation3 + $0x1d0] sm:$0xf] %v1401_v50  ;;  %v3498_v14 = vor.u32 %v3925_v18, %v3495_v3 }
 0x141   : > { %v5064_v2 = vadd.f32 %v2706_v49, %v2658_v38  ;;  %1421 = vst [vmem:[#allocation3 + $0x20c] sm:$0xf] %v1401_v50 }
 0x142   : > { %v2611_v13 = vpop.f32.mrf.mxu1 }
 0x143   : > { %2855 = vmatmul.bf16.gmra.mxu2 %v3466_v59  ;;  %v2612_v28 = vadd.f32 %v2611_v13, %v4963_v10  ;;  %v1403_v10 = vrot.slane %v5005_v23, 5  ;;  %v4161_v23 = vld [vmem:[%s5179_s2] ss:$0 sm:$0xff] }
 0x145   : > { %2806 = vmatmul.bf16.gmra.mxu1 %v3462_v11  ;;  %v818_v47 = vld [vmem:[#allocation2 + $0x6c] sm:$0xff]   ;;  %v1404_v24 = vsel %vm4644_vm14, %v1402_v4, %v1403_v10  ;;  %v4162_v11 = vld [vmem:[%s5180_s3] ss:$0 sm:$0xff] }
 0x146   : > { %v2660_v51 = vpop.f32.mrf.mxu2  ;;  %v848_v25 = vunpack.c.l.bf16 %v818_v47  ;;  %v849_v48 = vunpack.c.h.bf16 %v818_v47  ;;  %v820_v17 = vld [vmem:[#allocation2 + $0x74] sm:$0x1]  ;;  %1506 = vst [vmem:[#allocation3 + $0x1f4] sm:$0xf] %v1404_v24  ;;  %v3503_v47 = vld [vmem:[#allocation3 + $0x1a4] sm:$0xf0] }
 0x147   : > { %v2661_v34 = vadd.f32 %v2660_v51, %v2612_v28  ;;  %v2709_v39 = vpop.f32.mrf.mxu3  ;;  %2904 = vmatmul.bf16.gmra.mxu3 %v3470_v33  ;;  %v850_v38 = vunpack.c.l.bf16 %v820_v17  ;;  %1422 = vst [vmem:[#allocation3 + $0x230] sm:$0xf] %v1404_v24  ;;  %v3926_v33 = vld [vmem:[#allocation3 + $0x184] sm:$0xf] }
 0x148   : > { %v882_v61 = vmul.f32 %v4161_v23, %v848_v25  ;;  %v883_v36 = vmul.f32 %v4161_v23, %v849_v48 }
 0x149   : > { %v2710_v55 = vadd.f32 %v2709_v39, %v2661_v34  ;;  %v884_v27 = vmul.f32 %v4161_v23, %v850_v38  ;;  %v3506_v23 = vor.u32 %v3926_v33, %v3503_v47 }
 0x14a   : > { %v2613_v44 = vpop.f32.mrf.mxu1  ;;  %v916_v43 = vadd.f32 %v4162_v11, %v882_v61  ;;  %v917_v13 = vadd.f32 %v4162_v11, %v883_v36 }
 0x14b   : > { %v2614_v21 = vadd.f32 %v2613_v44, %v4987_v40  ;;  %v2758_v49 = vpop.f32.mrf.mxu0  ;;  %v3922_v40 = vld [vmem:[#allocation3 + $0x160] sm:$0xf0]  ;;  %v918_v51 = vadd.f32 %v4162_v11, %v884_v27 }
 0x14c   : > { %v5087_v16 = vadd.f32 %v2758_v49, %v2710_v55  ;;  %v946_v28 = vmax.f32 %v916_v43, 0.0  ;;  %v947_v31 = vmax.f32 %v917_v13, 0.0  ;;  %v3474_v29 = vor.u32 %v3922_v40, %v3473_v20  ;;  %v3537_v20 = vld [vmem:[#allocation3 + $0x1c8] sm:$0xf]  ;;  %v3939_v40 = vld [vmem:[#allocation3 + $0x1e8] sm:$0xf0] }
 0x14d   : > { %v948_v39 = vmax.f32 %v918_v51, 0.0 }
 0x14e   : > { %v2662_v26 = vpop.f32.mrf.mxu2  ;;  %v976_v32 = vpack.c.bf16 %v946_v28, %v946_v28  ;;  %v977_v34 = vpack.c.bf16 %v947_v31, %v947_v31  ;;  %v3531_v28 = vld [vmem:[#allocation3 + $0x1e4] sm:$0xf0] }
 0x14f   : > { %v2663_v59 = vadd.f32 %v2662_v26, %v2614_v21  ;;  %v2711_v9 = vpop.f32.mrf.mxu3  ;;  %v978_v58 = vpack.c.bf16 %v948_v39, %v948_v39  ;;  %v3509_v39 = vld [vmem:[#allocation3 + $0x188] sm:$0xf] }
 0x150   : > { %1437 = vst [vmem:[#allocation3 + $0x210] sm:$0xf] %v976_v32  ;;  %v1440_v4 = vshrl.u32 %v976_v32, 16  ;;  %v1443_v55 = vshll.u32 %v976_v32, 16  ;;  %2953 = vmatmul.bf16.gmra.mxu0 %v3474_v29  ;;  %v1449_v50 = vshll.u32 %v977_v34, 16  ;;  %v1453_v24 = vshrl.u32 %v977_v34, 16 }
 0x151   : > { %v2712_v12 = vadd.f32 %v2711_v9, %v2663_v59  ;;  %1438 = vst [vmem:[#allocation3 + $0x234] sm:$0xf] %v977_v34  ;;  %v1459_v21 = vshll.u32 %v978_v58, 16  ;;  %v1486_v17 = vrot.slane %v977_v34, 5  ;;  %v3294_v38 = vrot.slane %v976_v32, 9 }
 0x152   : > { %v2616_v54 = vpop.f32.mrf.mxu1  ;;  %v1442_v25 = vrot.slane %v1440_v4, 4  ;;  %v1445_v48 = vrot.slane %v1443_v55, 5  ;;  %v1451_v26 = vrot.slane %v1449_v50, 5  ;;  %v1455_v18 = vrot.slane %v1453_v24, 4 }
 0x153   : > { %2860 = vmatmul.bf16.gmra.mxu2 %v3502_v42  ;;  %v2617_v15 = vadd.f32 %v2616_v54, %v5007_v0  ;;  %v2760_v10 = vpop.f32.mrf.mxu0  ;;  %v1488_v49 = vrot.slane %v1486_v17, 4  ;;  %v1461_v9 = vrot.slane %v1459_v21, 5  ;;  %v1489_v42 = vrot.slane %v978_v58, 5  ;;  %v3934_v54 = vld [vmem:[#allocation3 + $0x1c4] sm:$0xf] }
 0x154   : > { %v5090_v3 = vadd.f32 %v2760_v10, %v2712_v12  ;;  %v1446_v36 = vor.u32 %v1445_v48, %v1442_v25  ;;  %v1456_v59 = vor.u32 %v1455_v18, %v1451_v26  ;;  %v1487_v43 = vsel %vm4644_vm14, %v3294_v38, %v1486_v17 }
 0x155   : > { %2811 = vmatmul.bf16.gmra.mxu1 %v3498_v14  ;;  %v1490_v12 = vsel %vm4644_vm14, %v1488_v49, %v1489_v42  ;;  %1507 = vst [vmem:[#allocation3 + $0x218] sm:$0xf] %v1487_v43  ;;  %v3538_v34 = vor.u32 %v3939_v40, %v3537_v20  ;;  %v3510_v4 = vor.u32 %v3931_v41, %v3509_v39  ;;  %v3545_v49 = vld [vmem:[#allocation3 + $0x1d0] sm:$0xf] }
 0x156   : > { %v2665_v44 = vpop.f32.mrf.mxu2  ;;  %v1447_v11 = vrot.slane %v1446_v36, 4  ;;  %v1457_v27 = vrot.slane %v1456_v59, 4  ;;  %1508 = vst [vmem:[#allocation3 + $0x23c] sm:$0xf] %v1490_v12  ;;  %v3940_v59 = vld [vmem:[#allocation3 + $0x1f0] sm:$0xf0] }
 0x157   : > { %v2666_v30 = vadd.f32 %v2665_v44, %v2617_v15  ;;  %v2714_v8 = vpop.f32.mrf.mxu3  ;;  %2909 = vmatmul.bf16.gmra.mxu3 %v3506_v23  ;;  %v3534_v44 = vor.u32 %v3934_v54, %v3531_v28  ;;  %v3573_v17 = vld [vmem:[#allocation3 + $0x210] sm:$0xf]  ;;  %v3546_v43 = vor.u32 %v3940_v59, %v3545_v49 }
 0x158   : > { %v1452_v31 = vsel %vm4635_vm13, %v1447_v11, %v1451_v26  ;;  %v3567_v23 = vld [vmem:[#allocation3 + $0x22c] sm:$0xf0] }
 0x159   : > { %v2715_v0 = vadd.f32 %v2714_v8, %v2666_v30  ;;  %1479 = vst [vmem:[#allocation3 + $0x214] sm:$0xf] %v1452_v31  ;;  %v3935_v30 = vld [vmem:[#allocation3 + $0x1cc] sm:$0xf] }
 0x15a   : > { %v2618_v61 = vpop.f32.mrf.mxu1  ;;  %v3542_v48 = vor.u32 %v3935_v30, %v3539_v35 }
 0x15b   : > { %v2619_v13 = vadd.f32 %v2618_v61, %v5026_v1  ;;  %v2763_v51 = vpop.f32.mrf.mxu0  ;;  %v1462_v1 = vsel %vm4635_vm13, %v1457_v27, %v1461_v9 }
 0x15c   : > { %1480 = vst [vmem:[#allocation3 + $0x238] sm:$0xf] %v1462_v1  ;;  %v5101_v15 = vadd.f32 %v2763_v51, %v2715_v0  ;;  %v3948_v0 = vld [vmem:[#allocation3 + $0x230] sm:$0xf0]  ;;  %v3581_v1 = vld [vmem:[#allocation3 + $0x218] sm:$0xf] }
 0x15d   : > { %v3574_v38 = vor.u32 %v3948_v0, %v3573_v17  ;;  %v3949_v39 = vld [vmem:[#allocation3 + $0x238] sm:$0xf0] }
 0x15e   : > { %v2667_v14 = vpop.f32.mrf.mxu2 }
 0x15f   : > { %v2668_v29 = vadd.f32 %v2667_v14, %v2619_v13  ;;  %v2716_v32 = vpop.f32.mrf.mxu3 }
 0x160   : > { %2958 = vmatmul.bf16.gmra.mxu0 %v3510_v4  ;;  %v3944_v12 = vld [vmem:[#allocation3 + $0x214] sm:$0xf] }
 0x161   : > { %v2717_v33 = vadd.f32 %v2716_v32, %v2668_v29 }
 0x162   : > { %v2621_v58 = vpop.f32.mrf.mxu1 }
 0x163   : > { %2865 = vmatmul.bf16.gmra.mxu2 %v3538_v34  ;;  %v2622_v55 = vadd.f32 %v2621_v58, %v4974_v52  ;;  %v2765_v47 = vpop.f32.mrf.mxu0  ;;  %v3943_v52 = vld [vmem:[#allocation3 + $0x20c] sm:$0xf]  ;;  %v3575_v14 = vld [vmem:[#allocation3 + $0x234] sm:$0xf0] }
 0x164   : > { %v5104_v24 = vadd.f32 %v2765_v47, %v2717_v33  ;;  %v3570_v40 = vor.u32 %v3943_v52, %v3567_v23  ;;  %v3578_v31 = vor.u32 %v3944_v12, %v3575_v14 }
 0x165   : > { %2816 = vmatmul.bf16.gmra.mxu1 %v3534_v44  ;;  %v3582_v44 = vor.u32 %v3949_v39, %v3581_v1 }
 0x166   : > { %v2670_v10 = vpop.f32.mrf.mxu2 }
 0x167   : > { %v2671_v8 = vadd.f32 %v2670_v10, %v2622_v55  ;;  %v2719_v50 = vpop.f32.mrf.mxu3  ;;  %2914 = vmatmul.bf16.gmra.mxu3 %v3542_v48  ;;  %v2741_v48 = vadd.f32 %v5034_v37, %v5036_v45 }
 0x169   : > { %v2720_v25 = vadd.f32 %v2719_v50, %v2671_v8 }
 0x16a   : > { %v2623_v21 = vpop.f32.mrf.mxu1 }
 0x16b   : > { %v2624_v26 = vadd.f32 %v2623_v21, %v4994_v56  ;;  %v2768_v61 = vpop.f32.mrf.mxu0 }
 0x16c   : > { %v5107_v42 = vadd.f32 %v2768_v61, %v2720_v25 }
 0x16e   : > { %v2672_v18 = vpop.f32.mrf.mxu2 }
 0x16f   : > { %v2673_v36 = vadd.f32 %v2672_v18, %v2624_v26  ;;  %v2721_v9 = vpop.f32.mrf.mxu3 }
 0x170   : > { %2963 = vmatmul.bf16.gmra.mxu0 %v3546_v43 }
 0x171   : > { %v2722_v20 = vadd.f32 %v2721_v9, %v2673_v36 }
 0x172   : > { %v2626_v11 = vpop.f32.mrf.mxu1 }
 0x173   : > { %2870 = vmatmul.bf16.gmra.mxu2 %v3574_v38  ;;  %v2627_v13 = vadd.f32 %v2626_v11, %v5018_v22  ;;  %v2770_v27 = vpop.f32.mrf.mxu0 }
 0x174   : > { %v5110_v28 = vadd.f32 %v2770_v27, %v2722_v20 }
 0x175   : > { %2821 = vmatmul.bf16.gmra.mxu1 %v3570_v40 }
 0x176   : > { %v2675_v56 = vpop.f32.mrf.mxu2 }
 0x177   : > { %v2676_v54 = vadd.f32 %v2675_v56, %v2627_v13  ;;  %2919 = vmatmul.bf16.gmra.mxu3 %v3578_v31 }
 0x17a   : > { %v2628_v51 = vpop.f32.mrf.mxu1  ;;  %v2724_v22 = vpop.f32.mrf.mxu3 }
 0x17b   : > { %v2629_v29 = vadd.f32 %v2628_v51, %v5028_v57  ;;  %v2725_v41 = vadd.f32 %v2724_v22, %v2676_v54 }
 0x17d   : > { %v2773_v58 = vpop.f32.mrf.mxu0 }
 0x17e   : > { %v2677_v32 = vpop.f32.mrf.mxu2  ;;  %v5113_v4 = vadd.f32 %v2773_v58, %v2725_v41 }
 0x17f   : > { %v2678_v34 = vadd.f32 %v2677_v32, %v2629_v29 }
 0x180   : > { %2968 = vmatmul.bf16.gmra.mxu0 %v3582_v44 }
 0x182   : > { %v2787_v33 = vpop.f32.mrf.mxu1  ;;  %v2726_v10 = vpop.f32.mrf.mxu3 }
 0x183   : > { %v2727_v47 = vadd.f32 %v2726_v10, %v2678_v34  ;;  %v2788_v50 = vadd.f32 %v2787_v33, %v5032_v5 }
 0x185   : > { %v2775_v30 = vpop.f32.mrf.mxu0 }
 0x186   : > { %v2836_v55 = vpop.f32.mrf.mxu2  ;;  %v5116_v35 = vadd.f32 %v2775_v30, %v2727_v47 }
 0x187   : > { %v2837_v17 = vadd.f32 %v2836_v55, %v2788_v50  ;;  %v2751_v50 = vadd.f32 %v5050_v62, %v5052_v7 }
 0x18a   : > { %v2789_v57 = vpop.f32.mrf.mxu1  ;;  %v2885_v25 = vpop.f32.mrf.mxu3 }
 0x18b   : > { %v2790_v26 = vadd.f32 %v2789_v57, %v2741_v48  ;;  %v2886_v23 = vadd.f32 %v2885_v25, %v2837_v17 }
 0x18d   : > { %v2934_v0 = vpop.f32.mrf.mxu0 }
 0x18e   : > { %v2838_v8 = vpop.f32.mrf.mxu2  ;;  %v2935_v49 = vadd.f32 %v2934_v0, %v2886_v23 }
 0x18f   : > { %v2839_v18 = vadd.f32 %v2838_v8, %v2790_v26 }
 0x190   : > { %v3028_v20 = vmul.f32 %v2935_v49, %v2935_v49 }
 0x192   : > { %v2792_v21 = vpop.f32.mrf.mxu1  ;;  %v2887_v61 = vpop.f32.mrf.mxu3 }
 0x193   : > { %v2888_v36 = vadd.f32 %v2887_v61, %v2839_v18  ;;  %v2793_v59 = vadd.f32 %v2792_v21, %v5038_v6  ;;  %v2746_v6 = vadd.f32 %v5041_v63, %v5043_v19 }
 0x195   : > { %v2936_v5 = vpop.f32.mrf.mxu0 }
 0x196   : > { %v2841_v52 = vpop.f32.mrf.mxu2  ;;  %v2937_v9 = vadd.f32 %v2936_v5, %v2888_v36 }
 0x197   : > { %v2842_v37 = vadd.f32 %v2841_v52, %v2793_v59 }
 0x198   : > { %v4045_v40 = vpack.c.bf16 %v2937_v9, %v2935_v49  ;;  %v3006_v11 = vadd.f32 %v2937_v9, %v2935_v49  ;;  %v3029_v43 = vmul.f32 %v2937_v9, %v2937_v9 }
 0x19a   : > { %v2794_v38 = vpop.f32.mrf.mxu1  ;;  %4046 = vst [vmem:[%s5127_s28] sm:$0xff] %v4045_v40   ;;  %v3044_v13 = vadd.f32 %v3029_v43, %v3028_v20  ;;  %v2890_v56 = vpop.f32.mrf.mxu3 }
 0x19b   : > { %v2891_v27 = vadd.f32 %v2890_v56, %v2842_v37  ;;  %v2795_v54 = vadd.f32 %v2794_v38, %v2746_v6 }
 0x19d   : > { %v2939_v14 = vpop.f32.mrf.mxu0 }
 0x19e   : > { %v2843_v45 = vpop.f32.mrf.mxu2  ;;  %v2940_v31 = vadd.f32 %v2939_v14, %v2891_v27 }
 0x19f   : > { %v2844_v51 = vadd.f32 %v2843_v45, %v2795_v54 }
 0x1a0   : > { %v3007_v32 = vadd.f32 %v3006_v11, %v2940_v31  ;;  %v3030_v34 = vmul.f32 %v2940_v31, %v2940_v31  ;;  %v2756_v11 = vadd.f32 %v5068_v53, %v5064_v2 }
 0x1a2   : > { %v2797_v12 = vpop.f32.mrf.mxu1  ;;  %v3045_v1 = vadd.f32 %v3044_v13, %v3030_v34  ;;  %v2892_v39 = vpop.f32.mrf.mxu3 }
 0x1a3   : > { %v2893_v22 = vadd.f32 %v2892_v39, %v2844_v51  ;;  %v2798_v44 = vadd.f32 %v2797_v12, %v5047_v46 }
 0x1a5   : > { %v2941_v33 = vpop.f32.mrf.mxu0 }
 0x1a6   : > { %v2846_v29 = vpop.f32.mrf.mxu2  ;;  %v2942_v58 = vadd.f32 %v2941_v33, %v2893_v22 }
 0x1a7   : > { %v2847_v55 = vadd.f32 %v2846_v29, %v2798_v44 }
 0x1a8   : > { %v4050_v63 = vpack.c.bf16 %v2942_v58, %v2940_v31  ;;  %v3008_v19 = vadd.f32 %v3007_v32, %v2942_v58  ;;  %v3031_v47 = vmul.f32 %v2942_v58, %v2942_v58 }
 0x1aa   : > { %v2799_v41 = vpop.f32.mrf.mxu1  ;;  %4086 = vst [vmem:[%s5127_s28 + $0x8] sm:$0xff] %v4050_v63   ;;  %v3046_v57 = vadd.f32 %v3045_v1, %v3031_v47  ;;  %v2895_v30 = vpop.f32.mrf.mxu3 }
 0x1ab   : > { %v2896_v8 = vadd.f32 %v2895_v30, %v2847_v55  ;;  %v2800_v21 = vadd.f32 %v2799_v41, %v2751_v50 }
 0x1ad   : > { %v2944_v48 = vpop.f32.mrf.mxu0 }
 0x1ae   : > { %v2848_v10 = vpop.f32.mrf.mxu2  ;;  %v2945_v17 = vadd.f32 %v2944_v48, %v2896_v8 }
 0x1af   : > { %v2849_v0 = vadd.f32 %v2848_v10, %v2800_v21 }
 0x1b0   : > { %v3009_v26 = vadd.f32 %v3008_v19, %v2945_v17  ;;  %v3032_v18 = vmul.f32 %v2945_v17, %v2945_v17 }
 0x1b2   : > { %v2802_v25 = vpop.f32.mrf.mxu1  ;;  %v3047_v52 = vadd.f32 %v3046_v57, %v3032_v18  ;;  %v2897_v23 = vpop.f32.mrf.mxu3 }
 0x1b3   : > { %v2898_v61 = vadd.f32 %v2897_v23, %v2849_v0  ;;  %v2803_v49 = vadd.f32 %v2802_v25, %v5062_v60 }
 0x1b5   : > { %v2946_v38 = vpop.f32.mrf.mxu0 }
 0x1b6   : > { %v2851_v46 = vpop.f32.mrf.mxu2  ;;  %v2947_v5 = vadd.f32 %v2946_v38, %v2898_v61 }
 0x1b7   : > { %v2852_v59 = vadd.f32 %v2851_v46, %v2803_v49 }
 0x1b8   : > { %v4055_v62 = vpack.c.bf16 %v2947_v5, %v2945_v17  ;;  %v3010_v7 = vadd.f32 %v3009_v26, %v2947_v5  ;;  %v3033_v37 = vmul.f32 %v2947_v5, %v2947_v5 }
 0x1ba   : > { %v2804_v36 = vpop.f32.mrf.mxu1  ;;  %4087 = vst [vmem:[%s5127_s28 + $0x10] sm:$0xff] %v4055_v62   ;;  %v3048_v45 = vadd.f32 %v3047_v52, %v3033_v37  ;;  %v2900_v20 = vpop.f32.mrf.mxu3 }
 0x1bb   : > { %v2901_v40 = vadd.f32 %v2900_v20, %v2852_v59  ;;  %v2805_v56 = vadd.f32 %v2804_v36, %v2756_v11 }
 0x1bd   : > { %v2949_v13 = vpop.f32.mrf.mxu0 }
 0x1be   : > { %v2853_v9 = vpop.f32.mrf.mxu2  ;;  %v2950_v27 = vadd.f32 %v2949_v13, %v2901_v40 }
 0x1bf   : > { %v2854_v6 = vadd.f32 %v2853_v9, %v2805_v56 }
 0x1c0   : > { %v3011_v12 = vadd.f32 %v3010_v7, %v2950_v27  ;;  %v3034_v14 = vmul.f32 %v2950_v27, %v2950_v27 }
 0x1c2   : > { %v2807_v43 = vpop.f32.mrf.mxu1  ;;  %v3049_v54 = vadd.f32 %v3048_v45, %v3034_v14  ;;  %v2902_v31 = vpop.f32.mrf.mxu3 }
 0x1c3   : > { %v2903_v51 = vadd.f32 %v2902_v31, %v2854_v6  ;;  %v2808_v34 = vadd.f32 %v2807_v43, %v5087_v16 }
 0x1c5   : > { %v2951_v32 = vpop.f32.mrf.mxu0 }
 0x1c6   : > { %v2856_v60 = vpop.f32.mrf.mxu2  ;;  %v2952_v1 = vadd.f32 %v2951_v32, %v2903_v51 }
 0x1c7   : > { %v2857_v39 = vadd.f32 %v2856_v60, %v2808_v34 }
 0x1c8   : > { %v4060_v2 = vpack.c.bf16 %v2952_v1, %v2950_v27  ;;  %v3012_v53 = vadd.f32 %v3011_v12, %v2952_v1  ;;  %v3035_v41 = vmul.f32 %v2952_v1, %v2952_v1 }
 0x1ca   : > { %v2809_v29 = vpop.f32.mrf.mxu1  ;;  %4088 = vst [vmem:[%s5127_s28 + $0x18] sm:$0xff] %v4060_v2   ;;  %v3050_v33 = vadd.f32 %v3049_v54, %v3035_v41  ;;  %v2905_v44 = vpop.f32.mrf.mxu3 }
 0x1cb   : > { %v2906_v58 = vadd.f32 %v2905_v44, %v2857_v39  ;;  %v2810_v63 = vadd.f32 %v2809_v29, %v5090_v3 }
 0x1cd   : > { %v2954_v10 = vpop.f32.mrf.mxu0 }
 0x1ce   : > { %v2858_v22 = vpop.f32.mrf.mxu2  ;;  %v2955_v19 = vadd.f32 %v2954_v10, %v2906_v58 }
 0x1cf   : > { %v2859_v47 = vadd.f32 %v2858_v22, %v2810_v63 }
 0x1d0   : > { %v3013_v30 = vadd.f32 %v3012_v53, %v2955_v19  ;;  %v3036_v16 = vmul.f32 %v2955_v19, %v2955_v19 }
 0x1d2   : > { %v2812_v55 = vpop.f32.mrf.mxu1  ;;  %v3051_v8 = vadd.f32 %v3050_v33, %v3036_v16  ;;  %v2907_v50 = vpop.f32.mrf.mxu3 }
 0x1d3   : > { %v2908_v25 = vadd.f32 %v2907_v50, %v2859_v47  ;;  %v2813_v17 = vadd.f32 %v2812_v55, %v5101_v15 }
 0x1d5   : > { %v2956_v21 = vpop.f32.mrf.mxu0 }
 0x1d6   : > { %v2861_v57 = vpop.f32.mrf.mxu2  ;;  %v2957_v0 = vadd.f32 %v2956_v21, %v2908_v25 }
 0x1d7   : > { %v2862_v46 = vadd.f32 %v2861_v57, %v2813_v17 }
 0x1d8   : > { %v4065_v18 = vpack.c.bf16 %v2957_v0, %v2955_v19  ;;  %v3014_v52 = vadd.f32 %v3013_v30, %v2957_v0  ;;  %v3037_v23 = vmul.f32 %v2957_v0, %v2957_v0 }
 0x1da   : > { %v2814_v48 = vpop.f32.mrf.mxu1  ;;  %4089 = vst [vmem:[%s5127_s28 + $0x20] sm:$0xff] %v4065_v18   ;;  %v3052_v3 = vadd.f32 %v3051_v8, %v3037_v23  ;;  %v2910_v61 = vpop.f32.mrf.mxu3 }
 0x1db   : > { %v2911_v36 = vadd.f32 %v2910_v61, %v2862_v46  ;;  %v2815_v5 = vadd.f32 %v2814_v48, %v5104_v24 }
 0x1dd   : > { %v2959_v49 = vpop.f32.mrf.mxu0 }
 0x1de   : > { %v2863_v26 = vpop.f32.mrf.mxu2  ;;  %v2960_v59 = vadd.f32 %v2959_v49, %v2911_v36 }
 0x1df   : > { %v2864_v9 = vadd.f32 %v2863_v26, %v2815_v5 }
 0x1e0   : > { %v3015_v7 = vadd.f32 %v3014_v52, %v2960_v59  ;;  %v3038_v15 = vmul.f32 %v2960_v59, %v2960_v59 }
 0x1e2   : > { %v2817_v38 = vpop.f32.mrf.mxu1  ;;  %v3053_v37 = vadd.f32 %v3052_v3, %v3038_v15  ;;  %v2912_v45 = vpop.f32.mrf.mxu3 }
 0x1e3   : > { %v2913_v20 = vadd.f32 %v2912_v45, %v2864_v9  ;;  %v2818_v11 = vadd.f32 %v2817_v38, %v5107_v42 }
 0x1e5   : > { %v2961_v40 = vpop.f32.mrf.mxu0 }
 0x1e6   : > { %v2866_v62 = vpop.f32.mrf.mxu2  ;;  %v2962_v43 = vadd.f32 %v2961_v40, %v2913_v20 }
 0x1e7   : > { %v2867_v56 = vadd.f32 %v2866_v62, %v2818_v11 }
 0x1e8   : > { %v4070_v27 = vpack.c.bf16 %v2962_v43, %v2960_v59  ;;  %v3016_v6 = vadd.f32 %v3015_v7, %v2962_v43  ;;  %v3039_v60 = vmul.f32 %v2962_v43, %v2962_v43 }
 0x1ea   : > { %v2819_v13 = vpop.f32.mrf.mxu1  ;;  %4090 = vst [vmem:[%s5127_s28 + $0x28] sm:$0xff] %v4070_v27   ;;  %v3054_v24 = vadd.f32 %v3053_v37, %v3039_v60  ;;  %v2915_v14 = vpop.f32.mrf.mxu3 }
 0x1eb   : > { %v2916_v54 = vadd.f32 %v2915_v14, %v2867_v56  ;;  %v2820_v51 = vadd.f32 %v2819_v13, %v5110_v28 }
 0x1ed   : > { %v2964_v31 = vpop.f32.mrf.mxu0 }
 0x1ee   : > { %v2868_v12 = vpop.f32.mrf.mxu2  ;;  %v2965_v29 = vadd.f32 %v2964_v31, %v2916_v54 }
 0x1ef   : > { %v2869_v32 = vadd.f32 %v2868_v12, %v2820_v51 }
 0x1f0   : > { %v3017_v34 = vadd.f32 %v3016_v6, %v2965_v29  ;;  %v3040_v1 = vmul.f32 %v2965_v29, %v2965_v29 }
 0x1f2   : > { %v2822_v42 = vpop.f32.mrf.mxu1  ;;  %v3055_v39 = vadd.f32 %v3054_v24, %v3040_v1  ;;  %v2917_v22 = vpop.f32.mrf.mxu3 }
 0x1f3   : > { %v2918_v53 = vadd.f32 %v2917_v22, %v2869_v32  ;;  %v2823_v33 = vadd.f32 %v2822_v42, %v5113_v4 }
 0x1f5   : > { %v2966_v41 = vpop.f32.mrf.mxu0 }
 0x1f6   : > { %v2871_v2 = vpop.f32.mrf.mxu2  ;;  %v2967_v44 = vadd.f32 %v2966_v41, %v2918_v53 }
 0x1f7   : > { %v2872_v58 = vadd.f32 %v2871_v2, %v2823_v33 }
 0x1f8   : > { %v4075_v55 = vpack.c.bf16 %v2967_v44, %v2965_v29  ;;  %v3018_v10 = vadd.f32 %v3017_v34, %v2967_v44  ;;  %v3041_v63 = vmul.f32 %v2967_v44, %v2967_v44 }
 0x1fa   : > { %4091 = vst [vmem:[%s5127_s28 + $0x30] sm:$0xff] %v4075_v55   ;;  %v3056_v28 = vadd.f32 %v3055_v39, %v3041_v63  ;;  %v2920_v19 = vpop.f32.mrf.mxu3  ;;  %v2824_v47 = vpop.f32.mrf.mxu1 }
 0x1fb   : > { %v2921_v57 = vadd.f32 %v2920_v19, %v2872_v58  ;;  %v2825_v8 = vadd.f32 %v2824_v47, %v5116_v35 }
 0x1fd   : > { %v2969_v16 = vpop.f32.mrf.mxu0 }
 0x1fe   : > { %v2873_v30 = vpop.f32.mrf.mxu2  ;;  %v2970_v50 = vadd.f32 %v2969_v16, %v2921_v57 }
 0x1ff   : > { %v2874_v25 = vadd.f32 %v2873_v30, %v2825_v8 }
 0x200   : > { %v3019_v4 = vadd.f32 %v3018_v10, %v2970_v50  ;;  %v3042_v48 = vmul.f32 %v2970_v50, %v2970_v50 }
 0x202   : > { %v3057_v21 = vadd.f32 %v3056_v28, %v3042_v48  ;;  %v2922_v17 = vpop.f32.mrf.mxu3 }
 0x203   : > { %v2923_v0 = vadd.f32 %v2922_v17, %v2874_v25 }
 0x205   : > { %v2971_v46 = vpop.f32.mrf.mxu0 }
 0x206   : > { %v2972_v26 = vadd.f32 %v2971_v46, %v2923_v0 }
 0x208   : > { %v4080_v18 = vpack.c.bf16 %v2972_v26, %v2970_v50  ;;  %v3020_v52 = vadd.f32 %v3019_v4, %v2972_v26  ;;  %v3043_v23 = vmul.f32 %v2972_v26, %v2972_v26 }
 0x20a   : > { %4092 = vst [vmem:[%s5127_s28 + $0x38] sm:$0xff] %v4080_v18   ;;  %v3021_v3 = vrot.slane %v3020_v52, 4  ;;  %v3058_v61 = vadd.f32 %v3057_v21, %v3043_v23 }
 0x20c   : > { %v3022_v35 = vadd.f32 %v3021_v3, %v3020_v52  ;;  %v3059_v36 = vrot.slane %v3058_v61, 4 }
 0x20e   : > { %v3023_v38 = vrot.slane %v3022_v35, 2  ;;  %v3060_v49 = vadd.f32 %v3059_v36, %v3058_v61 }
 0x210   : > { %v3024_v5 = vadd.f32 %v3023_v38, %v3022_v35  ;;  %v3061_v59 = vrot.slane %v3060_v49, 2 }
 0x212   : > { %v3025_v9 = vrot.slane %v3024_v5, 1  ;;  %v3062_v62 = vadd.f32 %v3061_v59, %v3060_v49 }
 0x214   : > { %v3026_v7 = vadd.f32 %v3025_v9, %v3024_v5  ;;  %v3063_v15 = vrot.slane %v3062_v62, 1 }
 0x216   : > { %3027 = vst [vmem:[%s306_s8] sm:$0x1] %v3026_v7  ;;  %v3064_v37 = vadd.f32 %v3063_v15, %v3062_v62 }
 0x218   : > { %3065 = vst [vmem:[%s313_s11] sm:$0x1] %v3064_v37 }
 0x219 PF: > { %s17_s25 = sadd.s32 1, %s4201_s25   ;;  %s5196_s21 = smov %s4193_s23 }
 0x21a   : > { %p14_p10 = scmp.ge.s32.totalorder %s17_s25, 6   ;;  %s5197_s22 = smov %s4197_s24 }
 0x21b   : > { %s5198_s23 = smov %s5201_s26  ;;  %s5199_s24 = smov %s5205_s27 }
 0x21c   :  { %16 = sbr.rel (!%p14_p10) target bundleno = 3 (0x3), region = 95 }

</bundles_post_ra>
